<compile_context>
chip_gen: v7x
topology: tpu7x:2x2x1
jax: 0.10.0
libtpu: 0.0.40
codegen_flags: <defaults>
</compile_context>

<pallas_src>
from functools import partial

import numpy as np
import jax
import jax.numpy as jnp
from jax import lax
from jax.experimental import pallas as pl
from jax.experimental.pallas import tpu as pltpu


def _round_up(x, m):
    return (x + m - 1) // m * m


# ---------------------------------------------------------------------------
# Fused kernel factory (gate order matches PyTorch nn.LSTM: [i, f, g, o]).
# ---------------------------------------------------------------------------
def _make_fused_rnn_kernel(num_layers, has_multilayer):
    def kernel(*refs):
        if has_multilayer:
            (x_ref, wih0_ref, wih_rest_ref, whh_ref, b_ref, fcw_ref, fcb_ref,
             out_ref, seq_scr, gx_scr, h_scr, c_scr) = refs
        else:
            (x_ref, wih0_ref, whh_ref, b_ref, fcw_ref, fcb_ref,
             out_ref, seq_scr, gx_scr, h_scr, c_scr) = refs
            wih_rest_ref = None

        Bp, Hp = h_scr.shape
        T = gx_scr.shape[0] // Bp
        L = num_layers

        def fast_sigmoid(v):
            # sigmoid(x) = 0.5 * tanh(0.5 * x) + 0.5  -> single EUP op
            return 0.5 * jnp.tanh(0.5 * v) + 0.5

        for l in range(L):                       # static unroll over layers
            # Hoisted input projection for ALL timesteps: one big MXU matmul.
            if l == 0:
                gx_scr[...] = (
                    jnp.dot(x_ref[...], wih0_ref[...],
                            preferred_element_type=jnp.float32)
                    + b_ref[0]
                )
            else:
                gx_scr[...] = (
                    jnp.dot(seq_scr[...], wih_rest_ref[l - 1],
                            preferred_element_type=jnp.float32)
                    + b_ref[l]
                )

            h_scr[...] = jnp.zeros_like(h_scr)   # h0 = c0 = 0
            c_scr[...] = jnp.zeros_like(c_scr)

            w_hh_l = whh_ref[l]                  # loop-invariant (VMEM resident)
            write_seq = (l != L - 1)             # last layer's seq never read

            def step(t, carry, w_hh_l=w_hh_l, write_seq=write_seq):
                row = pl.multiple_of(t * Bp, Bp)
                gates = gx_scr[pl.ds(row, Bp), :] + jnp.dot(
                    h_scr[...], w_hh_l, preferred_element_type=jnp.float32)
                # Hp is a multiple of 128 -> every gate slice is lane-aligned.
                i_g = fast_sigmoid(gates[:, 0 * Hp:1 * Hp])
                f_g = fast_sigmoid(gates[:, 1 * Hp:2 * Hp])
                g_g = jnp.tanh(gates[:, 2 * Hp:3 * Hp])
                o_g = fast_sigmoid(gates[:, 3 * Hp:4 * Hp])
                c_new = f_g * c_scr[...] + i_g * g_g
                h_new = o_g * jnp.tanh(c_new)
                c_scr[...] = c_new
                h_scr[...] = h_new
                if write_seq:
                    seq_scr[pl.ds(row, Bp), :] = h_new   # input for next layer
                return carry

            lax.fori_loop(0, T, step, 0, unroll=True)

        # Fused FC head on the last hidden state (single lane-dense store).
        out_ref[...] = (
            jnp.dot(h_scr[...], fcw_ref[...],
                    preferred_element_type=jnp.float32)
            + fcb_ref[...]
        ).astype(out_ref.dtype)

    return kernel


# ---------------------------------------------------------------------------
# One-time (host-side) weight packing: lane-aligned padded gate layout.
# ---------------------------------------------------------------------------
def pack_params(params, input_size):
    L = len(params["lstm"])
    H = int(np.shape(params["lstm"][0]["w_hh"])[0])
    D = int(input_size)
    O = int(np.shape(params["fc_w"])[1])

    Hp = _round_up(H, 128)
    Dp = _round_up(D, 128)
    Op = _round_up(O, 128)
    G = 4 * Hp

    wih0 = np.zeros((Dp, G), np.float32)
    wih_rest = np.zeros((L - 1, Hp, G), np.float32) if L > 1 else None
    whh = np.zeros((L, Hp, G), np.float32)
    b = np.zeros((L, 1, G), np.float32)

    for l, layer in enumerate(params["lstm"]):
        w_ih = np.asarray(layer["w_ih"], np.float32)
        w_hh = np.asarray(layer["w_hh"], np.float32)
        bb = np.asarray(layer["b"], np.float32)
        d_in = w_ih.shape[0]
        for g in range(4):   # remap each gate into its lane-aligned slot
            if l == 0:
                wih0[:d_in, g * Hp:g * Hp + H] = w_ih[:, g * H:(g + 1) * H]
            else:
                wih_rest[l - 1, :d_in, g * Hp:g * Hp + H] = \
                    w_ih[:, g * H:(g + 1) * H]
            whh[l, :H, g * Hp:g * Hp + H] = w_hh[:, g * H:(g + 1) * H]
            b[l, 0, g * Hp:g * Hp + H] = bb[g * H:(g + 1) * H]

    fcw = np.zeros((Hp, Op), np.float32)
    fcw[:H, :O] = np.asarray(params["fc_w"], np.float32)
    fcb = np.zeros((1, Op), np.float32)
    fcb[0, :O] = np.asarray(params["fc_b"], np.float32)

    return {
        "wih0": jnp.asarray(wih0),
        "wih_rest": jnp.asarray(wih_rest) if wih_rest is not None else None,
        "whh": jnp.asarray(whh),
        "b": jnp.asarray(b),
        "fcw": jnp.asarray(fcw),
        "fcb": jnp.asarray(fcb),
        "out_size": O,
    }


# ---------------------------------------------------------------------------
# Jitted forward: only x transpose/pad + one pallas_call per invocation.
# ---------------------------------------------------------------------------
@partial(jax.jit, static_argnames=("out_size",))
def _rnn_forward_impl(x, wih0, wih_rest, whh, b, fcw, fcb, *, out_size):
    B, T, D = x.shape
    Dp = wih0.shape[0]
    L, Hp, G = whh.shape
    Op = fcw.shape[1]
    Bp = _round_up(B, 8)                                  # f32 sublane min

    # (B,T,D) -> (T,B,D) -> zero-pad -> (T*Bp, Dp)
    x_tm = jnp.transpose(x.astype(jnp.float32), (1, 0, 2))
    x_p = jnp.zeros((T, Bp, Dp), jnp.float32).at[:, :B, :D].set(x_tm)
    x_p = x_p.reshape(T * Bp, Dp)

    has_multilayer = wih_rest is not None
    kernel = _make_fused_rnn_kernel(L, has_multilayer)

    inputs = [x_p, wih0]
    in_specs = [
        pl.BlockSpec((T * Bp, Dp), lambda: (0, 0)),
        pl.BlockSpec((Dp, G), lambda: (0, 0)),
    ]
    if has_multilayer:
        inputs.append(wih_rest)
        in_specs.append(pl.BlockSpec((L - 1, Hp, G), lambda: (0, 0, 0)))
    inputs += [whh, b, fcw, fcb]
    in_specs += [
        pl.BlockSpec((L, Hp, G), lambda: (0, 0, 0)),
        pl.BlockSpec((L, 1, G), lambda: (0, 0, 0)),
        pl.BlockSpec((Hp, Op), lambda: (0, 0)),
        pl.BlockSpec((1, Op), lambda: (0, 0)),
    ]

    out_p = pl.pallas_call(
        kernel,
        out_shape=jax.ShapeDtypeStruct((Bp, Op), jnp.float32),
        in_specs=in_specs,
        out_specs=pl.BlockSpec((Bp, Op), lambda: (0, 0)),
        scratch_shapes=[
            pltpu.VMEM((T * Bp, Hp), jnp.float32),   # inter-layer h sequence
            pltpu.VMEM((T * Bp, G), jnp.float32),    # hoisted x @ W_ih + b
            pltpu.VMEM((Bp, Hp), jnp.float32),       # h
            pltpu.VMEM((Bp, Hp), jnp.float32),       # c
        ],
    )(*inputs)
    return out_p[:B, :out_size]


def rnn_forward(x, packed):
    """x: (B, T, input_size) batch-first, like the PyTorch module."""
    return _rnn_forward_impl(
        x, packed["wih0"], packed["wih_rest"], packed["whh"], packed["b"],
        packed["fcw"], packed["fcb"], out_size=packed["out_size"])


# ---------------------------------------------------------------------------
# Parameter init (mimics PyTorch's U(-1/sqrt(H), 1/sqrt(H))) + pure-JAX ref.
# ---------------------------------------------------------------------------
def init_rnn_params(key, input_size, hidden_size, num_layers, output_size):
    params = {"lstm": []}
    bound = 1.0 / (hidden_size ** 0.5)
    d_in = input_size
    for _ in range(num_layers):
        key, k1, k2, k3, k4 = jax.random.split(key, 5)
        w_ih = jax.random.uniform(k1, (d_in, 4 * hidden_size), jnp.float32,
                                  -bound, bound)
        w_hh = jax.random.uniform(k2, (hidden_size, 4 * hidden_size),
                                  jnp.float32, -bound, bound)
        b_ih = jax.random.uniform(k3, (4 * hidden_size,), jnp.float32,
                                  -bound, bound)
        b_hh = jax.random.uniform(k4, (4 * hidden_size,), jnp.float32,
                                  -bound, bound)
        params["lstm"].append({"w_ih": w_ih, "w_hh": w_hh, "b": b_ih + b_hh})
        d_in = hidden_size
    key, k1, k2 = jax.random.split(key, 3)
    params["fc_w"] = jax.random.uniform(k1, (hidden_size, output_size),
                                        jnp.float32, -bound, bound)
    params["fc_b"] = jax.random.uniform(k2, (output_size,), jnp.float32,
                                        -bound, bound)
    return params


def rnn_reference(x, params):
    """Pure-JAX (non-Pallas) reference for correctness checking."""
    _, T, _ = x.shape
    seq = jnp.transpose(x.astype(jnp.float32), (1, 0, 2))   # (T, B, D)
    for layer in params["lstm"]:
        H = layer["w_hh"].shape[0]
        B = seq.shape[1]
        h = jnp.zeros((B, H), jnp.float32)
        c = jnp.zeros((B, H), jnp.float32)
        outs = []
        for t in range(T):
            g = seq[t] @ layer["w_ih"] + h @ layer["w_hh"] + layer["b"]
            i = jax.nn.sigmoid(g[:, 0 * H:1 * H])
            f = jax.nn.sigmoid(g[:, 1 * H:2 * H])
            gg = jnp.tanh(g[:, 2 * H:3 * H])
            o = jax.nn.sigmoid(g[:, 3 * H:4 * H])
            c = f * c + i * gg
            h = o * jnp.tanh(c)
            outs.append(h)
        seq = jnp.stack(outs)
    return seq[-1] @ params["fc_w"] + params["fc_b"]


if __name__ == "__main__":
    input_size, hidden_size, num_layers, output_size = 4, 32, 2, 5
    batch, seq_len = 2, 8

    key = jax.random.PRNGKey(0)
    key, kx, kp = jax.random.split(key, 3)
    x = jax.random.normal(kx, (batch, seq_len, input_size), jnp.float32)
    params = init_rnn_params(kp, input_size, hidden_size, num_layers,
                             output_size)

    packed = pack_params(params, input_size)   # one-time packing (host side)

    out = rnn_forward(x, packed)
    jax.block_until_ready(out)
    assert out.shape == (batch, output_size)

    ref = rnn_reference(x, params)
    assert jnp.allclose(out, ref, atol=2e-3, rtol=2e-3), (
        "max abs diff %e" % float(jnp.max(jnp.abs(out - ref))))
    print("KERNEL_OK")
</pallas_src>

<mosaic_0001>
module attributes {stable_mosaic.version = 11 : i64} {
  func.func @kernel(%arg0: memref<64x128xf32, #tpu.memory_space<vmem>>, %arg1: memref<128x512xf32, #tpu.memory_space<vmem>>, %arg2: memref<1x128x512xf32, #tpu.memory_space<vmem>>, %arg3: memref<2x128x512xf32, #tpu.memory_space<vmem>>, %arg4: memref<2x1x512xf32, #tpu.memory_space<vmem>>, %arg5: memref<128x128xf32, #tpu.memory_space<vmem>>, %arg6: memref<1x128xf32, #tpu.memory_space<vmem>>, %arg7: memref<8x128xf32, #tpu.memory_space<vmem>>, %arg8: memref<64x128xf32, #tpu.memory_space<vmem>>, %arg9: memref<64x512xf32, #tpu.memory_space<vmem>>, %arg10: memref<8x128xf32, #tpu.memory_space<vmem>>, %arg11: memref<8x128xf32, #tpu.memory_space<vmem>>) attributes {dimension_semantics = [], scalar_prefetch = 0 : i64, scratch_operands = 4 : i64, tpu.core_type = #tpu.core_type<tc>} {
    %c0 = arith.constant 0 : index
    %c0_0 = arith.constant 0 : index
    %0 = vector.load %arg0[%c0, %c0_0] : memref<64x128xf32, #tpu.memory_space<vmem>>, vector<64x128xf32>
    %c0_1 = arith.constant 0 : index
    %c0_2 = arith.constant 0 : index
    %1 = vector.load %arg1[%c0_1, %c0_2] : memref<128x512xf32, #tpu.memory_space<vmem>>, vector<128x512xf32>
    %cst = arith.constant dense<0.000000e+00> : vector<64x512xf32>
    %2 = tpu.matmul %0, %1, %cst {dimension_numbers = #tpu.dot_dimension_numbers<[1], [0], [0], [1], [0, 0, 1, 1], [], []>} : vector<64x128xf32>, vector<128x512xf32>, vector<64x512xf32> -> vector<64x512xf32>
    %c0_3 = arith.constant 0 : index
    %c0_4 = arith.constant 0 : index
    %c0_5 = arith.constant 0 : index
    %3 = vector.load %arg4[%c0_3, %c0_4, %c0_5] : memref<2x1x512xf32, #tpu.memory_space<vmem>>, vector<1x1x512xf32>
    %4 = vector.shape_cast %3 : vector<1x1x512xf32> to vector<1x512xf32>
    %5 = vector.broadcast %4 : vector<1x512xf32> to vector<64x512xf32>
    %6 = arith.addf %2, %5 : vector<64x512xf32>
    %c0_6 = arith.constant 0 : index
    %c0_7 = arith.constant 0 : index
    %7 = vector.load %arg9[%c0_6, %c0_7] : memref<64x512xf32, #tpu.memory_space<vmem>>, vector<64x512xf32>
    tpu.vector_store %arg9[%c0_6, %c0_7], %6 {strides = array<i32>} : memref<64x512xf32, #tpu.memory_space<vmem>>, vector<64x512xf32>,
    %cst_8 = arith.constant 0.000000e+00 : f32
    %8 = vector.broadcast %cst_8 : f32 to vector<8x128xf32>
    %c0_9 = arith.constant 0 : index
    %c0_10 = arith.constant 0 : index
    %9 = vector.load %arg10[%c0_9, %c0_10] : memref<8x128xf32, #tpu.memory_space<vmem>>, vector<8x128xf32>
    tpu.vector_store %arg10[%c0_9, %c0_10], %8 {strides = array<i32>} : memref<8x128xf32, #tpu.memory_space<vmem>>, vector<8x128xf32>,
    %cst_11 = arith.constant 0.000000e+00 : f32
    %10 = vector.broadcast %cst_11 : f32 to vector<8x128xf32>
    %c0_12 = arith.constant 0 : index
    %c0_13 = arith.constant 0 : index
    %11 = vector.load %arg11[%c0_12, %c0_13] : memref<8x128xf32, #tpu.memory_space<vmem>>, vector<8x128xf32>
    tpu.vector_store %arg11[%c0_12, %c0_13], %10 {strides = array<i32>} : memref<8x128xf32, #tpu.memory_space<vmem>>, vector<8x128xf32>,
    %c0_14 = arith.constant 0 : index
    %c0_15 = arith.constant 0 : index
    %c0_16 = arith.constant 0 : index
    %12 = vector.load %arg3[%c0_14, %c0_15, %c0_16] : memref<2x128x512xf32, #tpu.memory_space<vmem>>, vector<1x128x512xf32>
    %13 = vector.shape_cast %12 : vector<1x128x512xf32> to vector<128x512xf32>
    %c0_i32 = arith.constant 0 : i32
    %c8_i32 = arith.constant 8 : i32
    %14 = arith.muli %c0_i32, %c8_i32 : i32
    %15 = tpu.assume_multiple %14, 8 : i32
    %16 = arith.index_cast %15 : i32 to index
    %c0_17 = arith.constant 0 : index
    %17 = vector.load %arg9[%16, %c0_17] : memref<64x512xf32, #tpu.memory_space<vmem>>, vector<8x512xf32>
    %c0_18 = arith.constant 0 : index
    %c0_19 = arith.constant 0 : index
    %18 = vector.load %arg10[%c0_18, %c0_19] : memref<8x128xf32, #tpu.memory_space<vmem>>, vector<8x128xf32>
    %cst_20 = arith.constant dense<0.000000e+00> : vector<8x512xf32>
    %19 = tpu.matmul %18, %13, %cst_20 {dimension_numbers = #tpu.dot_dimension_numbers<[1], [0], [0], [1], [0, 0, 1, 1], [], []>} : vector<8x128xf32>, vector<128x512xf32>, vector<8x512xf32> -> vector<8x512xf32>
    %20 = arith.addf %17, %19 : vector<8x512xf32>
    %21 = vector.extract_strided_slice %20 {offsets = [0, 0], sizes = [8, 128], strides = [1, 1]} : vector<8x512xf32> to vector<8x128xf32>
    %cst_21 = arith.constant 5.000000e-01 : f32
    %22 = vector.broadcast %cst_21 : f32 to vector<8x128xf32>
    %23 = arith.mulf %22, %21 : vector<8x128xf32>
    %24 = math.tanh %23 : vector<8x128xf32>
    %cst_22 = arith.constant 5.000000e-01 : f32
    %25 = vector.broadcast %cst_22 : f32 to vector<8x128xf32>
    %26 = arith.mulf %25, %24 : vector<8x128xf32>
    %cst_23 = arith.constant 5.000000e-01 : f32
    %27 = vector.broadcast %cst_23 : f32 to vector<8x128xf32>
    %28 = arith.addf %26, %27 : vector<8x128xf32>
    %29 = vector.extract_strided_slice %20 {offsets = [0, 128], sizes = [8, 128], strides = [1, 1]} : vector<8x512xf32> to vector<8x128xf32>
    %cst_24 = arith.constant 5.000000e-01 : f32
    %30 = vector.broadcast %cst_24 : f32 to vector<8x128xf32>
    %31 = arith.mulf %30, %29 : vector<8x128xf32>
    %32 = math.tanh %31 : vector<8x128xf32>
    %cst_25 = arith.constant 5.000000e-01 : f32
    %33 = vector.broadcast %cst_25 : f32 to vector<8x128xf32>
    %34 = arith.mulf %33, %32 : vector<8x128xf32>
    %cst_26 = arith.constant 5.000000e-01 : f32
    %35 = vector.broadcast %cst_26 : f32 to vector<8x128xf32>
    %36 = arith.addf %34, %35 : vector<8x128xf32>
    %37 = vector.extract_strided_slice %20 {offsets = [0, 256], sizes = [8, 128], strides = [1, 1]} : vector<8x512xf32> to vector<8x128xf32>
    %38 = math.tanh %37 : vector<8x128xf32>
    %39 = vector.extract_strided_slice %20 {offsets = [0, 384], sizes = [8, 128], strides = [1, 1]} : vector<8x512xf32> to vector<8x128xf32>
    %cst_27 = arith.constant 5.000000e-01 : f32
    %40 = vector.broadcast %cst_27 : f32 to vector<8x128xf32>
    %41 = arith.mulf %40, %39 : vector<8x128xf32>
    %42 = math.tanh %41 : vector<8x128xf32>
    %cst_28 = arith.constant 5.000000e-01 : f32
    %43 = vector.broadcast %cst_28 : f32 to vector<8x128xf32>
    %44 = arith.mulf %43, %42 : vector<8x128xf32>
    %cst_29 = arith.constant 5.000000e-01 : f32
    %45 = vector.broadcast %cst_29 : f32 to vector<8x128xf32>
    %46 = arith.addf %44, %45 : vector<8x128xf32>
    %c0_30 = arith.constant 0 : index
    %c0_31 = arith.constant 0 : index
    %47 = vector.load %arg11[%c0_30, %c0_31] : memref<8x128xf32, #tpu.memory_space<vmem>>, vector<8x128xf32>
    %48 = arith.mulf %36, %47 : vector<8x128xf32>
    %49 = arith.mulf %28, %38 : vector<8x128xf32>
    %50 = arith.addf %48, %49 : vector<8x128xf32>
    %51 = math.tanh %50 : vector<8x128xf32>
    %52 = arith.mulf %46, %51 : vector<8x128xf32>
    %c0_32 = arith.constant 0 : index
    %c0_33 = arith.constant 0 : index
    %53 = vector.load %arg11[%c0_32, %c0_33] : memref<8x128xf32, #tpu.memory_space<vmem>>, vector<8x128xf32>
    tpu.vector_store %arg11[%c0_32, %c0_33], %50 {strides = array<i32>} : memref<8x128xf32, #tpu.memory_space<vmem>>, vector<8x128xf32>,
    %c0_34 = arith.constant 0 : index
    %c0_35 = arith.constant 0 : index
    %54 = vector.load %arg10[%c0_34, %c0_35] : memref<8x128xf32, #tpu.memory_space<vmem>>, vector<8x128xf32>
    tpu.vector_store %arg10[%c0_34, %c0_35], %52 {strides = array<i32>} : memref<8x128xf32, #tpu.memory_space<vmem>>, vector<8x128xf32>,
    %55 = arith.index_cast %15 : i32 to index
    %c0_36 = arith.constant 0 : index
    %56 = vector.load %arg8[%55, %c0_36] : memref<64x128xf32, #tpu.memory_space<vmem>>, vector<8x128xf32>
    tpu.vector_store %arg8[%55, %c0_36], %52 {strides = array<i32>} : memref<64x128xf32, #tpu.memory_space<vmem>>, vector<8x128xf32>,
    %c1_i32 = arith.constant 1 : i32
    %c8_i32_37 = arith.constant 8 : i32
    %57 = arith.muli %c1_i32, %c8_i32_37 : i32
    %58 = tpu.assume_multiple %57, 8 : i32
    %59 = arith.index_cast %58 : i32 to index
    %c0_38 = arith.constant 0 : index
    %60 = vector.load %arg9[%59, %c0_38] : memref<64x512xf32, #tpu.memory_space<vmem>>, vector<8x512xf32>
    %c0_39 = arith.constant 0 : index
    %c0_40 = arith.constant 0 : index
    %61 = vector.load %arg10[%c0_39, %c0_40] : memref<8x128xf32, #tpu.memory_space<vmem>>, vector<8x128xf32>
    %cst_41 = arith.constant dense<0.000000e+00> : vector<8x512xf32>
    %62 = tpu.matmul %61, %13, %cst_41 {dimension_numbers = #tpu.dot_dimension_numbers<[1], [0], [0], [1], [0, 0, 1, 1], [], []>} : vector<8x128xf32>, vector<128x512xf32>, vector<8x512xf32> -> vector<8x512xf32>
    %63 = arith.addf %60, %62 : vector<8x512xf32>
    %64 = vector.extract_strided_slice %63 {offsets = [0, 0], sizes = [8, 128], strides = [1, 1]} : vector<8x512xf32> to vector<8x128xf32>
    %cst_42 = arith.constant 5.000000e-01 : f32
    %65 = vector.broadcast %cst_42 : f32 to vector<8x128xf32>
    %66 = arith.mulf %65, %64 : vector<8x128xf32>
    %67 = math.tanh %66 : vector<8x128xf32>
    %cst_43 = arith.constant 5.000000e-01 : f32
    %68 = vector.broadcast %cst_43 : f32 to vector<8x128xf32>
    %69 = arith.mulf %68, %67 : vector<8x128xf32>
    %cst_44 = arith.constant 5.000000e-01 : f32
    %70 = vector.broadcast %cst_44 : f32 to vector<8x128xf32>
    %71 = arith.addf %69, %70 : vector<8x128xf32>
    %72 = vector.extract_strided_slice %63 {offsets = [0, 128], sizes = [8, 128], strides = [1, 1]} : vector<8x512xf32> to vector<8x128xf32>
    %cst_45 = arith.constant 5.000000e-01 : f32
    %73 = vector.broadcast %cst_45 : f32 to vector<8x128xf32>
    %74 = arith.mulf %73, %72 : vector<8x128xf32>
    %75 = math.tanh %74 : vector<8x128xf32>
    %cst_46 = arith.constant 5.000000e-01 : f32
    %76 = vector.broadcast %cst_46 : f32 to vector<8x128xf32>
    %77 = arith.mulf %76, %75 : vector<8x128xf32>
    %cst_47 = arith.constant 5.000000e-01 : f32
    %78 = vector.broadcast %cst_47 : f32 to vector<8x128xf32>
    %79 = arith.addf %77, %78 : vector<8x128xf32>
    %80 = vector.extract_strided_slice %63 {offsets = [0, 256], sizes = [8, 128], strides = [1, 1]} : vector<8x512xf32> to vector<8x128xf32>
    %81 = math.tanh %80 : vector<8x128xf32>
    %82 = vector.extract_strided_slice %63 {offsets = [0, 384], sizes = [8, 128], strides = [1, 1]} : vector<8x512xf32> to vector<8x128xf32>
    %cst_48 = arith.constant 5.000000e-01 : f32
    %83 = vector.broadcast %cst_48 : f32 to vector<8x128xf32>
    %84 = arith.mulf %83, %82 : vector<8x128xf32>
    %85 = math.tanh %84 : vector<8x128xf32>
    %cst_49 = arith.constant 5.000000e-01 : f32
    %86 = vector.broadcast %cst_49 : f32 to vector<8x128xf32>
    %87 = arith.mulf %86, %85 : vector<8x128xf32>
    %cst_50 = arith.constant 5.000000e-01 : f32
    %88 = vector.broadcast %cst_50 : f32 to vector<8x128xf32>
    %89 = arith.addf %87, %88 : vector<8x128xf32>
    %c0_51 = arith.constant 0 : index
    %c0_52 = arith.constant 0 : index
    %90 = vector.load %arg11[%c0_51, %c0_52] : memref<8x128xf32, #tpu.memory_space<vmem>>, vector<8x128xf32>
    %91 = arith.mulf %79, %90 : vector<8x128xf32>
    %92 = arith.mulf %71, %81 : vector<8x128xf32>
    %93 = arith.addf %91, %92 : vector<8x128xf32>
    %94 = math.tanh %93 : vector<8x128xf32>
    %95 = arith.mulf %89, %94 : vector<8x128xf32>
    %c0_53 = arith.constant 0 : index
    %c0_54 = arith.constant 0 : index
    %96 = vector.load %arg11[%c0_53, %c0_54] : memref<8x128xf32, #tpu.memory_space<vmem>>, vector<8x128xf32>
    tpu.vector_store %arg11[%c0_53, %c0_54], %93 {strides = array<i32>} : memref<8x128xf32, #tpu.memory_space<vmem>>, vector<8x128xf32>,
    %c0_55 = arith.constant 0 : index
    %c0_56 = arith.constant 0 : index
    %97 = vector.load %arg10[%c0_55, %c0_56] : memref<8x128xf32, #tpu.memory_space<vmem>>, vector<8x128xf32>
    tpu.vector_store %arg10[%c0_55, %c0_56], %95 {strides = array<i32>} : memref<8x128xf32, #tpu.memory_space<vmem>>, vector<8x128xf32>,
    %98 = arith.index_cast %58 : i32 to index
    %c0_57 = arith.constant 0 : index
    %99 = vector.load %arg8[%98, %c0_57] : memref<64x128xf32, #tpu.memory_space<vmem>>, vector<8x128xf32>
    tpu.vector_store %arg8[%98, %c0_57], %95 {strides = array<i32>} : memref<64x128xf32, #tpu.memory_space<vmem>>, vector<8x128xf32>,
    %c2_i32 = arith.constant 2 : i32
    %c8_i32_58 = arith.constant 8 : i32
    %100 = arith.muli %c2_i32, %c8_i32_58 : i32
    %101 = tpu.assume_multiple %100, 8 : i32
    %102 = arith.index_cast %101 : i32 to index
    %c0_59 = arith.constant 0 : index
    %103 = vector.load %arg9[%102, %c0_59] : memref<64x512xf32, #tpu.memory_space<vmem>>, vector<8x512xf32>
    %c0_60 = arith.constant 0 : index
    %c0_61 = arith.constant 0 : index
    %104 = vector.load %arg10[%c0_60, %c0_61] : memref<8x128xf32, #tpu.memory_space<vmem>>, vector<8x128xf32>
    %cst_62 = arith.constant dense<0.000000e+00> : vector<8x512xf32>
    %105 = tpu.matmul %104, %13, %cst_62 {dimension_numbers = #tpu.dot_dimension_numbers<[1], [0], [0], [1], [0, 0, 1, 1], [], []>} : vector<8x128xf32>, vector<128x512xf32>, vector<8x512xf32> -> vector<8x512xf32>
    %106 = arith.addf %103, %105 : vector<8x512xf32>
    %107 = vector.extract_strided_slice %106 {offsets = [0, 0], sizes = [8, 128], strides = [1, 1]} : vector<8x512xf32> to vector<8x128xf32>
    %cst_63 = arith.constant 5.000000e-01 : f32
    %108 = vector.broadcast %cst_63 : f32 to vector<8x128xf32>
    %109 = arith.mulf %108, %107 : vector<8x128xf32>
    %110 = math.tanh %109 : vector<8x128xf32>
    %cst_64 = arith.constant 5.000000e-01 : f32
    %111 = vector.broadcast %cst_64 : f32 to vector<8x128xf32>
    %112 = arith.mulf %111, %110 : vector<8x128xf32>
    %cst_65 = arith.constant 5.000000e-01 : f32
    %113 = vector.broadcast %cst_65 : f32 to vector<8x128xf32>
    %114 = arith.addf %112, %113 : vector<8x128xf32>
    %115 = vector.extract_strided_slice %106 {offsets = [0, 128], sizes = [8, 128], strides = [1, 1]} : vector<8x512xf32> to vector<8x128xf32>
    %cst_66 = arith.constant 5.000000e-01 : f32
    %116 = vector.broadcast %cst_66 : f32 to vector<8x128xf32>
    %117 = arith.mulf %116, %115 : vector<8x128xf32>
    %118 = math.tanh %117 : vector<8x128xf32>
    %cst_67 = arith.constant 5.000000e-01 : f32
    %119 = vector.broadcast %cst_67 : f32 to vector<8x128xf32>
    %120 = arith.mulf %119, %118 : vector<8x128xf32>
    %cst_68 = arith.constant 5.000000e-01 : f32
    %121 = vector.broadcast %cst_68 : f32 to vector<8x128xf32>
    %122 = arith.addf %120, %121 : vector<8x128xf32>
    %123 = vector.extract_strided_slice %106 {offsets = [0, 256], sizes = [8, 128], strides = [1, 1]} : vector<8x512xf32> to vector<8x128xf32>
    %124 = math.tanh %123 : vector<8x128xf32>
    %125 = vector.extract_strided_slice %106 {offsets = [0, 384], sizes = [8, 128], strides = [1, 1]} : vector<8x512xf32> to vector<8x128xf32>
    %cst_69 = arith.constant 5.000000e-01 : f32
    %126 = vector.broadcast %cst_69 : f32 to vector<8x128xf32>
    %127 = arith.mulf %126, %125 : vector<8x128xf32>
    %128 = math.tanh %127 : vector<8x128xf32>
    %cst_70 = arith.constant 5.000000e-01 : f32
    %129 = vector.broadcast %cst_70 : f32 to vector<8x128xf32>
    %130 = arith.mulf %129, %128 : vector<8x128xf32>
    %cst_71 = arith.constant 5.000000e-01 : f32
    %131 = vector.broadcast %cst_71 : f32 to vector<8x128xf32>
    %132 = arith.addf %130, %131 : vector<8x128xf32>
    %c0_72 = arith.constant 0 : index
    %c0_73 = arith.constant 0 : index
    %133 = vector.load %arg11[%c0_72, %c0_73] : memref<8x128xf32, #tpu.memory_space<vmem>>, vector<8x128xf32>
    %134 = arith.mulf %122, %133 : vector<8x128xf32>
    %135 = arith.mulf %114, %124 : vector<8x128xf32>
    %136 = arith.addf %134, %135 : vector<8x128xf32>
    %137 = math.tanh %136 : vector<8x128xf32>
    %138 = arith.mulf %132, %137 : vector<8x128xf32>
    %c0_74 = arith.constant 0 : index
    %c0_75 = arith.constant 0 : index
    %139 = vector.load %arg11[%c0_74, %c0_75] : memref<8x128xf32, #tpu.memory_space<vmem>>, vector<8x128xf32>
    tpu.vector_store %arg11[%c0_74, %c0_75], %136 {strides = array<i32>} : memref<8x128xf32, #tpu.memory_space<vmem>>, vector<8x128xf32>,
    %c0_76 = arith.constant 0 : index
    %c0_77 = arith.constant 0 : index
    %140 = vector.load %arg10[%c0_76, %c0_77] : memref<8x128xf32, #tpu.memory_space<vmem>>, vector<8x128xf32>
    tpu.vector_store %arg10[%c0_76, %c0_77], %138 {strides = array<i32>} : memref<8x128xf32, #tpu.memory_space<vmem>>, vector<8x128xf32>,
    %141 = arith.index_cast %101 : i32 to index
    %c0_78 = arith.constant 0 : index
    %142 = vector.load %arg8[%141, %c0_78] : memref<64x128xf32, #tpu.memory_space<vmem>>, vector<8x128xf32>
    tpu.vector_store %arg8[%141, %c0_78], %138 {strides = array<i32>} : memref<64x128xf32, #tpu.memory_space<vmem>>, vector<8x128xf32>,
    %c3_i32 = arith.constant 3 : i32
    %c8_i32_79 = arith.constant 8 : i32
    %143 = arith.muli %c3_i32, %c8_i32_79 : i32
    %144 = tpu.assume_multiple %143, 8 : i32
    %145 = arith.index_cast %144 : i32 to index
    %c0_80 = arith.constant 0 : index
    %146 = vector.load %arg9[%145, %c0_80] : memref<64x512xf32, #tpu.memory_space<vmem>>, vector<8x512xf32>
    %c0_81 = arith.constant 0 : index
    %c0_82 = arith.constant 0 : index
    %147 = vector.load %arg10[%c0_81, %c0_82] : memref<8x128xf32, #tpu.memory_space<vmem>>, vector<8x128xf32>
    %cst_83 = arith.constant dense<0.000000e+00> : vector<8x512xf32>
    %148 = tpu.matmul %147, %13, %cst_83 {dimension_numbers = #tpu.dot_dimension_numbers<[1], [0], [0], [1], [0, 0, 1, 1], [], []>} : vector<8x128xf32>, vector<128x512xf32>, vector<8x512xf32> -> vector<8x512xf32>
    %149 = arith.addf %146, %148 : vector<8x512xf32>
    %150 = vector.extract_strided_slice %149 {offsets = [0, 0], sizes = [8, 128], strides = [1, 1]} : vector<8x512xf32> to vector<8x128xf32>
    %cst_84 = arith.constant 5.000000e-01 : f32
    %151 = vector.broadcast %cst_84 : f32 to vector<8x128xf32>
    %152 = arith.mulf %151, %150 : vector<8x128xf32>
    %153 = math.tanh %152 : vector<8x128xf32>
    %cst_85 = arith.constant 5.000000e-01 : f32
    %154 = vector.broadcast %cst_85 : f32 to vector<8x128xf32>
    %155 = arith.mulf %154, %153 : vector<8x128xf32>
    %cst_86 = arith.constant 5.000000e-01 : f32
    %156 = vector.broadcast %cst_86 : f32 to vector<8x128xf32>
    %157 = arith.addf %155, %156 : vector<8x128xf32>
    %158 = vector.extract_strided_slice %149 {offsets = [0, 128], sizes = [8, 128], strides = [1, 1]} : vector<8x512xf32> to vector<8x128xf32>
    %cst_87 = arith.constant 5.000000e-01 : f32
    %159 = vector.broadcast %cst_87 : f32 to vector<8x128xf32>
    %160 = arith.mulf %159, %158 : vector<8x128xf32>
    %161 = math.tanh %160 : vector<8x128xf32>
    %cst_88 = arith.constant 5.000000e-01 : f32
    %162 = vector.broadcast %cst_88 : f32 to vector<8x128xf32>
    %163 = arith.mulf %162, %161 : vector<8x128xf32>
    %cst_89 = arith.constant 5.000000e-01 : f32
    %164 = vector.broadcast %cst_89 : f32 to vector<8x128xf32>
    %165 = arith.addf %163, %164 : vector<8x128xf32>
    %166 = vector.extract_strided_slice %149 {offsets = [0, 256], sizes = [8, 128], strides = [1, 1]} : vector<8x512xf32> to vector<8x128xf32>
    %167 = math.tanh %166 : vector<8x128xf32>
    %168 = vector.extract_strided_slice %149 {offsets = [0, 384], sizes = [8, 128], strides = [1, 1]} : vector<8x512xf32> to vector<8x128xf32>
    %cst_90 = arith.constant 5.000000e-01 : f32
    %169 = vector.broadcast %cst_90 : f32 to vector<8x128xf32>
    %170 = arith.mulf %169, %168 : vector<8x128xf32>
    %171 = math.tanh %170 : vector<8x128xf32>
    %cst_91 = arith.constant 5.000000e-01 : f32
    %172 = vector.broadcast %cst_91 : f32 to vector<8x128xf32>
    %173 = arith.mulf %172, %171 : vector<8x128xf32>
    %cst_92 = arith.constant 5.000000e-01 : f32
    %174 = vector.broadcast %cst_92 : f32 to vector<8x128xf32>
    %175 = arith.addf %173, %174 : vector<8x128xf32>
    %c0_93 = arith.constant 0 : index
    %c0_94 = arith.constant 0 : index
    %176 = vector.load %arg11[%c0_93, %c0_94] : memref<8x128xf32, #tpu.memory_space<vmem>>, vector<8x128xf32>
    %177 = arith.mulf %165, %176 : vector<8x128xf32>
    %178 = arith.mulf %157, %167 : vector<8x128xf32>
    %179 = arith.addf %177, %178 : vector<8x128xf32>
    %180 = math.tanh %179 : vector<8x128xf32>
    %181 = arith.mulf %175, %180 : vector<8x128xf32>
    %c0_95 = arith.constant 0 : index
    %c0_96 = arith.constant 0 : index
    %182 = vector.load %arg11[%c0_95, %c0_96] : memref<8x128xf32, #tpu.memory_space<vmem>>, vector<8x128xf32>
    tpu.vector_store %arg11[%c0_95, %c0_96], %179 {strides = array<i32>} : memref<8x128xf32, #tpu.memory_space<vmem>>, vector<8x128xf32>,
    %c0_97 = arith.constant 0 : index
    %c0_98 = arith.constant 0 : index
    %183 = vector.load %arg10[%c0_97, %c0_98] : memref<8x128xf32, #tpu.memory_space<vmem>>, vector<8x128xf32>
    tpu.vector_store %arg10[%c0_97, %c0_98], %181 {strides = array<i32>} : memref<8x128xf32, #tpu.memory_space<vmem>>, vector<8x128xf32>,
    %184 = arith.index_cast %144 : i32 to index
    %c0_99 = arith.constant 0 : index
    %185 = vector.load %arg8[%184, %c0_99] : memref<64x128xf32, #tpu.memory_space<vmem>>, vector<8x128xf32>
    tpu.vector_store %arg8[%184, %c0_99], %181 {strides = array<i32>} : memref<64x128xf32, #tpu.memory_space<vmem>>, vector<8x128xf32>,
    %c4_i32 = arith.constant 4 : i32
    %c8_i32_100 = arith.constant 8 : i32
    %186 = arith.muli %c4_i32, %c8_i32_100 : i32
    %187 = tpu.assume_multiple %186, 8 : i32
    %188 = arith.index_cast %187 : i32 to index
    %c0_101 = arith.constant 0 : index
    %189 = vector.load %arg9[%188, %c0_101] : memref<64x512xf32, #tpu.memory_space<vmem>>, vector<8x512xf32>
    %c0_102 = arith.constant 0 : index
    %c0_103 = arith.constant 0 : index
    %190 = vector.load %arg10[%c0_102, %c0_103] : memref<8x128xf32, #tpu.memory_space<vmem>>, vector<8x128xf32>
    %cst_104 = arith.constant dense<0.000000e+00> : vector<8x512xf32>
    %191 = tpu.matmul %190, %13, %cst_104 {dimension_numbers = #tpu.dot_dimension_numbers<[1], [0], [0], [1], [0, 0, 1, 1], [], []>} : vector<8x128xf32>, vector<128x512xf32>, vector<8x512xf32> -> vector<8x512xf32>
    %192 = arith.addf %189, %191 : vector<8x512xf32>
    %193 = vector.extract_strided_slice %192 {offsets = [0, 0], sizes = [8, 128], strides = [1, 1]} : vector<8x512xf32> to vector<8x128xf32>
    %cst_105 = arith.constant 5.000000e-01 : f32
    %194 = vector.broadcast %cst_105 : f32 to vector<8x128xf32>
    %195 = arith.mulf %194, %193 : vector<8x128xf32>
    %196 = math.tanh %195 : vector<8x128xf32>
    %cst_106 = arith.constant 5.000000e-01 : f32
    %197 = vector.broadcast %cst_106 : f32 to vector<8x128xf32>
    %198 = arith.mulf %197, %196 : vector<8x128xf32>
    %cst_107 = arith.constant 5.000000e-01 : f32
    %199 = vector.broadcast %cst_107 : f32 to vector<8x128xf32>
    %200 = arith.addf %198, %199 : vector<8x128xf32>
    %201 = vector.extract_strided_slice %192 {offsets = [0, 128], sizes = [8, 128], strides = [1, 1]} : vector<8x512xf32> to vector<8x128xf32>
    %cst_108 = arith.constant 5.000000e-01 : f32
    %202 = vector.broadcast %cst_108 : f32 to vector<8x128xf32>
    %203 = arith.mulf %202, %201 : vector<8x128xf32>
    %204 = math.tanh %203 : vector<8x128xf32>
    %cst_109 = arith.constant 5.000000e-01 : f32
    %205 = vector.broadcast %cst_109 : f32 to vector<8x128xf32>
    %206 = arith.mulf %205, %204 : vector<8x128xf32>
    %cst_110 = arith.constant 5.000000e-01 : f32
    %207 = vector.broadcast %cst_110 : f32 to vector<8x128xf32>
    %208 = arith.addf %206, %207 : vector<8x128xf32>
    %209 = vector.extract_strided_slice %192 {offsets = [0, 256], sizes = [8, 128], strides = [1, 1]} : vector<8x512xf32> to vector<8x128xf32>
    %210 = math.tanh %209 : vector<8x128xf32>
    %211 = vector.extract_strided_slice %192 {offsets = [0, 384], sizes = [8, 128], strides = [1, 1]} : vector<8x512xf32> to vector<8x128xf32>
    %cst_111 = arith.constant 5.000000e-01 : f32
    %212 = vector.broadcast %cst_111 : f32 to vector<8x128xf32>
    %213 = arith.mulf %212, %211 : vector<8x128xf32>
    %214 = math.tanh %213 : vector<8x128xf32>
    %cst_112 = arith.constant 5.000000e-01 : f32
    %215 = vector.broadcast %cst_112 : f32 to vector<8x128xf32>
    %216 = arith.mulf %215, %214 : vector<8x128xf32>
    %cst_113 = arith.constant 5.000000e-01 : f32
    %217 = vector.broadcast %cst_113 : f32 to vector<8x128xf32>
    %218 = arith.addf %216, %217 : vector<8x128xf32>
    %c0_114 = arith.constant 0 : index
    %c0_115 = arith.constant 0 : index
    %219 = vector.load %arg11[%c0_114, %c0_115] : memref<8x128xf32, #tpu.memory_space<vmem>>, vector<8x128xf32>
    %220 = arith.mulf %208, %219 : vector<8x128xf32>
    %221 = arith.mulf %200, %210 : vector<8x128xf32>
    %222 = arith.addf %220, %221 : vector<8x128xf32>
    %223 = math.tanh %222 : vector<8x128xf32>
    %224 = arith.mulf %218, %223 : vector<8x128xf32>
    %c0_116 = arith.constant 0 : index
    %c0_117 = arith.constant 0 : index
    %225 = vector.load %arg11[%c0_116, %c0_117] : memref<8x128xf32, #tpu.memory_space<vmem>>, vector<8x128xf32>
    tpu.vector_store %arg11[%c0_116, %c0_117], %222 {strides = array<i32>} : memref<8x128xf32, #tpu.memory_space<vmem>>, vector<8x128xf32>,
    %c0_118 = arith.constant 0 : index
    %c0_119 = arith.constant 0 : index
    %226 = vector.load %arg10[%c0_118, %c0_119] : memref<8x128xf32, #tpu.memory_space<vmem>>, vector<8x128xf32>
    tpu.vector_store %arg10[%c0_118, %c0_119], %224 {strides = array<i32>} : memref<8x128xf32, #tpu.memory_space<vmem>>, vector<8x128xf32>,
    %227 = arith.index_cast %187 : i32 to index
    %c0_120 = arith.constant 0 : index
    %228 = vector.load %arg8[%227, %c0_120] : memref<64x128xf32, #tpu.memory_space<vmem>>, vector<8x128xf32>
    tpu.vector_store %arg8[%227, %c0_120], %224 {strides = array<i32>} : memref<64x128xf32, #tpu.memory_space<vmem>>, vector<8x128xf32>,
    %c5_i32 = arith.constant 5 : i32
    %c8_i32_121 = arith.constant 8 : i32
    %229 = arith.muli %c5_i32, %c8_i32_121 : i32
    %230 = tpu.assume_multiple %229, 8 : i32
    %231 = arith.index_cast %230 : i32 to index
    %c0_122 = arith.constant 0 : index
    %232 = vector.load %arg9[%231, %c0_122] : memref<64x512xf32, #tpu.memory_space<vmem>>, vector<8x512xf32>
    %c0_123 = arith.constant 0 : index
    %c0_124 = arith.constant 0 : index
    %233 = vector.load %arg10[%c0_123, %c0_124] : memref<8x128xf32, #tpu.memory_space<vmem>>, vector<8x128xf32>
    %cst_125 = arith.constant dense<0.000000e+00> : vector<8x512xf32>
    %234 = tpu.matmul %233, %13, %cst_125 {dimension_numbers = #tpu.dot_dimension_numbers<[1], [0], [0], [1], [0, 0, 1, 1], [], []>} : vector<8x128xf32>, vector<128x512xf32>, vector<8x512xf32> -> vector<8x512xf32>
    %235 = arith.addf %232, %234 : vector<8x512xf32>
    %236 = vector.extract_strided_slice %235 {offsets = [0, 0], sizes = [8, 128], strides = [1, 1]} : vector<8x512xf32> to vector<8x128xf32>
    %cst_126 = arith.constant 5.000000e-01 : f32
    %237 = vector.broadcast %cst_126 : f32 to vector<8x128xf32>
    %238 = arith.mulf %237, %236 : vector<8x128xf32>
    %239 = math.tanh %238 : vector<8x128xf32>
    %cst_127 = arith.constant 5.000000e-01 : f32
    %240 = vector.broadcast %cst_127 : f32 to vector<8x128xf32>
    %241 = arith.mulf %240, %239 : vector<8x128xf32>
    %cst_128 = arith.constant 5.000000e-01 : f32
    %242 = vector.broadcast %cst_128 : f32 to vector<8x128xf32>
    %243 = arith.addf %241, %242 : vector<8x128xf32>
    %244 = vector.extract_strided_slice %235 {offsets = [0, 128], sizes = [8, 128], strides = [1, 1]} : vector<8x512xf32> to vector<8x128xf32>
    %cst_129 = arith.constant 5.000000e-01 : f32
    %245 = vector.broadcast %cst_129 : f32 to vector<8x128xf32>
    %246 = arith.mulf %245, %244 : vector<8x128xf32>
    %247 = math.tanh %246 : vector<8x128xf32>
    %cst_130 = arith.constant 5.000000e-01 : f32
    %248 = vector.broadcast %cst_130 : f32 to vector<8x128xf32>
    %249 = arith.mulf %248, %247 : vector<8x128xf32>
    %cst_131 = arith.constant 5.000000e-01 : f32
    %250 = vector.broadcast %cst_131 : f32 to vector<8x128xf32>
    %251 = arith.addf %249, %250 : vector<8x128xf32>
    %252 = vector.extract_strided_slice %235 {offsets = [0, 256], sizes = [8, 128], strides = [1, 1]} : vector<8x512xf32> to vector<8x128xf32>
    %253 = math.tanh %252 : vector<8x128xf32>
    %254 = vector.extract_strided_slice %235 {offsets = [0, 384], sizes = [8, 128], strides = [1, 1]} : vector<8x512xf32> to vector<8x128xf32>
    %cst_132 = arith.constant 5.000000e-01 : f32
    %255 = vector.broadcast %cst_132 : f32 to vector<8x128xf32>
    %256 = arith.mulf %255, %254 : vector<8x128xf32>
    %257 = math.tanh %256 : vector<8x128xf32>
    %cst_133 = arith.constant 5.000000e-01 : f32
    %258 = vector.broadcast %cst_133 : f32 to vector<8x128xf32>
    %259 = arith.mulf %258, %257 : vector<8x128xf32>
    %cst_134 = arith.constant 5.000000e-01 : f32
    %260 = vector.broadcast %cst_134 : f32 to vector<8x128xf32>
    %261 = arith.addf %259, %260 : vector<8x128xf32>
    %c0_135 = arith.constant 0 : index
    %c0_136 = arith.constant 0 : index
    %262 = vector.load %arg11[%c0_135, %c0_136] : memref<8x128xf32, #tpu.memory_space<vmem>>, vector<8x128xf32>
    %263 = arith.mulf %251, %262 : vector<8x128xf32>
    %264 = arith.mulf %243, %253 : vector<8x128xf32>
    %265 = arith.addf %263, %264 : vector<8x128xf32>
    %266 = math.tanh %265 : vector<8x128xf32>
    %267 = arith.mulf %261, %266 : vector<8x128xf32>
    %c0_137 = arith.constant 0 : index
    %c0_138 = arith.constant 0 : index
    %268 = vector.load %arg11[%c0_137, %c0_138] : memref<8x128xf32, #tpu.memory_space<vmem>>, vector<8x128xf32>
    tpu.vector_store %arg11[%c0_137, %c0_138], %265 {strides = array<i32>} : memref<8x128xf32, #tpu.memory_space<vmem>>, vector<8x128xf32>,
    %c0_139 = arith.constant 0 : index
    %c0_140 = arith.constant 0 : index
    %269 = vector.load %arg10[%c0_139, %c0_140] : memref<8x128xf32, #tpu.memory_space<vmem>>, vector<8x128xf32>
    tpu.vector_store %arg10[%c0_139, %c0_140], %267 {strides = array<i32>} : memref<8x128xf32, #tpu.memory_space<vmem>>, vector<8x128xf32>,
    %270 = arith.index_cast %230 : i32 to index
    %c0_141 = arith.constant 0 : index
    %271 = vector.load %arg8[%270, %c0_141] : memref<64x128xf32, #tpu.memory_space<vmem>>, vector<8x128xf32>
    tpu.vector_store %arg8[%270, %c0_141], %267 {strides = array<i32>} : memref<64x128xf32, #tpu.memory_space<vmem>>, vector<8x128xf32>,
    %c6_i32 = arith.constant 6 : i32
    %c8_i32_142 = arith.constant 8 : i32
    %272 = arith.muli %c6_i32, %c8_i32_142 : i32
    %273 = tpu.assume_multiple %272, 8 : i32
    %274 = arith.index_cast %273 : i32 to index
    %c0_143 = arith.constant 0 : index
    %275 = vector.load %arg9[%274, %c0_143] : memref<64x512xf32, #tpu.memory_space<vmem>>, vector<8x512xf32>
    %c0_144 = arith.constant 0 : index
    %c0_145 = arith.constant 0 : index
    %276 = vector.load %arg10[%c0_144, %c0_145] : memref<8x128xf32, #tpu.memory_space<vmem>>, vector<8x128xf32>
    %cst_146 = arith.constant dense<0.000000e+00> : vector<8x512xf32>
    %277 = tpu.matmul %276, %13, %cst_146 {dimension_numbers = #tpu.dot_dimension_numbers<[1], [0], [0], [1], [0, 0, 1, 1], [], []>} : vector<8x128xf32>, vector<128x512xf32>, vector<8x512xf32> -> vector<8x512xf32>
    %278 = arith.addf %275, %277 : vector<8x512xf32>
    %279 = vector.extract_strided_slice %278 {offsets = [0, 0], sizes = [8, 128], strides = [1, 1]} : vector<8x512xf32> to vector<8x128xf32>
    %cst_147 = arith.constant 5.000000e-01 : f32
    %280 = vector.broadcast %cst_147 : f32 to vector<8x128xf32>
    %281 = arith.mulf %280, %279 : vector<8x128xf32>
    %282 = math.tanh %281 : vector<8x128xf32>
    %cst_148 = arith.constant 5.000000e-01 : f32
    %283 = vector.broadcast %cst_148 : f32 to vector<8x128xf32>
    %284 = arith.mulf %283, %282 : vector<8x128xf32>
    %cst_149 = arith.constant 5.000000e-01 : f32
    %285 = vector.broadcast %cst_149 : f32 to vector<8x128xf32>
    %286 = arith.addf %284, %285 : vector<8x128xf32>
    %287 = vector.extract_strided_slice %278 {offsets = [0, 128], sizes = [8, 128], strides = [1, 1]} : vector<8x512xf32> to vector<8x128xf32>
    %cst_150 = arith.constant 5.000000e-01 : f32
    %288 = vector.broadcast %cst_150 : f32 to vector<8x128xf32>
    %289 = arith.mulf %288, %287 : vector<8x128xf32>
    %290 = math.tanh %289 : vector<8x128xf32>
    %cst_151 = arith.constant 5.000000e-01 : f32
    %291 = vector.broadcast %cst_151 : f32 to vector<8x128xf32>
    %292 = arith.mulf %291, %290 : vector<8x128xf32>
    %cst_152 = arith.constant 5.000000e-01 : f32
    %293 = vector.broadcast %cst_152 : f32 to vector<8x128xf32>
    %294 = arith.addf %292, %293 : vector<8x128xf32>
    %295 = vector.extract_strided_slice %278 {offsets = [0, 256], sizes = [8, 128], strides = [1, 1]} : vector<8x512xf32> to vector<8x128xf32>
    %296 = math.tanh %295 : vector<8x128xf32>
    %297 = vector.extract_strided_slice %278 {offsets = [0, 384], sizes = [8, 128], strides = [1, 1]} : vector<8x512xf32> to vector<8x128xf32>
    %cst_153 = arith.constant 5.000000e-01 : f32
    %298 = vector.broadcast %cst_153 : f32 to vector<8x128xf32>
    %299 = arith.mulf %298, %297 : vector<8x128xf32>
    %300 = math.tanh %299 : vector<8x128xf32>
    %cst_154 = arith.constant 5.000000e-01 : f32
    %301 = vector.broadcast %cst_154 : f32 to vector<8x128xf32>
    %302 = arith.mulf %301, %300 : vector<8x128xf32>
    %cst_155 = arith.constant 5.000000e-01 : f32
    %303 = vector.broadcast %cst_155 : f32 to vector<8x128xf32>
    %304 = arith.addf %302, %303 : vector<8x128xf32>
    %c0_156 = arith.constant 0 : index
    %c0_157 = arith.constant 0 : index
    %305 = vector.load %arg11[%c0_156, %c0_157] : memref<8x128xf32, #tpu.memory_space<vmem>>, vector<8x128xf32>
    %306 = arith.mulf %294, %305 : vector<8x128xf32>
    %307 = arith.mulf %286, %296 : vector<8x128xf32>
    %308 = arith.addf %306, %307 : vector<8x128xf32>
    %309 = math.tanh %308 : vector<8x128xf32>
    %310 = arith.mulf %304, %309 : vector<8x128xf32>
    %c0_158 = arith.constant 0 : index
    %c0_159 = arith.constant 0 : index
    %311 = vector.load %arg11[%c0_158, %c0_159] : memref<8x128xf32, #tpu.memory_space<vmem>>, vector<8x128xf32>
    tpu.vector_store %arg11[%c0_158, %c0_159], %308 {strides = array<i32>} : memref<8x128xf32, #tpu.memory_space<vmem>>, vector<8x128xf32>,
    %c0_160 = arith.constant 0 : index
    %c0_161 = arith.constant 0 : index
    %312 = vector.load %arg10[%c0_160, %c0_161] : memref<8x128xf32, #tpu.memory_space<vmem>>, vector<8x128xf32>
    tpu.vector_store %arg10[%c0_160, %c0_161], %310 {strides = array<i32>} : memref<8x128xf32, #tpu.memory_space<vmem>>, vector<8x128xf32>,
    %313 = arith.index_cast %273 : i32 to index
    %c0_162 = arith.constant 0 : index
    %314 = vector.load %arg8[%313, %c0_162] : memref<64x128xf32, #tpu.memory_space<vmem>>, vector<8x128xf32>
    tpu.vector_store %arg8[%313, %c0_162], %310 {strides = array<i32>} : memref<64x128xf32, #tpu.memory_space<vmem>>, vector<8x128xf32>,
    %c7_i32 = arith.constant 7 : i32
    %c8_i32_163 = arith.constant 8 : i32
    %315 = arith.muli %c7_i32, %c8_i32_163 : i32
    %316 = tpu.assume_multiple %315, 8 : i32
    %317 = arith.index_cast %316 : i32 to index
    %c0_164 = arith.constant 0 : index
    %318 = vector.load %arg9[%317, %c0_164] : memref<64x512xf32, #tpu.memory_space<vmem>>, vector<8x512xf32>
    %c0_165 = arith.constant 0 : index
    %c0_166 = arith.constant 0 : index
    %319 = vector.load %arg10[%c0_165, %c0_166] : memref<8x128xf32, #tpu.memory_space<vmem>>, vector<8x128xf32>
    %cst_167 = arith.constant dense<0.000000e+00> : vector<8x512xf32>
    %320 = tpu.matmul %319, %13, %cst_167 {dimension_numbers = #tpu.dot_dimension_numbers<[1], [0], [0], [1], [0, 0, 1, 1], [], []>} : vector<8x128xf32>, vector<128x512xf32>, vector<8x512xf32> -> vector<8x512xf32>
    %321 = arith.addf %318, %320 : vector<8x512xf32>
    %322 = vector.extract_strided_slice %321 {offsets = [0, 0], sizes = [8, 128], strides = [1, 1]} : vector<8x512xf32> to vector<8x128xf32>
    %cst_168 = arith.constant 5.000000e-01 : f32
    %323 = vector.broadcast %cst_168 : f32 to vector<8x128xf32>
    %324 = arith.mulf %323, %322 : vector<8x128xf32>
    %325 = math.tanh %324 : vector<8x128xf32>
    %cst_169 = arith.constant 5.000000e-01 : f32
    %326 = vector.broadcast %cst_169 : f32 to vector<8x128xf32>
    %327 = arith.mulf %326, %325 : vector<8x128xf32>
    %cst_170 = arith.constant 5.000000e-01 : f32
    %328 = vector.broadcast %cst_170 : f32 to vector<8x128xf32>
    %329 = arith.addf %327, %328 : vector<8x128xf32>
    %330 = vector.extract_strided_slice %321 {offsets = [0, 128], sizes = [8, 128], strides = [1, 1]} : vector<8x512xf32> to vector<8x128xf32>
    %cst_171 = arith.constant 5.000000e-01 : f32
    %331 = vector.broadcast %cst_171 : f32 to vector<8x128xf32>
    %332 = arith.mulf %331, %330 : vector<8x128xf32>
    %333 = math.tanh %332 : vector<8x128xf32>
    %cst_172 = arith.constant 5.000000e-01 : f32
    %334 = vector.broadcast %cst_172 : f32 to vector<8x128xf32>
    %335 = arith.mulf %334, %333 : vector<8x128xf32>
    %cst_173 = arith.constant 5.000000e-01 : f32
    %336 = vector.broadcast %cst_173 : f32 to vector<8x128xf32>
    %337 = arith.addf %335, %336 : vector<8x128xf32>
    %338 = vector.extract_strided_slice %321 {offsets = [0, 256], sizes = [8, 128], strides = [1, 1]} : vector<8x512xf32> to vector<8x128xf32>
    %339 = math.tanh %338 : vector<8x128xf32>
    %340 = vector.extract_strided_slice %321 {offsets = [0, 384], sizes = [8, 128], strides = [1, 1]} : vector<8x512xf32> to vector<8x128xf32>
    %cst_174 = arith.constant 5.000000e-01 : f32
    %341 = vector.broadcast %cst_174 : f32 to vector<8x128xf32>
    %342 = arith.mulf %341, %340 : vector<8x128xf32>
    %343 = math.tanh %342 : vector<8x128xf32>
    %cst_175 = arith.constant 5.000000e-01 : f32
    %344 = vector.broadcast %cst_175 : f32 to vector<8x128xf32>
    %345 = arith.mulf %344, %343 : vector<8x128xf32>
    %cst_176 = arith.constant 5.000000e-01 : f32
    %346 = vector.broadcast %cst_176 : f32 to vector<8x128xf32>
    %347 = arith.addf %345, %346 : vector<8x128xf32>
    %c0_177 = arith.constant 0 : index
    %c0_178 = arith.constant 0 : index
    %348 = vector.load %arg11[%c0_177, %c0_178] : memref<8x128xf32, #tpu.memory_space<vmem>>, vector<8x128xf32>
    %349 = arith.mulf %337, %348 : vector<8x128xf32>
    %350 = arith.mulf %329, %339 : vector<8x128xf32>
    %351 = arith.addf %349, %350 : vector<8x128xf32>
    %352 = math.tanh %351 : vector<8x128xf32>
    %353 = arith.mulf %347, %352 : vector<8x128xf32>
    %c0_179 = arith.constant 0 : index
    %c0_180 = arith.constant 0 : index
    %354 = vector.load %arg11[%c0_179, %c0_180] : memref<8x128xf32, #tpu.memory_space<vmem>>, vector<8x128xf32>
    tpu.vector_store %arg11[%c0_179, %c0_180], %351 {strides = array<i32>} : memref<8x128xf32, #tpu.memory_space<vmem>>, vector<8x128xf32>,
    %c0_181 = arith.constant 0 : index
    %c0_182 = arith.constant 0 : index
    %355 = vector.load %arg10[%c0_181, %c0_182] : memref<8x128xf32, #tpu.memory_space<vmem>>, vector<8x128xf32>
    tpu.vector_store %arg10[%c0_181, %c0_182], %353 {strides = array<i32>} : memref<8x128xf32, #tpu.memory_space<vmem>>, vector<8x128xf32>,
    %356 = arith.index_cast %316 : i32 to index
    %c0_183 = arith.constant 0 : index
    %357 = vector.load %arg8[%356, %c0_183] : memref<64x128xf32, #tpu.memory_space<vmem>>, vector<8x128xf32>
    tpu.vector_store %arg8[%356, %c0_183], %353 {strides = array<i32>} : memref<64x128xf32, #tpu.memory_space<vmem>>, vector<8x128xf32>,
    %c8_i32_184 = arith.constant 8 : i32
    %c0_185 = arith.constant 0 : index
    %c0_186 = arith.constant 0 : index
    %358 = vector.load %arg8[%c0_185, %c0_186] : memref<64x128xf32, #tpu.memory_space<vmem>>, vector<64x128xf32>
    %c0_187 = arith.constant 0 : index
    %c0_188 = arith.constant 0 : index
    %c0_189 = arith.constant 0 : index
    %359 = vector.load %arg2[%c0_187, %c0_188, %c0_189] : memref<1x128x512xf32, #tpu.memory_space<vmem>>, vector<1x128x512xf32>
    %360 = vector.shape_cast %359 : vector<1x128x512xf32> to vector<128x512xf32>
    %cst_190 = arith.constant dense<0.000000e+00> : vector<64x512xf32>
    %361 = tpu.matmul %358, %360, %cst_190 {dimension_numbers = #tpu.dot_dimension_numbers<[1], [0], [0], [1], [0, 0, 1, 1], [], []>} : vector<64x128xf32>, vector<128x512xf32>, vector<64x512xf32> -> vector<64x512xf32>
    %c1 = arith.constant 1 : index
    %c0_191 = arith.constant 0 : index
    %c0_192 = arith.constant 0 : index
    %362 = vector.load %arg4[%c1, %c0_191, %c0_192] : memref<2x1x512xf32, #tpu.memory_space<vmem>>, vector<1x1x512xf32>
    %363 = vector.shape_cast %362 : vector<1x1x512xf32> to vector<1x512xf32>
    %364 = vector.broadcast %363 : vector<1x512xf32> to vector<64x512xf32>
    %365 = arith.addf %361, %364 : vector<64x512xf32>
    %c0_193 = arith.constant 0 : index
    %c0_194 = arith.constant 0 : index
    %366 = vector.load %arg9[%c0_193, %c0_194] : memref<64x512xf32, #tpu.memory_space<vmem>>, vector<64x512xf32>
    tpu.vector_store %arg9[%c0_193, %c0_194], %365 {strides = array<i32>} : memref<64x512xf32, #tpu.memory_space<vmem>>, vector<64x512xf32>,
    %cst_195 = arith.constant 0.000000e+00 : f32
    %367 = vector.broadcast %cst_195 : f32 to vector<8x128xf32>
    %c0_196 = arith.constant 0 : index
    %c0_197 = arith.constant 0 : index
    %368 = vector.load %arg10[%c0_196, %c0_197] : memref<8x128xf32, #tpu.memory_space<vmem>>, vector<8x128xf32>
    tpu.vector_store %arg10[%c0_196, %c0_197], %367 {strides = array<i32>} : memref<8x128xf32, #tpu.memory_space<vmem>>, vector<8x128xf32>,
    %cst_198 = arith.constant 0.000000e+00 : f32
    %369 = vector.broadcast %cst_198 : f32 to vector<8x128xf32>
    %c0_199 = arith.constant 0 : index
    %c0_200 = arith.constant 0 : index
    %370 = vector.load %arg11[%c0_199, %c0_200] : memref<8x128xf32, #tpu.memory_space<vmem>>, vector<8x128xf32>
    tpu.vector_store %arg11[%c0_199, %c0_200], %369 {strides = array<i32>} : memref<8x128xf32, #tpu.memory_space<vmem>>, vector<8x128xf32>,
    %c1_201 = arith.constant 1 : index
    %c0_202 = arith.constant 0 : index
    %c0_203 = arith.constant 0 : index
    %371 = vector.load %arg3[%c1_201, %c0_202, %c0_203] : memref<2x128x512xf32, #tpu.memory_space<vmem>>, vector<1x128x512xf32>
    %372 = vector.shape_cast %371 : vector<1x128x512xf32> to vector<128x512xf32>
    %c0_i32_204 = arith.constant 0 : i32
    %c8_i32_205 = arith.constant 8 : i32
    %373 = arith.muli %c0_i32_204, %c8_i32_205 : i32
    %374 = tpu.assume_multiple %373, 8 : i32
    %375 = arith.index_cast %374 : i32 to index
    %c0_206 = arith.constant 0 : index
    %376 = vector.load %arg9[%375, %c0_206] : memref<64x512xf32, #tpu.memory_space<vmem>>, vector<8x512xf32>
    %c0_207 = arith.constant 0 : index
    %c0_208 = arith.constant 0 : index
    %377 = vector.load %arg10[%c0_207, %c0_208] : memref<8x128xf32, #tpu.memory_space<vmem>>, vector<8x128xf32>
    %cst_209 = arith.constant dense<0.000000e+00> : vector<8x512xf32>
    %378 = tpu.matmul %377, %372, %cst_209 {dimension_numbers = #tpu.dot_dimension_numbers<[1], [0], [0], [1], [0, 0, 1, 1], [], []>} : vector<8x128xf32>, vector<128x512xf32>, vector<8x512xf32> -> vector<8x512xf32>
    %379 = arith.addf %376, %378 : vector<8x512xf32>
    %380 = vector.extract_strided_slice %379 {offsets = [0, 0], sizes = [8, 128], strides = [1, 1]} : vector<8x512xf32> to vector<8x128xf32>
    %cst_210 = arith.constant 5.000000e-01 : f32
    %381 = vector.broadcast %cst_210 : f32 to vector<8x128xf32>
    %382 = arith.mulf %381, %380 : vector<8x128xf32>
    %383 = math.tanh %382 : vector<8x128xf32>
    %cst_211 = arith.constant 5.000000e-01 : f32
    %384 = vector.broadcast %cst_211 : f32 to vector<8x128xf32>
    %385 = arith.mulf %384, %383 : vector<8x128xf32>
    %cst_212 = arith.constant 5.000000e-01 : f32
    %386 = vector.broadcast %cst_212 : f32 to vector<8x128xf32>
    %387 = arith.addf %385, %386 : vector<8x128xf32>
    %388 = vector.extract_strided_slice %379 {offsets = [0, 128], sizes = [8, 128], strides = [1, 1]} : vector<8x512xf32> to vector<8x128xf32>
    %cst_213 = arith.constant 5.000000e-01 : f32
    %389 = vector.broadcast %cst_213 : f32 to vector<8x128xf32>
    %390 = arith.mulf %389, %388 : vector<8x128xf32>
    %391 = math.tanh %390 : vector<8x128xf32>
    %cst_214 = arith.constant 5.000000e-01 : f32
    %392 = vector.broadcast %cst_214 : f32 to vector<8x128xf32>
    %393 = arith.mulf %392, %391 : vector<8x128xf32>
    %cst_215 = arith.constant 5.000000e-01 : f32
    %394 = vector.broadcast %cst_215 : f32 to vector<8x128xf32>
    %395 = arith.addf %393, %394 : vector<8x128xf32>
    %396 = vector.extract_strided_slice %379 {offsets = [0, 256], sizes = [8, 128], strides = [1, 1]} : vector<8x512xf32> to vector<8x128xf32>
    %397 = math.tanh %396 : vector<8x128xf32>
    %398 = vector.extract_strided_slice %379 {offsets = [0, 384], sizes = [8, 128], strides = [1, 1]} : vector<8x512xf32> to vector<8x128xf32>
    %cst_216 = arith.constant 5.000000e-01 : f32
    %399 = vector.broadcast %cst_216 : f32 to vector<8x128xf32>
    %400 = arith.mulf %399, %398 : vector<8x128xf32>
    %401 = math.tanh %400 : vector<8x128xf32>
    %cst_217 = arith.constant 5.000000e-01 : f32
    %402 = vector.broadcast %cst_217 : f32 to vector<8x128xf32>
    %403 = arith.mulf %402, %401 : vector<8x128xf32>
    %cst_218 = arith.constant 5.000000e-01 : f32
    %404 = vector.broadcast %cst_218 : f32 to vector<8x128xf32>
    %405 = arith.addf %403, %404 : vector<8x128xf32>
    %c0_219 = arith.constant 0 : index
    %c0_220 = arith.constant 0 : index
    %406 = vector.load %arg11[%c0_219, %c0_220] : memref<8x128xf32, #tpu.memory_space<vmem>>, vector<8x128xf32>
    %407 = arith.mulf %395, %406 : vector<8x128xf32>
    %408 = arith.mulf %387, %397 : vector<8x128xf32>
    %409 = arith.addf %407, %408 : vector<8x128xf32>
    %410 = math.tanh %409 : vector<8x128xf32>
    %411 = arith.mulf %405, %410 : vector<8x128xf32>
    %c0_221 = arith.constant 0 : index
    %c0_222 = arith.constant 0 : index
    %412 = vector.load %arg11[%c0_221, %c0_222] : memref<8x128xf32, #tpu.memory_space<vmem>>, vector<8x128xf32>
    tpu.vector_store %arg11[%c0_221, %c0_222], %409 {strides = array<i32>} : memref<8x128xf32, #tpu.memory_space<vmem>>, vector<8x128xf32>,
    %c0_223 = arith.constant 0 : index
    %c0_224 = arith.constant 0 : index
    %413 = vector.load %arg10[%c0_223, %c0_224] : memref<8x128xf32, #tpu.memory_space<vmem>>, vector<8x128xf32>
    tpu.vector_store %arg10[%c0_223, %c0_224], %411 {strides = array<i32>} : memref<8x128xf32, #tpu.memory_space<vmem>>, vector<8x128xf32>,
    %c1_i32_225 = arith.constant 1 : i32
    %c8_i32_226 = arith.constant 8 : i32
    %414 = arith.muli %c1_i32_225, %c8_i32_226 : i32
    %415 = tpu.assume_multiple %414, 8 : i32
    %416 = arith.index_cast %415 : i32 to index
    %c0_227 = arith.constant 0 : index
    %417 = vector.load %arg9[%416, %c0_227] : memref<64x512xf32, #tpu.memory_space<vmem>>, vector<8x512xf32>
    %c0_228 = arith.constant 0 : index
    %c0_229 = arith.constant 0 : index
    %418 = vector.load %arg10[%c0_228, %c0_229] : memref<8x128xf32, #tpu.memory_space<vmem>>, vector<8x128xf32>
    %cst_230 = arith.constant dense<0.000000e+00> : vector<8x512xf32>
    %419 = tpu.matmul %418, %372, %cst_230 {dimension_numbers = #tpu.dot_dimension_numbers<[1], [0], [0], [1], [0, 0, 1, 1], [], []>} : vector<8x128xf32>, vector<128x512xf32>, vector<8x512xf32> -> vector<8x512xf32>
    %420 = arith.addf %417, %419 : vector<8x512xf32>
    %421 = vector.extract_strided_slice %420 {offsets = [0, 0], sizes = [8, 128], strides = [1, 1]} : vector<8x512xf32> to vector<8x128xf32>
    %cst_231 = arith.constant 5.000000e-01 : f32
    %422 = vector.broadcast %cst_231 : f32 to vector<8x128xf32>
    %423 = arith.mulf %422, %421 : vector<8x128xf32>
    %424 = math.tanh %423 : vector<8x128xf32>
    %cst_232 = arith.constant 5.000000e-01 : f32
    %425 = vector.broadcast %cst_232 : f32 to vector<8x128xf32>
    %426 = arith.mulf %425, %424 : vector<8x128xf32>
    %cst_233 = arith.constant 5.000000e-01 : f32
    %427 = vector.broadcast %cst_233 : f32 to vector<8x128xf32>
    %428 = arith.addf %426, %427 : vector<8x128xf32>
    %429 = vector.extract_strided_slice %420 {offsets = [0, 128], sizes = [8, 128], strides = [1, 1]} : vector<8x512xf32> to vector<8x128xf32>
    %cst_234 = arith.constant 5.000000e-01 : f32
    %430 = vector.broadcast %cst_234 : f32 to vector<8x128xf32>
    %431 = arith.mulf %430, %429 : vector<8x128xf32>
    %432 = math.tanh %431 : vector<8x128xf32>
    %cst_235 = arith.constant 5.000000e-01 : f32
    %433 = vector.broadcast %cst_235 : f32 to vector<8x128xf32>
    %434 = arith.mulf %433, %432 : vector<8x128xf32>
    %cst_236 = arith.constant 5.000000e-01 : f32
    %435 = vector.broadcast %cst_236 : f32 to vector<8x128xf32>
    %436 = arith.addf %434, %435 : vector<8x128xf32>
    %437 = vector.extract_strided_slice %420 {offsets = [0, 256], sizes = [8, 128], strides = [1, 1]} : vector<8x512xf32> to vector<8x128xf32>
    %438 = math.tanh %437 : vector<8x128xf32>
    %439 = vector.extract_strided_slice %420 {offsets = [0, 384], sizes = [8, 128], strides = [1, 1]} : vector<8x512xf32> to vector<8x128xf32>
    %cst_237 = arith.constant 5.000000e-01 : f32
    %440 = vector.broadcast %cst_237 : f32 to vector<8x128xf32>
    %441 = arith.mulf %440, %439 : vector<8x128xf32>
    %442 = math.tanh %441 : vector<8x128xf32>
    %cst_238 = arith.constant 5.000000e-01 : f32
    %443 = vector.broadcast %cst_238 : f32 to vector<8x128xf32>
    %444 = arith.mulf %443, %442 : vector<8x128xf32>
    %cst_239 = arith.constant 5.000000e-01 : f32
    %445 = vector.broadcast %cst_239 : f32 to vector<8x128xf32>
    %446 = arith.addf %444, %445 : vector<8x128xf32>
    %c0_240 = arith.constant 0 : index
    %c0_241 = arith.constant 0 : index
    %447 = vector.load %arg11[%c0_240, %c0_241] : memref<8x128xf32, #tpu.memory_space<vmem>>, vector<8x128xf32>
    %448 = arith.mulf %436, %447 : vector<8x128xf32>
    %449 = arith.mulf %428, %438 : vector<8x128xf32>
    %450 = arith.addf %448, %449 : vector<8x128xf32>
    %451 = math.tanh %450 : vector<8x128xf32>
    %452 = arith.mulf %446, %451 : vector<8x128xf32>
    %c0_242 = arith.constant 0 : index
    %c0_243 = arith.constant 0 : index
    %453 = vector.load %arg11[%c0_242, %c0_243] : memref<8x128xf32, #tpu.memory_space<vmem>>, vector<8x128xf32>
    tpu.vector_store %arg11[%c0_242, %c0_243], %450 {strides = array<i32>} : memref<8x128xf32, #tpu.memory_space<vmem>>, vector<8x128xf32>,
    %c0_244 = arith.constant 0 : index
    %c0_245 = arith.constant 0 : index
    %454 = vector.load %arg10[%c0_244, %c0_245] : memref<8x128xf32, #tpu.memory_space<vmem>>, vector<8x128xf32>
    tpu.vector_store %arg10[%c0_244, %c0_245], %452 {strides = array<i32>} : memref<8x128xf32, #tpu.memory_space<vmem>>, vector<8x128xf32>,
    %c2_i32_246 = arith.constant 2 : i32
    %c8_i32_247 = arith.constant 8 : i32
    %455 = arith.muli %c2_i32_246, %c8_i32_247 : i32
    %456 = tpu.assume_multiple %455, 8 : i32
    %457 = arith.index_cast %456 : i32 to index
    %c0_248 = arith.constant 0 : index
    %458 = vector.load %arg9[%457, %c0_248] : memref<64x512xf32, #tpu.memory_space<vmem>>, vector<8x512xf32>
    %c0_249 = arith.constant 0 : index
    %c0_250 = arith.constant 0 : index
    %459 = vector.load %arg10[%c0_249, %c0_250] : memref<8x128xf32, #tpu.memory_space<vmem>>, vector<8x128xf32>
    %cst_251 = arith.constant dense<0.000000e+00> : vector<8x512xf32>
    %460 = tpu.matmul %459, %372, %cst_251 {dimension_numbers = #tpu.dot_dimension_numbers<[1], [0], [0], [1], [0, 0, 1, 1], [], []>} : vector<8x128xf32>, vector<128x512xf32>, vector<8x512xf32> -> vector<8x512xf32>
    %461 = arith.addf %458, %460 : vector<8x512xf32>
    %462 = vector.extract_strided_slice %461 {offsets = [0, 0], sizes = [8, 128], strides = [1, 1]} : vector<8x512xf32> to vector<8x128xf32>
    %cst_252 = arith.constant 5.000000e-01 : f32
    %463 = vector.broadcast %cst_252 : f32 to vector<8x128xf32>
    %464 = arith.mulf %463, %462 : vector<8x128xf32>
    %465 = math.tanh %464 : vector<8x128xf32>
    %cst_253 = arith.constant 5.000000e-01 : f32
    %466 = vector.broadcast %cst_253 : f32 to vector<8x128xf32>
    %467 = arith.mulf %466, %465 : vector<8x128xf32>
    %cst_254 = arith.constant 5.000000e-01 : f32
    %468 = vector.broadcast %cst_254 : f32 to vector<8x128xf32>
    %469 = arith.addf %467, %468 : vector<8x128xf32>
    %470 = vector.extract_strided_slice %461 {offsets = [0, 128], sizes = [8, 128], strides = [1, 1]} : vector<8x512xf32> to vector<8x128xf32>
    %cst_255 = arith.constant 5.000000e-01 : f32
    %471 = vector.broadcast %cst_255 : f32 to vector<8x128xf32>
    %472 = arith.mulf %471, %470 : vector<8x128xf32>
    %473 = math.tanh %472 : vector<8x128xf32>
    %cst_256 = arith.constant 5.000000e-01 : f32
    %474 = vector.broadcast %cst_256 : f32 to vector<8x128xf32>
    %475 = arith.mulf %474, %473 : vector<8x128xf32>
    %cst_257 = arith.constant 5.000000e-01 : f32
    %476 = vector.broadcast %cst_257 : f32 to vector<8x128xf32>
    %477 = arith.addf %475, %476 : vector<8x128xf32>
    %478 = vector.extract_strided_slice %461 {offsets = [0, 256], sizes = [8, 128], strides = [1, 1]} : vector<8x512xf32> to vector<8x128xf32>
    %479 = math.tanh %478 : vector<8x128xf32>
    %480 = vector.extract_strided_slice %461 {offsets = [0, 384], sizes = [8, 128], strides = [1, 1]} : vector<8x512xf32> to vector<8x128xf32>
    %cst_258 = arith.constant 5.000000e-01 : f32
    %481 = vector.broadcast %cst_258 : f32 to vector<8x128xf32>
    %482 = arith.mulf %481, %480 : vector<8x128xf32>
    %483 = math.tanh %482 : vector<8x128xf32>
    %cst_259 = arith.constant 5.000000e-01 : f32
    %484 = vector.broadcast %cst_259 : f32 to vector<8x128xf32>
    %485 = arith.mulf %484, %483 : vector<8x128xf32>
    %cst_260 = arith.constant 5.000000e-01 : f32
    %486 = vector.broadcast %cst_260 : f32 to vector<8x128xf32>
    %487 = arith.addf %485, %486 : vector<8x128xf32>
    %c0_261 = arith.constant 0 : index
    %c0_262 = arith.constant 0 : index
    %488 = vector.load %arg11[%c0_261, %c0_262] : memref<8x128xf32, #tpu.memory_space<vmem>>, vector<8x128xf32>
    %489 = arith.mulf %477, %488 : vector<8x128xf32>
    %490 = arith.mulf %469, %479 : vector<8x128xf32>
    %491 = arith.addf %489, %490 : vector<8x128xf32>
    %492 = math.tanh %491 : vector<8x128xf32>
    %493 = arith.mulf %487, %492 : vector<8x128xf32>
    %c0_263 = arith.constant 0 : index
    %c0_264 = arith.constant 0 : index
    %494 = vector.load %arg11[%c0_263, %c0_264] : memref<8x128xf32, #tpu.memory_space<vmem>>, vector<8x128xf32>
    tpu.vector_store %arg11[%c0_263, %c0_264], %491 {strides = array<i32>} : memref<8x128xf32, #tpu.memory_space<vmem>>, vector<8x128xf32>,
    %c0_265 = arith.constant 0 : index
    %c0_266 = arith.constant 0 : index
    %495 = vector.load %arg10[%c0_265, %c0_266] : memref<8x128xf32, #tpu.memory_space<vmem>>, vector<8x128xf32>
    tpu.vector_store %arg10[%c0_265, %c0_266], %493 {strides = array<i32>} : memref<8x128xf32, #tpu.memory_space<vmem>>, vector<8x128xf32>,
    %c3_i32_267 = arith.constant 3 : i32
    %c8_i32_268 = arith.constant 8 : i32
    %496 = arith.muli %c3_i32_267, %c8_i32_268 : i32
    %497 = tpu.assume_multiple %496, 8 : i32
    %498 = arith.index_cast %497 : i32 to index
    %c0_269 = arith.constant 0 : index
    %499 = vector.load %arg9[%498, %c0_269] : memref<64x512xf32, #tpu.memory_space<vmem>>, vector<8x512xf32>
    %c0_270 = arith.constant 0 : index
    %c0_271 = arith.constant 0 : index
    %500 = vector.load %arg10[%c0_270, %c0_271] : memref<8x128xf32, #tpu.memory_space<vmem>>, vector<8x128xf32>
    %cst_272 = arith.constant dense<0.000000e+00> : vector<8x512xf32>
    %501 = tpu.matmul %500, %372, %cst_272 {dimension_numbers = #tpu.dot_dimension_numbers<[1], [0], [0], [1], [0, 0, 1, 1], [], []>} : vector<8x128xf32>, vector<128x512xf32>, vector<8x512xf32> -> vector<8x512xf32>
    %502 = arith.addf %499, %501 : vector<8x512xf32>
    %503 = vector.extract_strided_slice %502 {offsets = [0, 0], sizes = [8, 128], strides = [1, 1]} : vector<8x512xf32> to vector<8x128xf32>
    %cst_273 = arith.constant 5.000000e-01 : f32
    %504 = vector.broadcast %cst_273 : f32 to vector<8x128xf32>
    %505 = arith.mulf %504, %503 : vector<8x128xf32>
    %506 = math.tanh %505 : vector<8x128xf32>
    %cst_274 = arith.constant 5.000000e-01 : f32
    %507 = vector.broadcast %cst_274 : f32 to vector<8x128xf32>
    %508 = arith.mulf %507, %506 : vector<8x128xf32>
    %cst_275 = arith.constant 5.000000e-01 : f32
    %509 = vector.broadcast %cst_275 : f32 to vector<8x128xf32>
    %510 = arith.addf %508, %509 : vector<8x128xf32>
    %511 = vector.extract_strided_slice %502 {offsets = [0, 128], sizes = [8, 128], strides = [1, 1]} : vector<8x512xf32> to vector<8x128xf32>
    %cst_276 = arith.constant 5.000000e-01 : f32
    %512 = vector.broadcast %cst_276 : f32 to vector<8x128xf32>
    %513 = arith.mulf %512, %511 : vector<8x128xf32>
    %514 = math.tanh %513 : vector<8x128xf32>
    %cst_277 = arith.constant 5.000000e-01 : f32
    %515 = vector.broadcast %cst_277 : f32 to vector<8x128xf32>
    %516 = arith.mulf %515, %514 : vector<8x128xf32>
    %cst_278 = arith.constant 5.000000e-01 : f32
    %517 = vector.broadcast %cst_278 : f32 to vector<8x128xf32>
    %518 = arith.addf %516, %517 : vector<8x128xf32>
    %519 = vector.extract_strided_slice %502 {offsets = [0, 256], sizes = [8, 128], strides = [1, 1]} : vector<8x512xf32> to vector<8x128xf32>
    %520 = math.tanh %519 : vector<8x128xf32>
    %521 = vector.extract_strided_slice %502 {offsets = [0, 384], sizes = [8, 128], strides = [1, 1]} : vector<8x512xf32> to vector<8x128xf32>
    %cst_279 = arith.constant 5.000000e-01 : f32
    %522 = vector.broadcast %cst_279 : f32 to vector<8x128xf32>
    %523 = arith.mulf %522, %521 : vector<8x128xf32>
    %524 = math.tanh %523 : vector<8x128xf32>
    %cst_280 = arith.constant 5.000000e-01 : f32
    %525 = vector.broadcast %cst_280 : f32 to vector<8x128xf32>
    %526 = arith.mulf %525, %524 : vector<8x128xf32>
    %cst_281 = arith.constant 5.000000e-01 : f32
    %527 = vector.broadcast %cst_281 : f32 to vector<8x128xf32>
    %528 = arith.addf %526, %527 : vector<8x128xf32>
    %c0_282 = arith.constant 0 : index
    %c0_283 = arith.constant 0 : index
    %529 = vector.load %arg11[%c0_282, %c0_283] : memref<8x128xf32, #tpu.memory_space<vmem>>, vector<8x128xf32>
    %530 = arith.mulf %518, %529 : vector<8x128xf32>
    %531 = arith.mulf %510, %520 : vector<8x128xf32>
    %532 = arith.addf %530, %531 : vector<8x128xf32>
    %533 = math.tanh %532 : vector<8x128xf32>
    %534 = arith.mulf %528, %533 : vector<8x128xf32>
    %c0_284 = arith.constant 0 : index
    %c0_285 = arith.constant 0 : index
    %535 = vector.load %arg11[%c0_284, %c0_285] : memref<8x128xf32, #tpu.memory_space<vmem>>, vector<8x128xf32>
    tpu.vector_store %arg11[%c0_284, %c0_285], %532 {strides = array<i32>} : memref<8x128xf32, #tpu.memory_space<vmem>>, vector<8x128xf32>,
    %c0_286 = arith.constant 0 : index
    %c0_287 = arith.constant 0 : index
    %536 = vector.load %arg10[%c0_286, %c0_287] : memref<8x128xf32, #tpu.memory_space<vmem>>, vector<8x128xf32>
    tpu.vector_store %arg10[%c0_286, %c0_287], %534 {strides = array<i32>} : memref<8x128xf32, #tpu.memory_space<vmem>>, vector<8x128xf32>,
    %c4_i32_288 = arith.constant 4 : i32
    %c8_i32_289 = arith.constant 8 : i32
    %537 = arith.muli %c4_i32_288, %c8_i32_289 : i32
    %538 = tpu.assume_multiple %537, 8 : i32
    %539 = arith.index_cast %538 : i32 to index
    %c0_290 = arith.constant 0 : index
    %540 = vector.load %arg9[%539, %c0_290] : memref<64x512xf32, #tpu.memory_space<vmem>>, vector<8x512xf32>
    %c0_291 = arith.constant 0 : index
    %c0_292 = arith.constant 0 : index
    %541 = vector.load %arg10[%c0_291, %c0_292] : memref<8x128xf32, #tpu.memory_space<vmem>>, vector<8x128xf32>
    %cst_293 = arith.constant dense<0.000000e+00> : vector<8x512xf32>
    %542 = tpu.matmul %541, %372, %cst_293 {dimension_numbers = #tpu.dot_dimension_numbers<[1], [0], [0], [1], [0, 0, 1, 1], [], []>} : vector<8x128xf32>, vector<128x512xf32>, vector<8x512xf32> -> vector<8x512xf32>
    %543 = arith.addf %540, %542 : vector<8x512xf32>
    %544 = vector.extract_strided_slice %543 {offsets = [0, 0], sizes = [8, 128], strides = [1, 1]} : vector<8x512xf32> to vector<8x128xf32>
    %cst_294 = arith.constant 5.000000e-01 : f32
    %545 = vector.broadcast %cst_294 : f32 to vector<8x128xf32>
    %546 = arith.mulf %545, %544 : vector<8x128xf32>
    %547 = math.tanh %546 : vector<8x128xf32>
    %cst_295 = arith.constant 5.000000e-01 : f32
    %548 = vector.broadcast %cst_295 : f32 to vector<8x128xf32>
    %549 = arith.mulf %548, %547 : vector<8x128xf32>
    %cst_296 = arith.constant 5.000000e-01 : f32
    %550 = vector.broadcast %cst_296 : f32 to vector<8x128xf32>
    %551 = arith.addf %549, %550 : vector<8x128xf32>
    %552 = vector.extract_strided_slice %543 {offsets = [0, 128], sizes = [8, 128], strides = [1, 1]} : vector<8x512xf32> to vector<8x128xf32>
    %cst_297 = arith.constant 5.000000e-01 : f32
    %553 = vector.broadcast %cst_297 : f32 to vector<8x128xf32>
    %554 = arith.mulf %553, %552 : vector<8x128xf32>
    %555 = math.tanh %554 : vector<8x128xf32>
    %cst_298 = arith.constant 5.000000e-01 : f32
    %556 = vector.broadcast %cst_298 : f32 to vector<8x128xf32>
    %557 = arith.mulf %556, %555 : vector<8x128xf32>
    %cst_299 = arith.constant 5.000000e-01 : f32
    %558 = vector.broadcast %cst_299 : f32 to vector<8x128xf32>
    %559 = arith.addf %557, %558 : vector<8x128xf32>
    %560 = vector.extract_strided_slice %543 {offsets = [0, 256], sizes = [8, 128], strides = [1, 1]} : vector<8x512xf32> to vector<8x128xf32>
    %561 = math.tanh %560 : vector<8x128xf32>
    %562 = vector.extract_strided_slice %543 {offsets = [0, 384], sizes = [8, 128], strides = [1, 1]} : vector<8x512xf32> to vector<8x128xf32>
    %cst_300 = arith.constant 5.000000e-01 : f32
    %563 = vector.broadcast %cst_300 : f32 to vector<8x128xf32>
    %564 = arith.mulf %563, %562 : vector<8x128xf32>
    %565 = math.tanh %564 : vector<8x128xf32>
    %cst_301 = arith.constant 5.000000e-01 : f32
    %566 = vector.broadcast %cst_301 : f32 to vector<8x128xf32>
    %567 = arith.mulf %566, %565 : vector<8x128xf32>
    %cst_302 = arith.constant 5.000000e-01 : f32
    %568 = vector.broadcast %cst_302 : f32 to vector<8x128xf32>
    %569 = arith.addf %567, %568 : vector<8x128xf32>
    %c0_303 = arith.constant 0 : index
    %c0_304 = arith.constant 0 : index
    %570 = vector.load %arg11[%c0_303, %c0_304] : memref<8x128xf32, #tpu.memory_space<vmem>>, vector<8x128xf32>
    %571 = arith.mulf %559, %570 : vector<8x128xf32>
    %572 = arith.mulf %551, %561 : vector<8x128xf32>
    %573 = arith.addf %571, %572 : vector<8x128xf32>
    %574 = math.tanh %573 : vector<8x128xf32>
    %575 = arith.mulf %569, %574 : vector<8x128xf32>
    %c0_305 = arith.constant 0 : index
    %c0_306 = arith.constant 0 : index
    %576 = vector.load %arg11[%c0_305, %c0_306] : memref<8x128xf32, #tpu.memory_space<vmem>>, vector<8x128xf32>
    tpu.vector_store %arg11[%c0_305, %c0_306], %573 {strides = array<i32>} : memref<8x128xf32, #tpu.memory_space<vmem>>, vector<8x128xf32>,
    %c0_307 = arith.constant 0 : index
    %c0_308 = arith.constant 0 : index
    %577 = vector.load %arg10[%c0_307, %c0_308] : memref<8x128xf32, #tpu.memory_space<vmem>>, vector<8x128xf32>
    tpu.vector_store %arg10[%c0_307, %c0_308], %575 {strides = array<i32>} : memref<8x128xf32, #tpu.memory_space<vmem>>, vector<8x128xf32>,
    %c5_i32_309 = arith.constant 5 : i32
    %c8_i32_310 = arith.constant 8 : i32
    %578 = arith.muli %c5_i32_309, %c8_i32_310 : i32
    %579 = tpu.assume_multiple %578, 8 : i32
    %580 = arith.index_cast %579 : i32 to index
    %c0_311 = arith.constant 0 : index
    %581 = vector.load %arg9[%580, %c0_311] : memref<64x512xf32, #tpu.memory_space<vmem>>, vector<8x512xf32>
    %c0_312 = arith.constant 0 : index
    %c0_313 = arith.constant 0 : index
    %582 = vector.load %arg10[%c0_312, %c0_313] : memref<8x128xf32, #tpu.memory_space<vmem>>, vector<8x128xf32>
    %cst_314 = arith.constant dense<0.000000e+00> : vector<8x512xf32>
    %583 = tpu.matmul %582, %372, %cst_314 {dimension_numbers = #tpu.dot_dimension_numbers<[1], [0], [0], [1], [0, 0, 1, 1], [], []>} : vector<8x128xf32>, vector<128x512xf32>, vector<8x512xf32> -> vector<8x512xf32>
    %584 = arith.addf %581, %583 : vector<8x512xf32>
    %585 = vector.extract_strided_slice %584 {offsets = [0, 0], sizes = [8, 128], strides = [1, 1]} : vector<8x512xf32> to vector<8x128xf32>
    %cst_315 = arith.constant 5.000000e-01 : f32
    %586 = vector.broadcast %cst_315 : f32 to vector<8x128xf32>
    %587 = arith.mulf %586, %585 : vector<8x128xf32>
    %588 = math.tanh %587 : vector<8x128xf32>
    %cst_316 = arith.constant 5.000000e-01 : f32
    %589 = vector.broadcast %cst_316 : f32 to vector<8x128xf32>
    %590 = arith.mulf %589, %588 : vector<8x128xf32>
    %cst_317 = arith.constant 5.000000e-01 : f32
    %591 = vector.broadcast %cst_317 : f32 to vector<8x128xf32>
    %592 = arith.addf %590, %591 : vector<8x128xf32>
    %593 = vector.extract_strided_slice %584 {offsets = [0, 128], sizes = [8, 128], strides = [1, 1]} : vector<8x512xf32> to vector<8x128xf32>
    %cst_318 = arith.constant 5.000000e-01 : f32
    %594 = vector.broadcast %cst_318 : f32 to vector<8x128xf32>
    %595 = arith.mulf %594, %593 : vector<8x128xf32>
    %596 = math.tanh %595 : vector<8x128xf32>
    %cst_319 = arith.constant 5.000000e-01 : f32
    %597 = vector.broadcast %cst_319 : f32 to vector<8x128xf32>
    %598 = arith.mulf %597, %596 : vector<8x128xf32>
    %cst_320 = arith.constant 5.000000e-01 : f32
    %599 = vector.broadcast %cst_320 : f32 to vector<8x128xf32>
    %600 = arith.addf %598, %599 : vector<8x128xf32>
    %601 = vector.extract_strided_slice %584 {offsets = [0, 256], sizes = [8, 128], strides = [1, 1]} : vector<8x512xf32> to vector<8x128xf32>
    %602 = math.tanh %601 : vector<8x128xf32>
    %603 = vector.extract_strided_slice %584 {offsets = [0, 384], sizes = [8, 128], strides = [1, 1]} : vector<8x512xf32> to vector<8x128xf32>
    %cst_321 = arith.constant 5.000000e-01 : f32
    %604 = vector.broadcast %cst_321 : f32 to vector<8x128xf32>
    %605 = arith.mulf %604, %603 : vector<8x128xf32>
    %606 = math.tanh %605 : vector<8x128xf32>
    %cst_322 = arith.constant 5.000000e-01 : f32
    %607 = vector.broadcast %cst_322 : f32 to vector<8x128xf32>
    %608 = arith.mulf %607, %606 : vector<8x128xf32>
    %cst_323 = arith.constant 5.000000e-01 : f32
    %609 = vector.broadcast %cst_323 : f32 to vector<8x128xf32>
    %610 = arith.addf %608, %609 : vector<8x128xf32>
    %c0_324 = arith.constant 0 : index
    %c0_325 = arith.constant 0 : index
    %611 = vector.load %arg11[%c0_324, %c0_325] : memref<8x128xf32, #tpu.memory_space<vmem>>, vector<8x128xf32>
    %612 = arith.mulf %600, %611 : vector<8x128xf32>
    %613 = arith.mulf %592, %602 : vector<8x128xf32>
    %614 = arith.addf %612, %613 : vector<8x128xf32>
    %615 = math.tanh %614 : vector<8x128xf32>
    %616 = arith.mulf %610, %615 : vector<8x128xf32>
    %c0_326 = arith.constant 0 : index
    %c0_327 = arith.constant 0 : index
    %617 = vector.load %arg11[%c0_326, %c0_327] : memref<8x128xf32, #tpu.memory_space<vmem>>, vector<8x128xf32>
    tpu.vector_store %arg11[%c0_326, %c0_327], %614 {strides = array<i32>} : memref<8x128xf32, #tpu.memory_space<vmem>>, vector<8x128xf32>,
    %c0_328 = arith.constant 0 : index
    %c0_329 = arith.constant 0 : index
    %618 = vector.load %arg10[%c0_328, %c0_329] : memref<8x128xf32, #tpu.memory_space<vmem>>, vector<8x128xf32>
    tpu.vector_store %arg10[%c0_328, %c0_329], %616 {strides = array<i32>} : memref<8x128xf32, #tpu.memory_space<vmem>>, vector<8x128xf32>,
    %c6_i32_330 = arith.constant 6 : i32
    %c8_i32_331 = arith.constant 8 : i32
    %619 = arith.muli %c6_i32_330, %c8_i32_331 : i32
    %620 = tpu.assume_multiple %619, 8 : i32
    %621 = arith.index_cast %620 : i32 to index
    %c0_332 = arith.constant 0 : index
    %622 = vector.load %arg9[%621, %c0_332] : memref<64x512xf32, #tpu.memory_space<vmem>>, vector<8x512xf32>
    %c0_333 = arith.constant 0 : index
    %c0_334 = arith.constant 0 : index
    %623 = vector.load %arg10[%c0_333, %c0_334] : memref<8x128xf32, #tpu.memory_space<vmem>>, vector<8x128xf32>
    %cst_335 = arith.constant dense<0.000000e+00> : vector<8x512xf32>
    %624 = tpu.matmul %623, %372, %cst_335 {dimension_numbers = #tpu.dot_dimension_numbers<[1], [0], [0], [1], [0, 0, 1, 1], [], []>} : vector<8x128xf32>, vector<128x512xf32>, vector<8x512xf32> -> vector<8x512xf32>
    %625 = arith.addf %622, %624 : vector<8x512xf32>
    %626 = vector.extract_strided_slice %625 {offsets = [0, 0], sizes = [8, 128], strides = [1, 1]} : vector<8x512xf32> to vector<8x128xf32>
    %cst_336 = arith.constant 5.000000e-01 : f32
    %627 = vector.broadcast %cst_336 : f32 to vector<8x128xf32>
    %628 = arith.mulf %627, %626 : vector<8x128xf32>
    %629 = math.tanh %628 : vector<8x128xf32>
    %cst_337 = arith.constant 5.000000e-01 : f32
    %630 = vector.broadcast %cst_337 : f32 to vector<8x128xf32>
    %631 = arith.mulf %630, %629 : vector<8x128xf32>
    %cst_338 = arith.constant 5.000000e-01 : f32
    %632 = vector.broadcast %cst_338 : f32 to vector<8x128xf32>
    %633 = arith.addf %631, %632 : vector<8x128xf32>
    %634 = vector.extract_strided_slice %625 {offsets = [0, 128], sizes = [8, 128], strides = [1, 1]} : vector<8x512xf32> to vector<8x128xf32>
    %cst_339 = arith.constant 5.000000e-01 : f32
    %635 = vector.broadcast %cst_339 : f32 to vector<8x128xf32>
    %636 = arith.mulf %635, %634 : vector<8x128xf32>
    %637 = math.tanh %636 : vector<8x128xf32>
    %cst_340 = arith.constant 5.000000e-01 : f32
    %638 = vector.broadcast %cst_340 : f32 to vector<8x128xf32>
    %639 = arith.mulf %638, %637 : vector<8x128xf32>
    %cst_341 = arith.constant 5.000000e-01 : f32
    %640 = vector.broadcast %cst_341 : f32 to vector<8x128xf32>
    %641 = arith.addf %639, %640 : vector<8x128xf32>
    %642 = vector.extract_strided_slice %625 {offsets = [0, 256], sizes = [8, 128], strides = [1, 1]} : vector<8x512xf32> to vector<8x128xf32>
    %643 = math.tanh %642 : vector<8x128xf32>
    %644 = vector.extract_strided_slice %625 {offsets = [0, 384], sizes = [8, 128], strides = [1, 1]} : vector<8x512xf32> to vector<8x128xf32>
    %cst_342 = arith.constant 5.000000e-01 : f32
    %645 = vector.broadcast %cst_342 : f32 to vector<8x128xf32>
    %646 = arith.mulf %645, %644 : vector<8x128xf32>
    %647 = math.tanh %646 : vector<8x128xf32>
    %cst_343 = arith.constant 5.000000e-01 : f32
    %648 = vector.broadcast %cst_343 : f32 to vector<8x128xf32>
    %649 = arith.mulf %648, %647 : vector<8x128xf32>
    %cst_344 = arith.constant 5.000000e-01 : f32
    %650 = vector.broadcast %cst_344 : f32 to vector<8x128xf32>
    %651 = arith.addf %649, %650 : vector<8x128xf32>
    %c0_345 = arith.constant 0 : index
    %c0_346 = arith.constant 0 : index
    %652 = vector.load %arg11[%c0_345, %c0_346] : memref<8x128xf32, #tpu.memory_space<vmem>>, vector<8x128xf32>
    %653 = arith.mulf %641, %652 : vector<8x128xf32>
    %654 = arith.mulf %633, %643 : vector<8x128xf32>
    %655 = arith.addf %653, %654 : vector<8x128xf32>
    %656 = math.tanh %655 : vector<8x128xf32>
    %657 = arith.mulf %651, %656 : vector<8x128xf32>
    %c0_347 = arith.constant 0 : index
    %c0_348 = arith.constant 0 : index
    %658 = vector.load %arg11[%c0_347, %c0_348] : memref<8x128xf32, #tpu.memory_space<vmem>>, vector<8x128xf32>
    tpu.vector_store %arg11[%c0_347, %c0_348], %655 {strides = array<i32>} : memref<8x128xf32, #tpu.memory_space<vmem>>, vector<8x128xf32>,
    %c0_349 = arith.constant 0 : index
    %c0_350 = arith.constant 0 : index
    %659 = vector.load %arg10[%c0_349, %c0_350] : memref<8x128xf32, #tpu.memory_space<vmem>>, vector<8x128xf32>
    tpu.vector_store %arg10[%c0_349, %c0_350], %657 {strides = array<i32>} : memref<8x128xf32, #tpu.memory_space<vmem>>, vector<8x128xf32>,
    %c7_i32_351 = arith.constant 7 : i32
    %c8_i32_352 = arith.constant 8 : i32
    %660 = arith.muli %c7_i32_351, %c8_i32_352 : i32
    %661 = tpu.assume_multiple %660, 8 : i32
    %662 = arith.index_cast %661 : i32 to index
    %c0_353 = arith.constant 0 : index
    %663 = vector.load %arg9[%662, %c0_353] : memref<64x512xf32, #tpu.memory_space<vmem>>, vector<8x512xf32>
    %c0_354 = arith.constant 0 : index
    %c0_355 = arith.constant 0 : index
    %664 = vector.load %arg10[%c0_354, %c0_355] : memref<8x128xf32, #tpu.memory_space<vmem>>, vector<8x128xf32>
    %cst_356 = arith.constant dense<0.000000e+00> : vector<8x512xf32>
    %665 = tpu.matmul %664, %372, %cst_356 {dimension_numbers = #tpu.dot_dimension_numbers<[1], [0], [0], [1], [0, 0, 1, 1], [], []>} : vector<8x128xf32>, vector<128x512xf32>, vector<8x512xf32> -> vector<8x512xf32>
    %666 = arith.addf %663, %665 : vector<8x512xf32>
    %667 = vector.extract_strided_slice %666 {offsets = [0, 0], sizes = [8, 128], strides = [1, 1]} : vector<8x512xf32> to vector<8x128xf32>
    %cst_357 = arith.constant 5.000000e-01 : f32
    %668 = vector.broadcast %cst_357 : f32 to vector<8x128xf32>
    %669 = arith.mulf %668, %667 : vector<8x128xf32>
    %670 = math.tanh %669 : vector<8x128xf32>
    %cst_358 = arith.constant 5.000000e-01 : f32
    %671 = vector.broadcast %cst_358 : f32 to vector<8x128xf32>
    %672 = arith.mulf %671, %670 : vector<8x128xf32>
    %cst_359 = arith.constant 5.000000e-01 : f32
    %673 = vector.broadcast %cst_359 : f32 to vector<8x128xf32>
    %674 = arith.addf %672, %673 : vector<8x128xf32>
    %675 = vector.extract_strided_slice %666 {offsets = [0, 128], sizes = [8, 128], strides = [1, 1]} : vector<8x512xf32> to vector<8x128xf32>
    %cst_360 = arith.constant 5.000000e-01 : f32
    %676 = vector.broadcast %cst_360 : f32 to vector<8x128xf32>
    %677 = arith.mulf %676, %675 : vector<8x128xf32>
    %678 = math.tanh %677 : vector<8x128xf32>
    %cst_361 = arith.constant 5.000000e-01 : f32
    %679 = vector.broadcast %cst_361 : f32 to vector<8x128xf32>
    %680 = arith.mulf %679, %678 : vector<8x128xf32>
    %cst_362 = arith.constant 5.000000e-01 : f32
    %681 = vector.broadcast %cst_362 : f32 to vector<8x128xf32>
    %682 = arith.addf %680, %681 : vector<8x128xf32>
    %683 = vector.extract_strided_slice %666 {offsets = [0, 256], sizes = [8, 128], strides = [1, 1]} : vector<8x512xf32> to vector<8x128xf32>
    %684 = math.tanh %683 : vector<8x128xf32>
    %685 = vector.extract_strided_slice %666 {offsets = [0, 384], sizes = [8, 128], strides = [1, 1]} : vector<8x512xf32> to vector<8x128xf32>
    %cst_363 = arith.constant 5.000000e-01 : f32
    %686 = vector.broadcast %cst_363 : f32 to vector<8x128xf32>
    %687 = arith.mulf %686, %685 : vector<8x128xf32>
    %688 = math.tanh %687 : vector<8x128xf32>
    %cst_364 = arith.constant 5.000000e-01 : f32
    %689 = vector.broadcast %cst_364 : f32 to vector<8x128xf32>
    %690 = arith.mulf %689, %688 : vector<8x128xf32>
    %cst_365 = arith.constant 5.000000e-01 : f32
    %691 = vector.broadcast %cst_365 : f32 to vector<8x128xf32>
    %692 = arith.addf %690, %691 : vector<8x128xf32>
    %c0_366 = arith.constant 0 : index
    %c0_367 = arith.constant 0 : index
    %693 = vector.load %arg11[%c0_366, %c0_367] : memref<8x128xf32, #tpu.memory_space<vmem>>, vector<8x128xf32>
    %694 = arith.mulf %682, %693 : vector<8x128xf32>
    %695 = arith.mulf %674, %684 : vector<8x128xf32>
    %696 = arith.addf %694, %695 : vector<8x128xf32>
    %697 = math.tanh %696 : vector<8x128xf32>
    %698 = arith.mulf %692, %697 : vector<8x128xf32>
    %c0_368 = arith.constant 0 : index
    %c0_369 = arith.constant 0 : index
    %699 = vector.load %arg11[%c0_368, %c0_369] : memref<8x128xf32, #tpu.memory_space<vmem>>, vector<8x128xf32>
    tpu.vector_store %arg11[%c0_368, %c0_369], %696 {strides = array<i32>} : memref<8x128xf32, #tpu.memory_space<vmem>>, vector<8x128xf32>,
    %c0_370 = arith.constant 0 : index
    %c0_371 = arith.constant 0 : index
    %700 = vector.load %arg10[%c0_370, %c0_371] : memref<8x128xf32, #tpu.memory_space<vmem>>, vector<8x128xf32>
    tpu.vector_store %arg10[%c0_370, %c0_371], %698 {strides = array<i32>} : memref<8x128xf32, #tpu.memory_space<vmem>>, vector<8x128xf32>,
    %c8_i32_372 = arith.constant 8 : i32
    %c0_373 = arith.constant 0 : index
    %c0_374 = arith.constant 0 : index
    %701 = vector.load %arg10[%c0_373, %c0_374] : memref<8x128xf32, #tpu.memory_space<vmem>>, vector<8x128xf32>
    %c0_375 = arith.constant 0 : index
    %c0_376 = arith.constant 0 : index
    %702 = vector.load %arg5[%c0_375, %c0_376] : memref<128x128xf32, #tpu.memory_space<vmem>>, vector<128x128xf32>
    %cst_377 = arith.constant dense<0.000000e+00> : vector<8x128xf32>
    %703 = tpu.matmul %701, %702, %cst_377 {dimension_numbers = #tpu.dot_dimension_numbers<[1], [0], [0], [1], [0, 0, 1, 1], [], []>} : vector<8x128xf32>, vector<128x128xf32>, vector<8x128xf32> -> vector<8x128xf32>
    %c0_378 = arith.constant 0 : index
    %c0_379 = arith.constant 0 : index
    %704 = vector.load %arg6[%c0_378, %c0_379] : memref<1x128xf32, #tpu.memory_space<vmem>>, vector<1x128xf32>
    %705 = vector.broadcast %704 : vector<1x128xf32> to vector<8x128xf32>
    %706 = arith.addf %703, %705 : vector<8x128xf32>
    %c0_380 = arith.constant 0 : index
    %c0_381 = arith.constant 0 : index
    %707 = vector.load %arg7[%c0_380, %c0_381] : memref<8x128xf32, #tpu.memory_space<vmem>>, vector<8x128xf32>
    tpu.vector_store %arg7[%c0_380, %c0_381], %706 {strides = array<i32>} : memref<8x128xf32, #tpu.memory_space<vmem>>, vector<8x128xf32>,
    return
  }
}

</mosaic_0001>

<bundles_post_ra>
// kernel: _rnn_forward_impl.1
= control target key start
LH: loop header
LB: loop body
LE: loop exit
PB: predicated region body
PF: predicated region fallthrough
CT: control target
= control target key end

     0   :  { %12 = vsyncpa [#allocation7], 0  ;;  %s6509_s0 = inlined_call_operand.vmem [shape: f32[64,128], index: 0, kind: input, shape index: {}]   ;;  %s6510_s1 = inlined_call_operand.hbm [shape: f32[128,512], index: 1, kind: input, shape index: {}]   ;;  %s6511_s2 = inlined_call_operand.hbm [shape: f32[1,128,512], index: 2, kind: input, shape index: {}]   ;;  %s6512_s3 = inlined_call_operand.hbm [shape: f32[2,128,512], index: 3, kind: input, shape index: {}]   ;;  %s6513_s4 = inlined_call_operand.vmem [shape: f32[2,1,512], index: 4, kind: input, shape index: {}]   ;;  %s6514_s5 = inlined_call_operand.hbm [shape: f32[128,128], index: 5, kind: input, shape index: {}]   ;;  %s6515_s6 = inlined_call_operand.vmem [shape: f32[1,128], index: 6, kind: input, shape index: {}]   ;;  %s6516_s7 = inlined_call_operand.vmem [shape: f32[8,128], index: 7, kind: output, shape index: {}]  }
   0x1   :  { %13 = vsyncpa [#allocation9], 0 }
   0x2   :  { %14 = vsyncpa [#allocation12], 0  ;;  %s5442_s24 = smov [#allocation8]   ;;  %s5443_s26 = smov [#allocation6]  }
   0x3   :  { %s34_s25 = sshll.u32 %s5442_s24, 4  ;;  %s22_s27 = sshll.u32 %s5443_s26, 4  ;;  %s35_s25 = int_to_ptr.vmem [resolvable:$true] %s34_s25  ;;  %s5493_s27 = int_to_ptr.vmem [resolvable:$true] %s22_s27 }
   0x4   :  { %s5348_s30 = scalar_lea.hbm %s6511_s2, 8192 }
   0x5   :  { %p5349_p0 = scmp.ne.s32.totalorder %s6511_s2, %s5348_s30  ;;  %p5352_p1 = scmp.lt.u32.totalorder %s5348_s30, %s6511_s2 }
   0x7   :  { %p5354_p2 = pnand %p5352_p1, %p5349_p0 }
   0x9   :  { %5357 = shalt.err (!%p5354_p2)
}
   0xa   :  { %s5358_s12 = scalar_lea.vmem %s35_s25, 8192  ;;  %p5363_p4 = scmp.lt.s32.totalorder %s35_s25, %s35_s25 }
   0xb   :  { %p5359_p3 = scmp.ne.s32.totalorder %s35_s25, %s5358_s12  ;;  %p5364_p5 = scmp.lt.s32.totalorder %s5358_s12, %s5358_s12 }
   0xd   :  { %p5365_p6 = por %p5364_p5, %p5363_p4 }
   0xf   :  { %p5366_p7 = pnand %p5365_p6, %p5359_p3 }
  0x11   :  { %5369 = shalt.err (!%p5366_p7)
}
  0x12   :  { %s5444_s13 = smov 512   ;;  %s5445_s14 = smov 32  }
  0x13   :  { %40 = dma.hbm_to_vmem [thread:$0]  %s6511_s2, 8192, %s35_s25, [#allocation9], %s5444_s13, %s5444_s13, %s5445_s14  }
  0x14   :  { %s5370_s19 = scalar_lea.hbm %s6510_s1, 8192 }
  0x15   :  { %p5371_p8 = scmp.ne.s32.totalorder %s6510_s1, %s5370_s19  ;;  %p5374_p9 = scmp.lt.u32.totalorder %s5370_s19, %s6510_s1 }
  0x17   :  { %p5376_p10 = pnand %p5374_p9, %p5371_p8 }
  0x19   :  { %5379 = shalt.err (!%p5376_p10)
}
  0x1a   :  { %s5380_s24 = scalar_lea.vmem %s5493_s27, 8192  ;;  %p5385_p12 = scmp.lt.s32.totalorder %s5493_s27, %s5493_s27 }
  0x1b   :  { %p5381_p11 = scmp.ne.s32.totalorder %s5493_s27, %s5380_s24  ;;  %p5386_p13 = scmp.lt.s32.totalorder %s5380_s24, %s5380_s24 }
  0x1d   :  { %p5387_p0 = por %p5386_p13, %p5385_p12 }
  0x1f   :  { %p5388_p1 = pnand %p5387_p0, %p5381_p11 }
  0x21   :  { %5391 = shalt.err (!%p5388_p1)
}
  0x22   :  { %28 = dma.hbm_to_vmem [thread:$0]  %s6510_s1, 8192, %s5493_s27, [#allocation7], %s5444_s13, %s5444_s13, %s5445_s14  }
  0x23   :  { %s5446_s26 = smov [#allocation10]   ;;  %s5447_s29 = smov [#allocation11]  }
  0x24   :  { %s46_s28 = sshll.u32 %s5446_s26, 4  ;;  %s60_s30 = sshll.u32 %s5447_s29, 4  ;;  %s47_s28 = int_to_ptr.vmem [resolvable:$true] %s46_s28  ;;  %s5530_s30 = int_to_ptr.vmem [resolvable:$true] %s60_s30 }
  0x25   :  { %s5392_s10 = scalar_lea.hbm %s6512_s3, 16384 }
  0x26   :  { %p5393_p2 = scmp.ne.s32.totalorder %s6512_s3, %s5392_s10  ;;  %p5396_p3 = scmp.lt.u32.totalorder %s5392_s10, %s6512_s3 }
  0x28   :  { %p5398_p4 = pnand %p5396_p3, %p5393_p2 }
  0x2a   :  { %5401 = shalt.err (!%p5398_p4)
}
  0x2b   :  { %s5402_s1 = scalar_lea.vmem %s47_s28, 16384  ;;  %p5407_p6 = scmp.lt.s32.totalorder %s47_s28, %s47_s28 }
  0x2c   :  { %p5403_p5 = scmp.ne.s32.totalorder %s47_s28, %s5402_s1  ;;  %p5408_p7 = scmp.lt.s32.totalorder %s5402_s1, %s5402_s1 }
  0x2e   :  { %p5409_p8 = por %p5408_p7, %p5407_p6 }
  0x30   :  { %p5410_p9 = pnand %p5409_p8, %p5403_p5 }
  0x32   :  { %5413 = shalt.err (!%p5410_p9)
}
  0x33   :  { %52 = dma.hbm_to_vmem [thread:$0]  %s6512_s3, 16384, %s47_s28, [#allocation9], %s5444_s13, %s5444_s13, %s5445_s14  }
  0x34   :  { %s5414_s20 = scalar_lea.hbm %s6514_s5, 2048 }
  0x35   :  { %p5415_p10 = scmp.ne.s32.totalorder %s6514_s5, %s5414_s20  ;;  %p5418_p11 = scmp.lt.u32.totalorder %s5414_s20, %s6514_s5 }
  0x37   :  { %p5420_p12 = pnand %p5418_p11, %p5415_p10 }
  0x39   :  { %5423 = shalt.err (!%p5420_p12)
}
  0x3a   :  { %s5424_s2 = scalar_lea.vmem %s5530_s30, 2048  ;;  %p5429_p0 = scmp.lt.s32.totalorder %s5530_s30, %s5530_s30 }
  0x3b   :  { %p5425_p13 = scmp.ne.s32.totalorder %s5530_s30, %s5424_s2  ;;  %p5430_p1 = scmp.lt.s32.totalorder %s5424_s2, %s5424_s2 }
  0x3d   :  { %p5431_p2 = por %p5430_p1, %p5429_p0 }
  0x3f   :  { %p5432_p3 = pnand %p5431_p2, %p5425_p13 }
  0x41   :  { %5435 = shalt.err (!%p5432_p3)
}
  0x42   :  { %s5448_s3 = smov 128   ;;  %s5449_s13 = smov 8  }
  0x43   :  { %66 = dma.hbm_to_vmem [thread:$0]  %s6514_s5, 2048, %s5530_s30, [#allocation12], %s5448_s3, %s5448_s3, %s5449_s13  }
  0x44   :  { %5436 = dma.done.wait [#allocation7], 8192  }
  0x45   :  { %5437 = vsyncadd [#allocation7], 4294959104 }
  0x46   :  { %5438 = dma.done.wait [#allocation9], 24576  }
  0x47   :  { %5439 = vsyncadd [#allocation9], 4294942720 }
  0x48   :  { %5440 = dma.done.wait [#allocation12], 2048  }
  0x49   :  { %5441 = vsyncadd [#allocation12], 4294965248  ;;  %v5450_v0 = vmov 0.0   ;;  %v90_v1 = vld [vmem:[#allocation6 + $0x8] sm:$0xff]  ;;  %v92_v3 = vld [vmem:[#allocation6 + $0x18] sm:$0xff]  ;;  %vm5452_vm0 = vmmov 0  }
  0x4a   :  { %239 = vmatprep.mubr.f32.mxu0 %v5450_v0  ;;  %352 = vmatprep.mubr.f32.mxu1 %v5450_v0  ;;  %v94_v2 = vld [vmem:[#allocation6 + $0x28] sm:$0xff]  ;;  %v96_v5 = vld [vmem:[#allocation6 + $0x38] sm:$0xff]  ;;  %v89_v6 = vld [vmem:[#allocation6] sm:$0xff] }
  0x4b   :  { %v3873_v4 = vpack.c.bf16 %v94_v2, %v90_v1  ;;  %v93_v7 = vld [vmem:[#allocation6 + $0x20] sm:$0xff]  ;;  %v3905_v8 = vpack.c.bf16 %v96_v5, %v92_v3  ;;  %v91_v10 = vld [vmem:[#allocation6 + $0x10] sm:$0xff]  ;;  %v98_v12 = vld [vmem:[#allocation6 + $0x48] sm:$0xff] }
  0x4c   :  { %v3875_v9 = vpack.c.bf16 %v93_v7, %v89_v6  ;;  %v95_v11 = vld [vmem:[#allocation6 + $0x30] sm:$0xff]  ;;  %v102_v14 = vld [vmem:[#allocation6 + $0x68] sm:$0xff]  ;;  %v100_v15 = vld [vmem:[#allocation6 + $0x58] sm:$0xff] }
  0x4d   :  { %3874 = vmatprep.subr.bf16.mxu0 %v3873_v4  ;;  %v3907_v13 = vpack.c.bf16 %v95_v11, %v91_v10  ;;  %v104_v16 = vld [vmem:[#allocation6 + $0x78] sm:$0xff]  ;;  %3906 = vmatprep.subr.bf16.mxu1 %v3905_v8  ;;  %v3877_v17 = vpack.c.bf16 %v102_v14, %v98_v12  ;;  %v97_v19 = vld [vmem:[#allocation6 + $0x40] sm:$0xff]  ;;  %v99_v21 = vld [vmem:[#allocation6 + $0x50] sm:$0xff] }
  0x4e   :  { %3876 = vmatpush1.bf16.msra.mxu0 %v3875_v9  ;;  %v3909_v18 = vpack.c.bf16 %v104_v16, %v100_v15  ;;  %v101_v20 = vld [vmem:[#allocation6 + $0x60] sm:$0xff]  ;;  %v103_v23 = vld [vmem:[#allocation6 + $0x70] sm:$0xff]  ;;  %v106_v24 = vld [vmem:[#allocation6 + $0x88] sm:$0xff] }
  0x4f   :  { %3908 = vmatpush1.bf16.msra.mxu1 %v3907_v13  ;;  %v3879_v22 = vpack.c.bf16 %v101_v20, %v97_v19  ;;  %v110_v25 = vld [vmem:[#allocation6 + $0xa8] sm:$0xff]  ;;  %3878 = vmatprep.subr.bf16.mxu0 %v3877_v17  ;;  %v3911_v26 = vpack.c.bf16 %v103_v23, %v99_v21  ;;  %v108_v28 = vld [vmem:[#allocation6 + $0x98] sm:$0xff]  ;;  %v105_v30 = vld [vmem:[#allocation6 + $0x80] sm:$0xff] }
  0x50   :  { %3910 = vmatprep.subr.bf16.mxu1 %v3909_v18  ;;  %v3881_v27 = vpack.c.bf16 %v110_v25, %v106_v24  ;;  %v112_v29 = vld [vmem:[#allocation6 + $0xb8] sm:$0xff]  ;;  %v109_v32 = vld [vmem:[#allocation6 + $0xa0] sm:$0xff]  ;;  %v107_v33 = vld [vmem:[#allocation6 + $0x90] sm:$0xff] }
  0x51   :  { %v3913_v31 = vpack.c.bf16 %v112_v29, %v108_v28  ;;  %v111_v34 = vld [vmem:[#allocation6 + $0xb0] sm:$0xff]  ;;  %v3883_v35 = vpack.c.bf16 %v109_v32, %v105_v30  ;;  %v114_v36 = vld [vmem:[#allocation6 + $0xc8] sm:$0xff]  ;;  %v116_v38 = vld [vmem:[#allocation6 + $0xd8] sm:$0xff] }
  0x52   :  { %3880 = vmatpush1.bf16.msra.mxu0 %v3879_v22  ;;  %v118_v37 = vld [vmem:[#allocation6 + $0xe8] sm:$0xff]  ;;  %v3915_v39 = vpack.c.bf16 %v111_v34, %v107_v33  ;;  %v120_v41 = vld [vmem:[#allocation6 + $0xf8] sm:$0xff]  ;;  %v113_v42 = vld [vmem:[#allocation6 + $0xc0] sm:$0xff] }
  0x53   :  { %3912 = vmatpush1.bf16.msra.mxu1 %v3911_v26  ;;  %3882 = vmatprep.subr.bf16.mxu0 %v3881_v27  ;;  %v3885_v40 = vpack.c.bf16 %v118_v37, %v114_v36  ;;  %v117_v43 = vld [vmem:[#allocation6 + $0xe0] sm:$0xff]  ;;  %v3917_v44 = vpack.c.bf16 %v120_v41, %v116_v38  ;;  %v115_v45 = vld [vmem:[#allocation6 + $0xd0] sm:$0xff]  ;;  %v122_v47 = vld [vmem:[#allocation6 + $0x108] sm:$0xff] }
  0x54   :  { %3914 = vmatprep.subr.bf16.mxu1 %v3913_v31  ;;  %v119_v46 = vld [vmem:[#allocation6 + $0xf0] sm:$0xff]  ;;  %v126_v48 = vld [vmem:[#allocation6 + $0x128] sm:$0xff]  ;;  %v124_v49 = vld [vmem:[#allocation6 + $0x118] sm:$0xff]  ;;  %v3887_v51 = vpack.c.bf16 %v117_v43, %v113_v42 }
  0x55   :  { %v128_v50 = vld [vmem:[#allocation6 + $0x138] sm:$0xff]  ;;  %v3919_v52 = vpack.c.bf16 %v119_v46, %v115_v45  ;;  %v3889_v53 = vpack.c.bf16 %v126_v48, %v122_v47  ;;  %v121_v54 = vld [vmem:[#allocation6 + $0x100] sm:$0xff]  ;;  %v123_v56 = vld [vmem:[#allocation6 + $0x110] sm:$0xff] }
  0x56   :  { %3884 = vmatpush1.bf16.msra.mxu0 %v3883_v35  ;;  %v125_v55 = vld [vmem:[#allocation6 + $0x120] sm:$0xff]  ;;  %v3921_v57 = vpack.c.bf16 %v128_v50, %v124_v49  ;;  %v127_v58 = vld [vmem:[#allocation6 + $0x130] sm:$0xff]  ;;  %v130_v59 = vld [vmem:[#allocation6 + $0x148] sm:$0xff] }
  0x57   :  { %3916 = vmatpush1.bf16.msra.mxu1 %v3915_v39  ;;  %3886 = vmatprep.subr.bf16.mxu0 %v3885_v40  ;;  %v134_v60 = vld [vmem:[#allocation6 + $0x168] sm:$0xff]  ;;  %v132_v61 = vld [vmem:[#allocation6 + $0x158] sm:$0xff]  ;;  %v3891_v63 = vpack.c.bf16 %v125_v55, %v121_v54  ;;  %v3923_v1 = vpack.c.bf16 %v127_v58, %v123_v56  ;;  %v129_v3 = vld [vmem:[#allocation6 + $0x140] sm:$0xff] }
  0x58   :  { %3918 = vmatprep.subr.bf16.mxu1 %v3917_v44  ;;  %v136_v62 = vld [vmem:[#allocation6 + $0x178] sm:$0xff]  ;;  %v3893_v2 = vpack.c.bf16 %v134_v60, %v130_v59  ;;  %v133_v4 = vld [vmem:[#allocation6 + $0x160] sm:$0xff]  ;;  %v131_v5 = vld [vmem:[#allocation6 + $0x150] sm:$0xff] }
  0x59   :  { %v3925_v6 = vpack.c.bf16 %v136_v62, %v132_v61  ;;  %v135_v7 = vld [vmem:[#allocation6 + $0x170] sm:$0xff]  ;;  %v138_v8 = vld [vmem:[#allocation6 + $0x188] sm:$0xff]  ;;  %v140_v10 = vld [vmem:[#allocation6 + $0x198] sm:$0xff]  ;;  %v3895_v12 = vpack.c.bf16 %v133_v4, %v129_v3 }
  0x5a   :  { %3888 = vmatpush1.bf16.msra.mxu0 %v3887_v51  ;;  %v142_v9 = vld [vmem:[#allocation6 + $0x1a8] sm:$0xff]  ;;  %v144_v11 = vld [vmem:[#allocation6 + $0x1b8] sm:$0xff]  ;;  %v3927_v13 = vpack.c.bf16 %v135_v7, %v131_v5  ;;  %v137_v15 = vld [vmem:[#allocation6 + $0x180] sm:$0xff] }
  0x5b   :  { %3920 = vmatpush1.bf16.msra.mxu1 %v3919_v52  ;;  %3890 = vmatprep.subr.bf16.mxu0 %v3889_v53  ;;  %v3897_v14 = vpack.c.bf16 %v142_v9, %v138_v8  ;;  %v141_v16 = vld [vmem:[#allocation6 + $0x1a0] sm:$0xff]  ;;  %v139_v17 = vld [vmem:[#allocation6 + $0x190] sm:$0xff]  ;;  %v3929_v18 = vpack.c.bf16 %v144_v11, %v140_v10  ;;  %v146_v20 = vld [vmem:[#allocation6 + $0x1c8] sm:$0xff] }
  0x5c   :  { %3922 = vmatprep.subr.bf16.mxu1 %v3921_v57  ;;  %v143_v19 = vld [vmem:[#allocation6 + $0x1b0] sm:$0xff]  ;;  %v150_v21 = vld [vmem:[#allocation6 + $0x1e8] sm:$0xff]  ;;  %v148_v22 = vld [vmem:[#allocation6 + $0x1d8] sm:$0xff]  ;;  %v3899_v24 = vpack.c.bf16 %v141_v16, %v137_v15 }
  0x5d   :  { %v152_v23 = vld [vmem:[#allocation6 + $0x1f8] sm:$0xff]  ;;  %v3931_v25 = vpack.c.bf16 %v143_v19, %v139_v17  ;;  %v3901_v26 = vpack.c.bf16 %v150_v21, %v146_v20  ;;  %v145_v27 = vld [vmem:[#allocation6 + $0x1c0] sm:$0xff]  ;;  %v147_v29 = vld [vmem:[#allocation6 + $0x1d0] sm:$0xff] }
  0x5e   :  { %3892 = vmatpush1.bf16.msra.mxu0 %v3891_v63  ;;  %v149_v28 = vld [vmem:[#allocation6 + $0x1e0] sm:$0xff]  ;;  %v3933_v30 = vpack.c.bf16 %v152_v23, %v148_v22  ;;  %v151_v31 = vld [vmem:[#allocation6 + $0x1f0] sm:$0xff]  ;;  %v436_v32 = vld [vmem:[#allocation10 + $0x8] sm:$0xff] }
  0x5f   :  { %3924 = vmatpush1.bf16.msra.mxu1 %v3923_v1  ;;  %3894 = vmatprep.subr.bf16.mxu0 %v3893_v2  ;;  %v440_v33 = vld [vmem:[#allocation10 + $0x28] sm:$0xff]  ;;  %v438_v34 = vld [vmem:[#allocation10 + $0x18] sm:$0xff]  ;;  %v3903_v36 = vpack.c.bf16 %v149_v28, %v145_v27  ;;  %v3935_v37 = vpack.c.bf16 %v151_v31, %v147_v29  ;;  %v435_v39 = vld [vmem:[#allocation10] sm:$0xff] }
  0x60   :  { %3926 = vmatprep.subr.bf16.mxu1 %v3925_v6  ;;  %v442_v35 = vld [vmem:[#allocation10 + $0x38] sm:$0xff]  ;;  %v5566_v38 = vpack.c.bf16 %v440_v33, %v436_v32  ;;  %v439_v40 = vld [vmem:[#allocation10 + $0x20] sm:$0xff]  ;;  %v437_v42 = vld [vmem:[#allocation10 + $0x10] sm:$0xff] }
  0x61   :  { %v5568_v41 = vpack.c.bf16 %v442_v35, %v438_v34  ;;  %v441_v43 = vld [vmem:[#allocation10 + $0x30] sm:$0xff]  ;;  %v444_v44 = vld [vmem:[#allocation10 + $0x48] sm:$0xff]  ;;  %v81_v46 = vld [vmem:[%s6509_s0] sm:$0xff]  ;;  %v5573_v47 = vpack.c.bf16 %v439_v40, %v435_v39 }
  0x62   :  { %3896 = vmatpush1.bf16.msra.mxu0 %v3895_v12  ;;  %v448_v45 = vld [vmem:[#allocation10 + $0x68] sm:$0xff]  ;;  %v446_v48 = vld [vmem:[#allocation10 + $0x58] sm:$0xff]  ;;  %v5576_v50 = vpack.c.bf16 %v441_v43, %v437_v42  ;;  %v443_v51 = vld [vmem:[#allocation10 + $0x40] sm:$0xff] }
  0x63   :  { %3928 = vmatpush1.bf16.msra.mxu1 %v3927_v13  ;;  %3898 = vmatprep.subr.bf16.mxu0 %v3897_v14  ;;  %v450_v49 = vld [vmem:[#allocation10 + $0x78] sm:$0xff]  ;;  %v447_v52 = vld [vmem:[#allocation10 + $0x60] sm:$0xff]  ;;  %v5579_v53 = vpack.c.bf16 %v448_v45, %v444_v44  ;;  %v445_v54 = vld [vmem:[#allocation10 + $0x50] sm:$0xff] }
  0x64   :  { %3930 = vmatprep.subr.bf16.mxu1 %v3929_v18  ;;  %v449_v55 = vld [vmem:[#allocation10 + $0x70] sm:$0xff]  ;;  %v5581_v56 = vpack.c.bf16 %v450_v49, %v446_v48  ;;  %v452_v57 = vld [vmem:[#allocation10 + $0x88] sm:$0xff]  ;;  %v5587_v60 = vpack.c.bf16 %v447_v52, %v443_v51  ;;  %v454_v61 = vld [vmem:[#allocation10 + $0x98] sm:$0xff] }
  0x65   :  { %v456_v58 = vld [vmem:[#allocation10 + $0xa8] sm:$0xff]  ;;  %v458_v62 = vld [vmem:[#allocation10 + $0xb8] sm:$0xff]  ;;  %v5591_v63 = vpack.c.bf16 %v449_v55, %v445_v54  ;;  %v451_v1 = vld [vmem:[#allocation10 + $0x80] sm:$0xff] }
  0x66   :  { %3900 = vmatpush1.bf16.msra.mxu0 %v3899_v24  ;;  %v82_v59 = vld [vmem:[%s6509_s0 + $0x8] sm:$0xff]  ;;  %v455_v2 = vld [vmem:[#allocation10 + $0xa0] sm:$0xff]  ;;  %v5595_v3 = vpack.c.bf16 %v456_v58, %v452_v57  ;;  %v453_v4 = vld [vmem:[#allocation10 + $0x90] sm:$0xff]  ;;  %v5598_v6 = vpack.c.bf16 %v458_v62, %v454_v61 }
  0x67   :  { %3932 = vmatpush1.bf16.msra.mxu1 %v3931_v25  ;;  %3902 = vmatprep.subr.bf16.mxu0 %v3901_v26  ;;  %v457_v5 = vld [vmem:[#allocation10 + $0xb0] sm:$0xff]  ;;  %v460_v7 = vld [vmem:[#allocation10 + $0xc8] sm:$0xff]  ;;  %v5604_v10 = vpack.c.bf16 %v455_v2, %v451_v1  ;;  %v462_v11 = vld [vmem:[#allocation10 + $0xd8] sm:$0xff] }
  0x68   :  { %3934 = vmatprep.subr.bf16.mxu1 %v3933_v30  ;;  %v464_v8 = vld [vmem:[#allocation10 + $0xe8] sm:$0xff]  ;;  %v83_v9 = vld [vmem:[%s6509_s0 + $0x10] sm:$0xff]  ;;  %v466_v12 = vld [vmem:[#allocation10 + $0xf8] sm:$0xff]  ;;  %v5608_v13 = vpack.c.bf16 %v457_v5, %v453_v4 }
  0x69   :  { %v459_v14 = vld [vmem:[#allocation10 + $0xc0] sm:$0xff]  ;;  %v5612_v16 = vpack.c.bf16 %v464_v8, %v460_v7  ;;  %v461_v17 = vld [vmem:[#allocation10 + $0xd0] sm:$0xff]  ;;  %v5615_v19 = vpack.c.bf16 %v466_v12, %v462_v11  ;;  %v468_v20 = vld [vmem:[#allocation10 + $0x108] sm:$0xff] }
  0x6a   :  { %3904 = vmatpush1.bf16.msra.mxu0 %v3903_v36  ;;  %v463_v15 = vld [vmem:[#allocation10 + $0xe0] sm:$0xff]  ;;  %v465_v18 = vld [vmem:[#allocation10 + $0xf0] sm:$0xff]  ;;  %v472_v21 = vld [vmem:[#allocation10 + $0x128] sm:$0xff] }
  0x6b   :  { %3936 = vmatpush1.bf16.msra.mxu1 %v3935_v37  ;;  %3938 = vmatprep.subr.bf16.mxu0 %v5566_v38  ;;  %v84_v22 = vld [vmem:[%s6509_s0 + $0x18] sm:$0xff]  ;;  %v5621_v23 = vpack.c.bf16 %v463_v15, %v459_v14  ;;  %v5625_v26 = vpack.c.bf16 %v465_v18, %v461_v17  ;;  %v467_v27 = vld [vmem:[#allocation10 + $0x100] sm:$0xff]  ;;  %v5629_v29 = vpack.c.bf16 %v472_v21, %v468_v20  ;;  %v469_v30 = vld [vmem:[#allocation10 + $0x110] sm:$0xff] }
  0x6c   :  { %3970 = vmatprep.subr.bf16.mxu1 %v5568_v41  ;;  %v470_v24 = vld [vmem:[#allocation10 + $0x118] sm:$0xff]  ;;  %v471_v28 = vld [vmem:[#allocation10 + $0x120] sm:$0xff]  ;;  %v473_v31 = vld [vmem:[#allocation10 + $0x130] sm:$0xff] }
  0x6d   :  { %240 = vmatmul.mubr.f32.vlgmr.msra.gmra.mrb[0].mxu0 %v81_v46  ;;  %v474_v25 = vld [vmem:[#allocation10 + $0x138] sm:$0xff]  ;;  %v476_v33 = vld [vmem:[#allocation10 + $0x148] sm:$0xff]  ;;  %v85_v35 = vld [vmem:[%s6509_s0 + $0x20] sm:$0xff]  ;;  %v5638_v36 = vpack.c.bf16 %v471_v28, %v467_v27  ;;  %v5642_v40 = vpack.c.bf16 %v473_v31, %v469_v30  ;;  %v155_v28 = vlaneseq }
  0x6e   :  { %353 = vmatmul.mubr.f32.vlgmr.msra.gmra.mrb[0].mxu1 %v81_v46  ;;  %3940 = vmatpush1.bf16.msra.mxu0 %v5573_v47  ;;  %v5632_v32 = vpack.c.bf16 %v474_v25, %v470_v24  ;;  %v480_v34 = vld [vmem:[#allocation10 + $0x168] sm:$0xff]  ;;  %v478_v37 = vld [vmem:[#allocation10 + $0x158] sm:$0xff]  ;;  %v475_v42 = vld [vmem:[#allocation10 + $0x140] sm:$0xff] }
  0x6f   :  { %3972 = vmatpush1.bf16.msra.mxu1 %v5576_v50  ;;  %245 = vmatprep.mubr.f32.mxu0 %v5450_v0  ;;  %v482_v39 = vld [vmem:[#allocation10 + $0x178] sm:$0xff]  ;;  %v479_v43 = vld [vmem:[#allocation10 + $0x160] sm:$0xff]  ;;  %v5646_v44 = vpack.c.bf16 %v480_v34, %v476_v33  ;;  %v477_v45 = vld [vmem:[#allocation10 + $0x150] sm:$0xff]  ;;  %v5740_v30 = vshrl.u32 %v155_v28, 7 }
  0x70   :  { %358 = vmatprep.mubr.f32.mxu1 %v5450_v0  ;;  %3942 = vmatprep.subr.bf16.mxu0 %v5579_v53  ;;  %v481_v46 = vld [vmem:[#allocation10 + $0x170] sm:$0xff]  ;;  %v5649_v48 = vpack.c.bf16 %v482_v39, %v478_v37  ;;  %v484_v49 = vld [vmem:[#allocation10 + $0x188] sm:$0xff]  ;;  %v5655_v54 = vpack.c.bf16 %v479_v43, %v475_v42  ;;  %v486_v55 = vld [vmem:[#allocation10 + $0x198] sm:$0xff] }
  0x71   :  { %246 = vmatmul.mubr.f32.gmra.mrb[2].mxu0 %v82_v59  ;;  %3974 = vmatprep.subr.bf16.mxu1 %v5581_v56  ;;  %v488_v51 = vld [vmem:[#allocation10 + $0x1a8] sm:$0xff]  ;;  %v490_v57 = vld [vmem:[#allocation10 + $0x1b8] sm:$0xff]  ;;  %v5659_v58 = vpack.c.bf16 %v481_v46, %v477_v45  ;;  %v487_v61 = vld [vmem:[#allocation10 + $0x1a0] sm:$0xff]  ;;  %v157_v31 = vsub.s32 0, %v5740_v30  ;;  %v161_v34 = vsub.s32 1, %v5740_v30  ;;  %v165_v37 = vsub.s32 2, %v5740_v30 }
  0x72   :  { %359 = vmatmul.mubr.f32.gmra.mrb[2].mxu1 %v82_v59  ;;  %3944 = vmatpush1.bf16.msra.mxu0 %v5587_v60  ;;  %v86_v52 = vld [vmem:[%s6509_s0 + $0x28] sm:$0xff]  ;;  %v483_v59 = vld [vmem:[#allocation10 + $0x180] sm:$0xff]  ;;  %v5663_v62 = vpack.c.bf16 %v488_v51, %v484_v49  ;;  %v485_v1 = vld [vmem:[#allocation10 + $0x190] sm:$0xff]  ;;  %v5666_v4 = vpack.c.bf16 %v490_v57, %v486_v55  ;;  %v6517_v51 = vsub.s32 3, %v5740_v30 }
  0x73   :  { %3976 = vmatpush1.bf16.msra.mxu1 %v5591_v63  ;;  %251 = vmatprep.mubr.f32.mxu0 %v5450_v0  ;;  %v489_v2 = vld [vmem:[#allocation10 + $0x1b0] sm:$0xff]  ;;  %v492_v5 = vld [vmem:[#allocation10 + $0x1c8] sm:$0xff]  ;;  %v494_v11 = vld [vmem:[#allocation10 + $0x1d8] sm:$0xff] }
  0x74   :  { %364 = vmatprep.mubr.f32.mxu1 %v5450_v0  ;;  %3946 = vmatprep.subr.bf16.mxu0 %v5595_v3  ;;  %v496_v7 = vld [vmem:[#allocation10 + $0x1e8] sm:$0xff]  ;;  %v87_v8 = vld [vmem:[%s6509_s0 + $0x30] sm:$0xff]  ;;  %v498_v12 = vld [vmem:[#allocation10 + $0x1f8] sm:$0xff]  ;;  %v5676_v14 = vpack.c.bf16 %v489_v2, %v485_v1 }
  0x75   :  { %252 = vmatmul.mubr.f32.gmra.mrb[4].mxu0 %v83_v9  ;;  %3978 = vmatprep.subr.bf16.mxu1 %v5598_v6  ;;  %v491_v15 = vld [vmem:[#allocation10 + $0x1c0] sm:$0xff]  ;;  %v5680_v18 = vpack.c.bf16 %v496_v7, %v492_v5  ;;  %v493_v20 = vld [vmem:[#allocation10 + $0x1d0] sm:$0xff]  ;;  %v88_v24 = vld [vmem:[%s6509_s0 + $0x38] sm:$0xff] }
  0x76   :  { %365 = vmatmul.mubr.f32.gmra.mrb[4].mxu1 %v83_v9  ;;  %3948 = vmatpush1.bf16.msra.mxu0 %v5604_v10  ;;  %v5672_v9 = vpack.c.bf16 %v487_v61, %v483_v59  ;;  %v495_v17 = vld [vmem:[#allocation10 + $0x1e0] sm:$0xff]  ;;  %v497_v21 = vld [vmem:[#allocation10 + $0x1f0] sm:$0xff] }
  0x77   :  { %3980 = vmatpush1.bf16.msra.mxu1 %v5608_v13  ;;  %257 = vmatprep.mubr.f32.mxu0 %v5450_v0  ;;  %v5689_v25 = vpack.c.bf16 %v495_v17, %v491_v15  ;;  %v5693_v27 = vpack.c.bf16 %v497_v21, %v493_v20  ;;  %v153_v33 = vld [vmem:[%s6513_s4] sm:$0xf] }
  0x78   :  { %370 = vmatprep.mubr.f32.mxu1 %v5450_v0  ;;  %3950 = vmatprep.subr.bf16.mxu0 %v5612_v16  ;;  %v5754_v39 = vrot.slane %v153_v33, %v161_v34  ;;  %v5759_v45 = vrot.slane %v153_v33, %v165_v37  ;;  %v5766_v1 = vrot.slane %v153_v33, %v6517_v51 }
  0x79   :  { %258 = vmatmul.mubr.f32.gmra.mrb[6].mxu0 %v84_v22  ;;  %3982 = vmatprep.subr.bf16.mxu1 %v5615_v19 }
  0x7a   :  { %371 = vmatmul.mubr.f32.gmra.mrb[6].mxu1 %v84_v22  ;;  %3952 = vmatpush1.bf16.msra.mxu0 %v5621_v23  ;;  %v5683_v22 = vpack.c.bf16 %v498_v12, %v494_v11 }
  0x7b   :  { %3984 = vmatpush1.bf16.msra.mxu1 %v5625_v26  ;;  %263 = vmatprep.mubr.f32.mxu0 %v5450_v0 }
  0x7c   :  { %376 = vmatprep.mubr.f32.mxu1 %v5450_v0  ;;  %3954 = vmatprep.subr.bf16.mxu0 %v5629_v29 }
  0x7d   :  { %264 = vmatmul.mubr.f32.gmra.mrb[8].mxu0 %v85_v35  ;;  %3986 = vmatprep.subr.bf16.mxu1 %v5632_v32 }
  0x7e   :  { %377 = vmatmul.mubr.f32.gmra.mrb[8].mxu1 %v85_v35  ;;  %3956 = vmatpush1.bf16.msra.mxu0 %v5638_v36  ;;  %v5749_v35 = vrot.slane %v153_v33, %v157_v31 }
  0x7f   :  { %3988 = vmatpush1.bf16.msra.mxu1 %v5642_v40  ;;  %269 = vmatprep.mubr.f32.mxu0 %v5450_v0 }
  0x80   :  { %382 = vmatprep.mubr.f32.mxu1 %v5450_v0  ;;  %3958 = vmatprep.subr.bf16.mxu0 %v5646_v44 }
  0x81   :  { %270 = vmatmul.mubr.f32.gmra.mrb[10].mxu0 %v86_v52  ;;  %3990 = vmatprep.subr.bf16.mxu1 %v5649_v48 }
  0x82   :  { %383 = vmatmul.mubr.f32.gmra.mrb[10].mxu1 %v86_v52  ;;  %3960 = vmatpush1.bf16.msra.mxu0 %v5655_v54 }
  0x83   :  { %3992 = vmatpush1.bf16.msra.mxu1 %v5659_v58  ;;  %275 = vmatprep.mubr.f32.mxu0 %v5450_v0 }
  0x84   :  { %388 = vmatprep.mubr.f32.mxu1 %v5450_v0  ;;  %3962 = vmatprep.subr.bf16.mxu0 %v5663_v62 }
  0x85   :  { %276 = vmatmul.mubr.f32.gmra.mrb[12].mxu0 %v87_v8  ;;  %3994 = vmatprep.subr.bf16.mxu1 %v5666_v4 }
  0x86   :  { %389 = vmatmul.mubr.f32.gmra.mrb[12].mxu1 %v87_v8  ;;  %3964 = vmatpush1.bf16.msra.mxu0 %v5672_v9 }
  0x87   :  { %3996 = vmatpush1.bf16.msra.mxu1 %v5676_v14  ;;  %281 = vmatprep.mubr.f32.mxu0 %v5450_v0 }
  0x88   :  { %394 = vmatprep.mubr.f32.mxu1 %v5450_v0  ;;  %3966 = vmatprep.subr.bf16.mxu0 %v5680_v18 }
  0x89   :  { %282 = vmatmul.mubr.f32.gmra.mrb[14].mxu0 %v88_v24  ;;  %3998 = vmatprep.subr.bf16.mxu1 %v5683_v22 }
  0x8a   :  { %395 = vmatmul.mubr.f32.gmra.mrb[14].mxu1 %v88_v24  ;;  %3968 = vmatpush1.bf16.msra.mxu0 %v5689_v25 }
  0x8b   :  { %4000 = vmatpush1.bf16.msra.mxu1 %v5693_v27  ;;  %571 = vmatprep.mubr.f32.mxu0 %v5450_v0 }
  0x8c   :  { %642 = vmatprep.mubr.f32.mxu1 %v5450_v0  ;;  %4002 = vmatprep.subr.bf16.mxu0 %v5566_v38 }
  0x8d   :  { %572 = vmatmul.mubr.f32.vlgmr.msra.gmra.mrb[0].mxu0 %v5450_v0  ;;  %4034 = vmatprep.subr.bf16.mxu1 %v5568_v41 }
  0x8e   :  { %643 = vmatmul.mubr.f32.vlgmr.msra.gmra.mrb[0].mxu1 %v5450_v0  ;;  %4004 = vmatpush1.bf16.msra.mxu0 %v5573_v47 }
  0x8f   :  { %4036 = vmatpush1.bf16.msra.mxu1 %v5576_v50  ;;  %4006 = vmatprep.subr.bf16.mxu0 %v5579_v53 }
  0x90   :  { %4038 = vmatprep.subr.bf16.mxu1 %v5581_v56  ;;  %747 = vmatprep.mubr.f32.mxu0 %v5450_v0 }
  0x91   :  { %818 = vmatprep.mubr.f32.mxu1 %v5450_v0 }
  0x92   :  { %4008 = vmatpush1.bf16.msra.mxu0 %v5587_v60 }
  0x93   :  { %4040 = vmatpush1.bf16.msra.mxu1 %v5591_v63  ;;  %4010 = vmatprep.subr.bf16.mxu0 %v5595_v3 }
  0x94   :  { %4042 = vmatprep.subr.bf16.mxu1 %v5598_v6 }
  0x96   :  { %4012 = vmatpush1.bf16.msra.mxu0 %v5604_v10 }
  0x97   :  { %4044 = vmatpush1.bf16.msra.mxu1 %v5608_v13  ;;  %4014 = vmatprep.subr.bf16.mxu0 %v5612_v16 }
  0x98   :  { %4046 = vmatprep.subr.bf16.mxu1 %v5615_v19 }
  0x9a   :  { %4016 = vmatpush1.bf16.msra.mxu0 %v5621_v23 }
  0x9b   :  { %4048 = vmatpush1.bf16.msra.mxu1 %v5625_v26  ;;  %4018 = vmatprep.subr.bf16.mxu0 %v5629_v29 }
  0x9c   :  { %4050 = vmatprep.subr.bf16.mxu1 %v5632_v32 }
  0x9e   :  { %4020 = vmatpush1.bf16.msra.mxu0 %v5638_v36 }
  0x9f   :  { %4052 = vmatpush1.bf16.msra.mxu1 %v5642_v40  ;;  %4022 = vmatprep.subr.bf16.mxu0 %v5646_v44 }
  0xa0   :  { %4054 = vmatprep.subr.bf16.mxu1 %v5649_v48 }
  0xa2   :  { %4024 = vmatpush1.bf16.msra.mxu0 %v5655_v54 }
  0xa3   :  { %4056 = vmatpush1.bf16.msra.mxu1 %v5659_v58  ;;  %4026 = vmatprep.subr.bf16.mxu0 %v5663_v62 }
  0xa4   :  { %4058 = vmatprep.subr.bf16.mxu1 %v5666_v4 }
  0xa6   :  { %4028 = vmatpush1.bf16.msra.mxu0 %v5672_v9 }
  0xa7   :  { %4060 = vmatpush1.bf16.msra.mxu1 %v5676_v14  ;;  %4030 = vmatprep.subr.bf16.mxu0 %v5680_v18 }
  0xa8   :  { %4062 = vmatprep.subr.bf16.mxu1 %v5683_v22 }
  0xaa   :  { %4032 = vmatpush1.bf16.msra.mxu0 %v5689_v25 }
  0xab   :  { %4064 = vmatpush1.bf16.msra.mxu1 %v5693_v27  ;;  %4066 = vmatprep.subr.bf16.mxu0 %v5566_v38 }
  0xac   :  { %4098 = vmatprep.subr.bf16.mxu1 %v5568_v41 }
 0x160   :  { %v573_v42 = vpop.f32.mrb[0].mxu0 }
 0x161   :  { %v5049_v43 = vadd.f32 %v573_v42, %v5749_v35  ;;  %v644_v46 = vpop.f32.mrb[0].mxu1  ;;  %v575_v49 = vpop.f32.mrb[1].mxu0 }
 0x162   :  { %v5050_v52 = vadd.f32 %v575_v49, %v5754_v39  ;;  %v646_v55 = vpop.f32.mrb[1].mxu1  ;;  %v5065_v61 = vadd.f32 %v644_v46, %v5759_v45 }
 0x163   :  { %v653_v57 = vmul.f32 0.5, %v5049_v43  ;;  %v5066_v2 = vadd.f32 %v646_v55, %v5766_v1 }
 0x164   :  { %v657_v59 = vmul.f32 0.5, %v5050_v52 }
 0x165   :  { %5188 = vtanh.f32 %v653_v57  ;;  %v662_v5 = vmul.f32 0.5, %v5066_v2 }
 0x166   :  { %5190 = vtanh.f32 %v657_v59 }
 0x167   :  { %5192 = vtanh.f32 %v5065_v61 }
 0x168   :  { %5194 = vtanh.f32 %v662_v5 }
 0x16f   :  { %v5189_v7 = vpop.eup %5188 }
 0x170   :  { %v5191_v8 = vpop.eup %5190  ;;  %v655_v11 = vmul.f32 0.5, %v5189_v7 }
 0x171   :  { %v659_v12 = vmul.f32 0.5, %v5191_v8  ;;  %v5193_v17 = vpop.eup %5192 }
 0x172   :  { %v656_v15 = vadd.f32 0.5, %v655_v11  ;;  %v5195_v33 = vpop.eup %5194 }
 0x173   :  { %v660_v20 = vadd.f32 0.5, %v659_v12  ;;  %v664_v42 = vmul.f32 0.5, %v5195_v33 }
 0x174   :  { %v668_v21 = vmul.f32 %v5193_v17, %v656_v15 }
 0x175   :  { %v667_v24 = vmul.f32 0.0, %v660_v20  ;;  %v665_v43 = vadd.f32 0.5, %v664_v42 }
 0x177   :  { %v5769_v28 = vadd.f32 %v668_v21, %v667_v24 }
 0x179   :  { %5196 = vtanh.f32 %v5769_v28 }
 0x183   :  { %v5197_v46 = vpop.eup %5196 }
 0x184   :  { %v5772_v49 = vmul.f32 %v5197_v46, %v665_v43 }
 0x186   :  { %748 = vmatmul.mubr.f32.vlgmr.msra.gmra.mrb[2].mxu0 %v5772_v49  ;;  %819 = vmatmul.mubr.f32.vlgmr.msra.gmra.mrb[2].mxu1 %v5772_v49 }
 0x187   :  { %4068 = vmatpush1.bf16.msra.mxu0 %v5573_v47  ;;  %4100 = vmatpush1.bf16.msra.mxu1 %v5576_v50 }
 0x188   :  { %4070 = vmatprep.subr.bf16.mxu0 %v5579_v53  ;;  %4102 = vmatprep.subr.bf16.mxu1 %v5581_v56 }
 0x189   :  { %924 = vmatprep.mubr.f32.mxu0 %v5450_v0  ;;  %995 = vmatprep.mubr.f32.mxu1 %v5450_v0 }
 0x18b   :  { %4072 = vmatpush1.bf16.msra.mxu0 %v5587_v60  ;;  %4104 = vmatpush1.bf16.msra.mxu1 %v5591_v63 }
 0x18c   :  { %4074 = vmatprep.subr.bf16.mxu0 %v5595_v3  ;;  %4106 = vmatprep.subr.bf16.mxu1 %v5598_v6 }
 0x18f   :  { %4076 = vmatpush1.bf16.msra.mxu0 %v5604_v10  ;;  %4108 = vmatpush1.bf16.msra.mxu1 %v5608_v13 }
 0x190   :  { %4078 = vmatprep.subr.bf16.mxu0 %v5612_v16  ;;  %4110 = vmatprep.subr.bf16.mxu1 %v5615_v19 }
 0x193   :  { %4080 = vmatpush1.bf16.msra.mxu0 %v5621_v23  ;;  %4112 = vmatpush1.bf16.msra.mxu1 %v5625_v26 }
 0x194   :  { %4082 = vmatprep.subr.bf16.mxu0 %v5629_v29  ;;  %4114 = vmatprep.subr.bf16.mxu1 %v5632_v32 }
 0x197   :  { %4084 = vmatpush1.bf16.msra.mxu0 %v5638_v36  ;;  %4116 = vmatpush1.bf16.msra.mxu1 %v5642_v40 }
 0x198   :  { %4086 = vmatprep.subr.bf16.mxu0 %v5646_v44  ;;  %4118 = vmatprep.subr.bf16.mxu1 %v5649_v48 }
 0x19b   :  { %4088 = vmatpush1.bf16.msra.mxu0 %v5655_v54  ;;  %4120 = vmatpush1.bf16.msra.mxu1 %v5659_v58 }
 0x19c   :  { %4090 = vmatprep.subr.bf16.mxu0 %v5663_v62  ;;  %4122 = vmatprep.subr.bf16.mxu1 %v5666_v4 }
 0x19f   :  { %4092 = vmatpush1.bf16.msra.mxu0 %v5672_v9  ;;  %4124 = vmatpush1.bf16.msra.mxu1 %v5676_v14 }
 0x1a0   :  { %4094 = vmatprep.subr.bf16.mxu0 %v5680_v18  ;;  %4126 = vmatprep.subr.bf16.mxu1 %v5683_v22 }
 0x1a3   :  { %4096 = vmatpush1.bf16.msra.mxu0 %v5689_v25  ;;  %4128 = vmatpush1.bf16.msra.mxu1 %v5693_v27 }
 0x1a4   :  { %4130 = vmatprep.subr.bf16.mxu0 %v5566_v38  ;;  %4162 = vmatprep.subr.bf16.mxu1 %v5568_v41 }
 0x259   :  { %v749_v52 = vpop.f32.mrb[2].mxu0  ;;  %v820_v55 = vpop.f32.mrb[2].mxu1 }
 0x25a   :  { %v5051_v57 = vadd.f32 %v749_v52, %v5749_v35  ;;  %v751_v59 = vpop.f32.mrb[3].mxu0  ;;  %v822_v61 = vpop.f32.mrb[3].mxu1  ;;  %v5067_v8 = vadd.f32 %v820_v55, %v5759_v45 }
 0x25b   :  { %v5052_v2 = vadd.f32 %v751_v59, %v5754_v39  ;;  %v5068_v11 = vadd.f32 %v822_v61, %v5766_v1 }
 0x25c   :  { %v829_v5 = vmul.f32 0.5, %v5051_v57 }
 0x25d   :  { %v833_v7 = vmul.f32 0.5, %v5052_v2  ;;  %v838_v12 = vmul.f32 0.5, %v5068_v11 }
 0x25e   :  { %5198 = vtanh.f32 %v829_v5 }
 0x25f   :  { %5200 = vtanh.f32 %v833_v7 }
 0x260   :  { %5202 = vtanh.f32 %v5067_v8 }
 0x261   :  { %5204 = vtanh.f32 %v838_v12 }
 0x268   :  { %v5199_v15 = vpop.eup %5198 }
 0x269   :  { %v5201_v17 = vpop.eup %5200  ;;  %v831_v20 = vmul.f32 0.5, %v5199_v15 }
 0x26a   :  { %v835_v21 = vmul.f32 0.5, %v5201_v17  ;;  %v5203_v33 = vpop.eup %5202 }
 0x26b   :  { %v832_v24 = vadd.f32 0.5, %v831_v20  ;;  %v5205_v55 = vpop.eup %5204 }
 0x26c   :  { %v836_v42 = vadd.f32 0.5, %v835_v21  ;;  %v840_v57 = vmul.f32 0.5, %v5205_v55 }
 0x26d   :  { %v844_v43 = vmul.f32 %v5203_v33, %v832_v24 }
 0x26e   :  { %v843_v46 = vmul.f32 %v836_v42, %v5769_v28  ;;  %v841_v59 = vadd.f32 0.5, %v840_v57 }
 0x270   :  { %v5815_v52 = vadd.f32 %v844_v43, %v843_v46 }
 0x272   :  { %5206 = vtanh.f32 %v5815_v52 }
 0x27c   :  { %v5207_v61 = vpop.eup %5206 }
 0x27d   :  { %v5818_v2 = vmul.f32 %v5207_v61, %v841_v59 }
 0x27f   :  { %925 = vmatmul.mubr.f32.vlgmr.msra.gmra.mrb[4].mxu0 %v5818_v2  ;;  %996 = vmatmul.mubr.f32.vlgmr.msra.gmra.mrb[4].mxu1 %v5818_v2 }
 0x280   :  { %4132 = vmatpush1.bf16.msra.mxu0 %v5573_v47  ;;  %4164 = vmatpush1.bf16.msra.mxu1 %v5576_v50 }
 0x281   :  { %4134 = vmatprep.subr.bf16.mxu0 %v5579_v53  ;;  %4166 = vmatprep.subr.bf16.mxu1 %v5581_v56 }
 0x282   :  { %1101 = vmatprep.mubr.f32.mxu0 %v5450_v0  ;;  %1172 = vmatprep.mubr.f32.mxu1 %v5450_v0 }
 0x284   :  { %4136 = vmatpush1.bf16.msra.mxu0 %v5587_v60  ;;  %4168 = vmatpush1.bf16.msra.mxu1 %v5591_v63 }
 0x285   :  { %4138 = vmatprep.subr.bf16.mxu0 %v5595_v3  ;;  %4170 = vmatprep.subr.bf16.mxu1 %v5598_v6 }
 0x288   :  { %4140 = vmatpush1.bf16.msra.mxu0 %v5604_v10  ;;  %4172 = vmatpush1.bf16.msra.mxu1 %v5608_v13 }
 0x289   :  { %4142 = vmatprep.subr.bf16.mxu0 %v5612_v16  ;;  %4174 = vmatprep.subr.bf16.mxu1 %v5615_v19 }
 0x28c   :  { %4144 = vmatpush1.bf16.msra.mxu0 %v5621_v23  ;;  %4176 = vmatpush1.bf16.msra.mxu1 %v5625_v26 }
 0x28d   :  { %4146 = vmatprep.subr.bf16.mxu0 %v5629_v29  ;;  %4178 = vmatprep.subr.bf16.mxu1 %v5632_v32 }
 0x290   :  { %4148 = vmatpush1.bf16.msra.mxu0 %v5638_v36  ;;  %4180 = vmatpush1.bf16.msra.mxu1 %v5642_v40 }
 0x291   :  { %4150 = vmatprep.subr.bf16.mxu0 %v5646_v44  ;;  %4182 = vmatprep.subr.bf16.mxu1 %v5649_v48 }
 0x294   :  { %4152 = vmatpush1.bf16.msra.mxu0 %v5655_v54  ;;  %4184 = vmatpush1.bf16.msra.mxu1 %v5659_v58 }
 0x295   :  { %4154 = vmatprep.subr.bf16.mxu0 %v5663_v62  ;;  %4186 = vmatprep.subr.bf16.mxu1 %v5666_v4 }
 0x298   :  { %4156 = vmatpush1.bf16.msra.mxu0 %v5672_v9  ;;  %4188 = vmatpush1.bf16.msra.mxu1 %v5676_v14 }
 0x299   :  { %4158 = vmatprep.subr.bf16.mxu0 %v5680_v18  ;;  %4190 = vmatprep.subr.bf16.mxu1 %v5683_v22 }
 0x29c   :  { %4160 = vmatpush1.bf16.msra.mxu0 %v5689_v25  ;;  %4192 = vmatpush1.bf16.msra.mxu1 %v5693_v27 }
 0x29d   :  { %4194 = vmatprep.subr.bf16.mxu0 %v5566_v38  ;;  %4226 = vmatprep.subr.bf16.mxu1 %v5568_v41 }
 0x352   :  { %v926_v28 = vpop.f32.mrb[4].mxu0  ;;  %v997_v5 = vpop.f32.mrb[4].mxu1 }
 0x353   :  { %v5053_v7 = vadd.f32 %v926_v28, %v5749_v35  ;;  %v928_v8 = vpop.f32.mrb[5].mxu0  ;;  %v999_v11 = vpop.f32.mrb[5].mxu1  ;;  %v5069_v20 = vadd.f32 %v997_v5, %v5759_v45 }
 0x354   :  { %v5054_v12 = vadd.f32 %v928_v8, %v5754_v39  ;;  %v5070_v21 = vadd.f32 %v999_v11, %v5766_v1 }
 0x355   :  { %v1006_v15 = vmul.f32 0.5, %v5053_v7 }
 0x356   :  { %v1010_v17 = vmul.f32 0.5, %v5054_v12  ;;  %v1015_v24 = vmul.f32 0.5, %v5070_v21 }
 0x357   :  { %5208 = vtanh.f32 %v1006_v15 }
 0x358   :  { %5210 = vtanh.f32 %v1010_v17 }
 0x359   :  { %5212 = vtanh.f32 %v5069_v20 }
 0x35a   :  { %5214 = vtanh.f32 %v1015_v24 }
 0x361   :  { %v5209_v33 = vpop.eup %5208 }
 0x362   :  { %v5211_v42 = vpop.eup %5210  ;;  %v1008_v43 = vmul.f32 0.5, %v5209_v33 }
 0x363   :  { %v1012_v46 = vmul.f32 0.5, %v5211_v42  ;;  %v5213_v57 = vpop.eup %5212 }
 0x364   :  { %v1009_v55 = vadd.f32 0.5, %v1008_v43  ;;  %v5215_v5 = vpop.eup %5214 }
 0x365   :  { %v1013_v59 = vadd.f32 0.5, %v1012_v46  ;;  %v1017_v8 = vmul.f32 0.5, %v5215_v5 }
 0x366   :  { %v1021_v61 = vmul.f32 %v5213_v57, %v1009_v55 }
 0x367   :  { %v1020_v28 = vmul.f32 %v1013_v59, %v5815_v52  ;;  %v1018_v12 = vadd.f32 0.5, %v1017_v8 }
 0x369   :  { %v5861_v7 = vadd.f32 %v1021_v61, %v1020_v28 }
 0x36b   :  { %5216 = vtanh.f32 %v5861_v7 }
 0x375   :  { %v5217_v11 = vpop.eup %5216 }
 0x376   :  { %v5864_v15 = vmul.f32 %v5217_v11, %v1018_v12 }
 0x378   :  { %1102 = vmatmul.mubr.f32.vlgmr.msra.gmra.mrb[6].mxu0 %v5864_v15  ;;  %1173 = vmatmul.mubr.f32.vlgmr.msra.gmra.mrb[6].mxu1 %v5864_v15 }
 0x379   :  { %4196 = vmatpush1.bf16.msra.mxu0 %v5573_v47  ;;  %4228 = vmatpush1.bf16.msra.mxu1 %v5576_v50 }
 0x37a   :  { %4198 = vmatprep.subr.bf16.mxu0 %v5579_v53  ;;  %4230 = vmatprep.subr.bf16.mxu1 %v5581_v56 }
 0x37b   :  { %1278 = vmatprep.mubr.f32.mxu0 %v5450_v0  ;;  %1349 = vmatprep.mubr.f32.mxu1 %v5450_v0 }
 0x37d   :  { %4200 = vmatpush1.bf16.msra.mxu0 %v5587_v60  ;;  %4232 = vmatpush1.bf16.msra.mxu1 %v5591_v63 }
 0x37e   :  { %4202 = vmatprep.subr.bf16.mxu0 %v5595_v3  ;;  %4234 = vmatprep.subr.bf16.mxu1 %v5598_v6 }
 0x381   :  { %4204 = vmatpush1.bf16.msra.mxu0 %v5604_v10  ;;  %4236 = vmatpush1.bf16.msra.mxu1 %v5608_v13 }
 0x382   :  { %4206 = vmatprep.subr.bf16.mxu0 %v5612_v16  ;;  %4238 = vmatprep.subr.bf16.mxu1 %v5615_v19 }
 0x385   :  { %4208 = vmatpush1.bf16.msra.mxu0 %v5621_v23  ;;  %4240 = vmatpush1.bf16.msra.mxu1 %v5625_v26 }
 0x386   :  { %4210 = vmatprep.subr.bf16.mxu0 %v5629_v29  ;;  %4242 = vmatprep.subr.bf16.mxu1 %v5632_v32 }
 0x389   :  { %4212 = vmatpush1.bf16.msra.mxu0 %v5638_v36  ;;  %4244 = vmatpush1.bf16.msra.mxu1 %v5642_v40 }
 0x38a   :  { %4214 = vmatprep.subr.bf16.mxu0 %v5646_v44  ;;  %4246 = vmatprep.subr.bf16.mxu1 %v5649_v48 }
 0x38d   :  { %4216 = vmatpush1.bf16.msra.mxu0 %v5655_v54  ;;  %4248 = vmatpush1.bf16.msra.mxu1 %v5659_v58 }
 0x38e   :  { %4218 = vmatprep.subr.bf16.mxu0 %v5663_v62  ;;  %4250 = vmatprep.subr.bf16.mxu1 %v5666_v4 }
 0x391   :  { %4220 = vmatpush1.bf16.msra.mxu0 %v5672_v9  ;;  %4252 = vmatpush1.bf16.msra.mxu1 %v5676_v14 }
 0x392   :  { %4222 = vmatprep.subr.bf16.mxu0 %v5680_v18  ;;  %4254 = vmatprep.subr.bf16.mxu1 %v5683_v22 }
 0x395   :  { %4224 = vmatpush1.bf16.msra.mxu0 %v5689_v25  ;;  %4256 = vmatpush1.bf16.msra.mxu1 %v5693_v27 }
 0x396   :  { %4258 = vmatprep.subr.bf16.mxu0 %v5566_v38  ;;  %4290 = vmatprep.subr.bf16.mxu1 %v5568_v41 }
 0x44b   :  { %v1103_v52 = vpop.f32.mrb[6].mxu0  ;;  %v1174_v17 = vpop.f32.mrb[6].mxu1 }
 0x44c   :  { %v5055_v20 = vadd.f32 %v1103_v52, %v5749_v35  ;;  %v1105_v21 = vpop.f32.mrb[7].mxu0  ;;  %v1176_v24 = vpop.f32.mrb[7].mxu1  ;;  %v5071_v46 = vadd.f32 %v1174_v17, %v5759_v45 }
 0x44d   :  { %v5056_v33 = vadd.f32 %v1105_v21, %v5754_v39  ;;  %v5072_v55 = vadd.f32 %v1176_v24, %v5766_v1 }
 0x44e   :  { %v1183_v42 = vmul.f32 0.5, %v5055_v20 }
 0x44f   :  { %v1187_v43 = vmul.f32 0.5, %v5056_v33  ;;  %v1192_v57 = vmul.f32 0.5, %v5072_v55 }
 0x450   :  { %5218 = vtanh.f32 %v1183_v42 }
 0x451   :  { %5220 = vtanh.f32 %v1187_v43 }
 0x452   :  { %5222 = vtanh.f32 %v5071_v46 }
 0x453   :  { %5224 = vtanh.f32 %v1192_v57 }
 0x45a   :  { %v5219_v59 = vpop.eup %5218 }
 0x45b   :  { %v5221_v61 = vpop.eup %5220  ;;  %v1185_v28 = vmul.f32 0.5, %v5219_v59 }
 0x45c   :  { %v1189_v5 = vmul.f32 0.5, %v5221_v61  ;;  %v5223_v12 = vpop.eup %5222 }
 0x45d   :  { %v1186_v8 = vadd.f32 0.5, %v1185_v28  ;;  %v5225_v17 = vpop.eup %5224 }
 0x45e   :  { %v1190_v11 = vadd.f32 0.5, %v1189_v5  ;;  %v1194_v33 = vmul.f32 0.5, %v5225_v17 }
 0x45f   :  { %v1198_v52 = vmul.f32 %v5223_v12, %v1186_v8 }
 0x460   :  { %v1197_v20 = vmul.f32 %v1190_v11, %v5861_v7  ;;  %v1195_v42 = vadd.f32 0.5, %v1194_v33 }
 0x462   :  { %v5907_v21 = vadd.f32 %v1198_v52, %v1197_v20 }
 0x464   :  { %5226 = vtanh.f32 %v5907_v21 }
 0x46e   :  { %v5227_v24 = vpop.eup %5226 }
 0x46f   :  { %v5910_v43 = vmul.f32 %v5227_v24, %v1195_v42 }
 0x471   :  { %1279 = vmatmul.mubr.f32.vlgmr.msra.gmra.mrb[8].mxu0 %v5910_v43  ;;  %1350 = vmatmul.mubr.f32.vlgmr.msra.gmra.mrb[8].mxu1 %v5910_v43 }
 0x472   :  { %4260 = vmatpush1.bf16.msra.mxu0 %v5573_v47  ;;  %4292 = vmatpush1.bf16.msra.mxu1 %v5576_v50 }
 0x473   :  { %4262 = vmatprep.subr.bf16.mxu0 %v5579_v53  ;;  %4294 = vmatprep.subr.bf16.mxu1 %v5581_v56 }
 0x474   :  { %1455 = vmatprep.mubr.f32.mxu0 %v5450_v0  ;;  %1526 = vmatprep.mubr.f32.mxu1 %v5450_v0 }
 0x476   :  { %4264 = vmatpush1.bf16.msra.mxu0 %v5587_v60  ;;  %4296 = vmatpush1.bf16.msra.mxu1 %v5591_v63 }
 0x477   :  { %4266 = vmatprep.subr.bf16.mxu0 %v5595_v3  ;;  %4298 = vmatprep.subr.bf16.mxu1 %v5598_v6 }
 0x47a   :  { %4268 = vmatpush1.bf16.msra.mxu0 %v5604_v10  ;;  %4300 = vmatpush1.bf16.msra.mxu1 %v5608_v13 }
 0x47b   :  { %4270 = vmatprep.subr.bf16.mxu0 %v5612_v16  ;;  %4302 = vmatprep.subr.bf16.mxu1 %v5615_v19 }
 0x47e   :  { %4272 = vmatpush1.bf16.msra.mxu0 %v5621_v23  ;;  %4304 = vmatpush1.bf16.msra.mxu1 %v5625_v26 }
 0x47f   :  { %4274 = vmatprep.subr.bf16.mxu0 %v5629_v29  ;;  %4306 = vmatprep.subr.bf16.mxu1 %v5632_v32 }
 0x482   :  { %4276 = vmatpush1.bf16.msra.mxu0 %v5638_v36  ;;  %4308 = vmatpush1.bf16.msra.mxu1 %v5642_v40 }
 0x483   :  { %4278 = vmatprep.subr.bf16.mxu0 %v5646_v44  ;;  %4310 = vmatprep.subr.bf16.mxu1 %v5649_v48 }
 0x486   :  { %4280 = vmatpush1.bf16.msra.mxu0 %v5655_v54  ;;  %4312 = vmatpush1.bf16.msra.mxu1 %v5659_v58 }
 0x487   :  { %4282 = vmatprep.subr.bf16.mxu0 %v5663_v62  ;;  %4314 = vmatprep.subr.bf16.mxu1 %v5666_v4 }
 0x48a   :  { %4284 = vmatpush1.bf16.msra.mxu0 %v5672_v9  ;;  %4316 = vmatpush1.bf16.msra.mxu1 %v5676_v14 }
 0x48b   :  { %4286 = vmatprep.subr.bf16.mxu0 %v5680_v18  ;;  %4318 = vmatprep.subr.bf16.mxu1 %v5683_v22 }
 0x48e   :  { %4288 = vmatpush1.bf16.msra.mxu0 %v5689_v25  ;;  %4320 = vmatpush1.bf16.msra.mxu1 %v5693_v27 }
 0x48f   :  { %4322 = vmatprep.subr.bf16.mxu0 %v5566_v38  ;;  %4354 = vmatprep.subr.bf16.mxu1 %v5568_v41 }
 0x544   :  { %v1280_v7 = vpop.f32.mrb[8].mxu0  ;;  %v1351_v46 = vpop.f32.mrb[8].mxu1 }
 0x545   :  { %v5057_v55 = vadd.f32 %v1280_v7, %v5749_v35  ;;  %v1282_v57 = vpop.f32.mrb[9].mxu0  ;;  %v1353_v59 = vpop.f32.mrb[9].mxu1  ;;  %v5073_v8 = vadd.f32 %v1351_v46, %v5759_v45 }
 0x546   :  { %v5058_v61 = vadd.f32 %v1282_v57, %v5754_v39  ;;  %v5074_v12 = vadd.f32 %v1353_v59, %v5766_v1 }
 0x547   :  { %v1360_v28 = vmul.f32 0.5, %v5057_v55 }
 0x548   :  { %v1364_v5 = vmul.f32 0.5, %v5058_v61  ;;  %v1369_v11 = vmul.f32 0.5, %v5074_v12 }
 0x549   :  { %5228 = vtanh.f32 %v1360_v28 }
 0x54a   :  { %5230 = vtanh.f32 %v1364_v5 }
 0x54b   :  { %5232 = vtanh.f32 %v5073_v8 }
 0x54c   :  { %5234 = vtanh.f32 %v1369_v11 }
 0x553   :  { %v5229_v52 = vpop.eup %5228 }
 0x554   :  { %v5231_v20 = vpop.eup %5230  ;;  %v1362_v17 = vmul.f32 0.5, %v5229_v52 }
 0x555   :  { %v1366_v33 = vmul.f32 0.5, %v5231_v20  ;;  %v5233_v24 = vpop.eup %5232 }
 0x556   :  { %v1363_v42 = vadd.f32 0.5, %v1362_v17  ;;  %v5235_v46 = vpop.eup %5234 }
 0x557   :  { %v1367_v7 = vadd.f32 0.5, %v1366_v33  ;;  %v1371_v61 = vmul.f32 0.5, %v5235_v46 }
 0x558   :  { %v1375_v51 = vmul.f32 %v5233_v24, %v1363_v42 }
 0x559   :  { %v1374_v55 = vmul.f32 %v1367_v7, %v5907_v21  ;;  %v1372_v28 = vadd.f32 0.5, %v1371_v61 }
 0x55b   :  { %v5953_v57 = vadd.f32 %v1375_v51, %v1374_v55 }
 0x55d   :  { %5236 = vtanh.f32 %v5953_v57 }
 0x567   :  { %v5237_v59 = vpop.eup %5236 }
 0x568   :  { %v5956_v5 = vmul.f32 %v5237_v59, %v1372_v28 }
 0x56a   :  { %1456 = vmatmul.mubr.f32.vlgmr.msra.gmra.mrb[10].mxu0 %v5956_v5  ;;  %1527 = vmatmul.mubr.f32.vlgmr.msra.gmra.mrb[10].mxu1 %v5956_v5 }
 0x56b   :  { %4324 = vmatpush1.bf16.msra.mxu0 %v5573_v47  ;;  %4356 = vmatpush1.bf16.msra.mxu1 %v5576_v50 }
 0x56c   :  { %4326 = vmatprep.subr.bf16.mxu0 %v5579_v53  ;;  %4358 = vmatprep.subr.bf16.mxu1 %v5581_v56 }
 0x56d   :  { %1632 = vmatprep.mubr.f32.mxu0 %v5450_v0  ;;  %1703 = vmatprep.mubr.f32.mxu1 %v5450_v0 }
 0x56f   :  { %4328 = vmatpush1.bf16.msra.mxu0 %v5587_v60  ;;  %4360 = vmatpush1.bf16.msra.mxu1 %v5591_v63 }
 0x570   :  { %4330 = vmatprep.subr.bf16.mxu0 %v5595_v3  ;;  %4362 = vmatprep.subr.bf16.mxu1 %v5598_v6 }
 0x573   :  { %4332 = vmatpush1.bf16.msra.mxu0 %v5604_v10  ;;  %4364 = vmatpush1.bf16.msra.mxu1 %v5608_v13 }
 0x574   :  { %4334 = vmatprep.subr.bf16.mxu0 %v5612_v16  ;;  %4366 = vmatprep.subr.bf16.mxu1 %v5615_v19 }
 0x577   :  { %4336 = vmatpush1.bf16.msra.mxu0 %v5621_v23  ;;  %4368 = vmatpush1.bf16.msra.mxu1 %v5625_v26 }
 0x578   :  { %4338 = vmatprep.subr.bf16.mxu0 %v5629_v29  ;;  %4370 = vmatprep.subr.bf16.mxu1 %v5632_v32 }
 0x57b   :  { %4340 = vmatpush1.bf16.msra.mxu0 %v5638_v36  ;;  %4372 = vmatpush1.bf16.msra.mxu1 %v5642_v40 }
 0x57c   :  { %4342 = vmatprep.subr.bf16.mxu0 %v5646_v44  ;;  %4374 = vmatprep.subr.bf16.mxu1 %v5649_v48 }
 0x57f   :  { %4344 = vmatpush1.bf16.msra.mxu0 %v5655_v54  ;;  %4376 = vmatpush1.bf16.msra.mxu1 %v5659_v58 }
 0x580   :  { %4346 = vmatprep.subr.bf16.mxu0 %v5663_v62  ;;  %4378 = vmatprep.subr.bf16.mxu1 %v5666_v4 }
 0x583   :  { %4348 = vmatpush1.bf16.msra.mxu0 %v5672_v9  ;;  %4380 = vmatpush1.bf16.msra.mxu1 %v5676_v14 }
 0x584   :  { %4350 = vmatprep.subr.bf16.mxu0 %v5680_v18  ;;  %4382 = vmatprep.subr.bf16.mxu1 %v5683_v22 }
 0x587   :  { %4352 = vmatpush1.bf16.msra.mxu0 %v5689_v25  ;;  %4384 = vmatpush1.bf16.msra.mxu1 %v5693_v27 }
 0x588   :  { %4386 = vmatprep.subr.bf16.mxu0 %v5566_v38  ;;  %4418 = vmatprep.subr.bf16.mxu1 %v5568_v41 }
 0x63d   :  { %v1457_v51 = vpop.f32.mrb[10].mxu0  ;;  %v1528_v21 = vpop.f32.mrb[10].mxu1 }
 0x63e   :  { %v5059_v8 = vadd.f32 %v1457_v51, %v5749_v35  ;;  %v1459_v12 = vpop.f32.mrb[11].mxu0  ;;  %v1530_v11 = vpop.f32.mrb[11].mxu1  ;;  %v5075_v33 = vadd.f32 %v1528_v21, %v5759_v45 }
 0x63f   :  { %v5060_v52 = vadd.f32 %v1459_v12, %v5754_v39  ;;  %v5076_v42 = vadd.f32 %v1530_v11, %v5766_v1 }
 0x640   :  { %v1537_v20 = vmul.f32 0.5, %v5059_v8 }
 0x641   :  { %v1541_v17 = vmul.f32 0.5, %v5060_v52  ;;  %v1546_v38 = vmul.f32 0.5, %v5076_v42  ;;  %v1931_v42 = vld [vmem:[#allocation8 + $0x48] sm:$0xff] }
 0x642   :  { %5238 = vtanh.f32 %v1537_v20 }
 0x643   :  { %5240 = vtanh.f32 %v1541_v17  ;;  %v1924_v17 = vld [vmem:[#allocation8 + $0x10] sm:$0xff] }
 0x644   :  { %5242 = vtanh.f32 %v5075_v33  ;;  %v1928_v33 = vld [vmem:[#allocation8 + $0x30] sm:$0xff] }
 0x645   :  { %5244 = vtanh.f32 %v1546_v38  ;;  %v1935_v38 = vld [vmem:[#allocation8 + $0x68] sm:$0xff] }
 0x64c   :  { %v5239_v24 = vpop.eup %5238 }
 0x64d   :  { %v5241_v41 = vpop.eup %5240  ;;  %v1539_v7 = vmul.f32 0.5, %v5239_v24  ;;  %v1933_v24 = vld [vmem:[#allocation8 + $0x58] sm:$0xff] }
 0x64e   :  { %v1543_v55 = vmul.f32 0.5, %v5241_v41  ;;  %v5243_v61 = vpop.eup %5242  ;;  %v1937_v41 = vld [vmem:[#allocation8 + $0x78] sm:$0xff] }
 0x64f   :  { %v1540_v46 = vadd.f32 0.5, %v1539_v7  ;;  %v5245_v21 = vpop.eup %5244 }
 0x650   :  { %v1544_v28 = vadd.f32 0.5, %v1543_v55  ;;  %v1548_v12 = vmul.f32 0.5, %v5245_v21  ;;  %v4485_v21 = vpack.c.bf16 %v1937_v41, %v1933_v24  ;;  %v1960_v24 = vld [vmem:[#allocation8 + $0x130] sm:$0xff]  ;;  %v1963_v41 = vld [vmem:[#allocation8 + $0x148] sm:$0xff] }
 0x651   :  { %v1552_v59 = vmul.f32 %v5243_v61, %v1540_v46  ;;  %v4483_v61 = vpack.c.bf16 %v1928_v33, %v1924_v17  ;;  %v1958_v17 = vld [vmem:[#allocation8 + $0x120] sm:$0xff] }
 0x652   :  { %v1551_v51 = vmul.f32 %v1544_v28, %v5953_v57  ;;  %v1549_v52 = vadd.f32 0.5, %v1548_v12  ;;  %v1926_v57 = vld [vmem:[#allocation8 + $0x20] sm:$0xff]  ;;  %v1932_v12 = vld [vmem:[#allocation8 + $0x50] sm:$0xff] }
 0x653   :  { %v1930_v28 = vld [vmem:[#allocation8 + $0x40] sm:$0xff] }
 0x654   :  { %v5999_v8 = vadd.f32 %v1552_v59, %v1551_v51  ;;  %v1934_v59 = vld [vmem:[#allocation8 + $0x60] sm:$0xff] }
 0x656   :  { %5246 = vtanh.f32 %v5999_v8 }
 0x660   :  { %v5247_v11 = vpop.eup %5246 }
 0x661   :  { %v6002_v20 = vmul.f32 %v5247_v11, %v1549_v52  ;;  %v1936_v52 = vld [vmem:[#allocation8 + $0x70] sm:$0xff]  ;;  %v1939_v11 = vld [vmem:[#allocation8 + $0x88] sm:$0xff] }
 0x663   :  { %1633 = vmatmul.mubr.f32.vlgmr.msra.gmra.mrb[12].mxu0 %v6002_v20  ;;  %1704 = vmatmul.mubr.f32.vlgmr.msra.gmra.mrb[12].mxu1 %v6002_v20 }
 0x664   :  { %4388 = vmatpush1.bf16.msra.mxu0 %v5573_v47  ;;  %4420 = vmatpush1.bf16.msra.mxu1 %v5576_v50  ;;  %v1923_v47 = vld [vmem:[#allocation8 + $0x8] sm:$0xff] }
 0x665   :  { %4390 = vmatprep.subr.bf16.mxu0 %v5579_v53  ;;  %4422 = vmatprep.subr.bf16.mxu1 %v5581_v56  ;;  %v1927_v50 = vld [vmem:[#allocation8 + $0x28] sm:$0xff]  ;;  %v1925_v53 = vld [vmem:[#allocation8 + $0x18] sm:$0xff] }
 0x666   :  { %1809 = vmatprep.mubr.f32.mxu0 %v5450_v0  ;;  %1880 = vmatprep.mubr.f32.mxu1 %v5450_v0  ;;  %v4449_v56 = vpack.c.bf16 %v1927_v50, %v1923_v47  ;;  %v1943_v47 = vld [vmem:[#allocation8 + $0xa8] sm:$0xff]  ;;  %v1941_v50 = vld [vmem:[#allocation8 + $0x98] sm:$0xff] }
 0x668   :  { %4392 = vmatpush1.bf16.msra.mxu0 %v5587_v60  ;;  %4424 = vmatpush1.bf16.msra.mxu1 %v5591_v63  ;;  %v1929_v60 = vld [vmem:[#allocation8 + $0x38] sm:$0xff] }
 0x669   :  { %4394 = vmatprep.subr.bf16.mxu0 %v5595_v3  ;;  %4426 = vmatprep.subr.bf16.mxu1 %v5598_v6  ;;  %v4481_v63 = vpack.c.bf16 %v1929_v60, %v1925_v53  ;;  %v1945_v53 = vld [vmem:[#allocation8 + $0xb8] sm:$0xff]  ;;  %v4487_v60 = vpack.c.bf16 %v1936_v52, %v1932_v12  ;;  %v1964_v52 = vld [vmem:[#allocation8 + $0x150] sm:$0xff] }
 0x66c   :  { %4396 = vmatpush1.bf16.msra.mxu0 %v5604_v10  ;;  %4428 = vmatpush1.bf16.msra.mxu1 %v5608_v13 }
 0x66d   :  { %4398 = vmatprep.subr.bf16.mxu0 %v5612_v16  ;;  %4430 = vmatprep.subr.bf16.mxu1 %v5615_v19 }
 0x670   :  { %4400 = vmatpush1.bf16.msra.mxu0 %v5621_v23  ;;  %4432 = vmatpush1.bf16.msra.mxu1 %v5625_v26 }
 0x671   :  { %4402 = vmatprep.subr.bf16.mxu0 %v5629_v29  ;;  %4434 = vmatprep.subr.bf16.mxu1 %v5632_v32 }
 0x674   :  { %4404 = vmatpush1.bf16.msra.mxu0 %v5638_v36  ;;  %4436 = vmatpush1.bf16.msra.mxu1 %v5642_v40 }
 0x675   :  { %4406 = vmatprep.subr.bf16.mxu0 %v5646_v44  ;;  %4438 = vmatprep.subr.bf16.mxu1 %v5649_v48 }
 0x678   :  { %4408 = vmatpush1.bf16.msra.mxu0 %v5655_v54  ;;  %4440 = vmatpush1.bf16.msra.mxu1 %v5659_v58 }
 0x679   :  { %4410 = vmatprep.subr.bf16.mxu0 %v5663_v62  ;;  %4442 = vmatprep.subr.bf16.mxu1 %v5666_v4 }
 0x67c   :  { %4412 = vmatpush1.bf16.msra.mxu0 %v5672_v9  ;;  %4444 = vmatpush1.bf16.msra.mxu1 %v5676_v14 }
 0x67d   :  { %4414 = vmatprep.subr.bf16.mxu0 %v5680_v18  ;;  %4446 = vmatprep.subr.bf16.mxu1 %v5683_v22 }
 0x680   :  { %4416 = vmatpush1.bf16.msra.mxu0 %v5689_v25  ;;  %4448 = vmatpush1.bf16.msra.mxu1 %v5693_v27  ;;  %v1922_v27 = vld [vmem:[#allocation8] sm:$0xff] }
 0x681   :  { %4450 = vmatprep.subr.bf16.mxu0 %v4449_v56  ;;  %4482 = vmatprep.subr.bf16.mxu1 %v4481_v63  ;;  %v4451_v46 = vpack.c.bf16 %v1926_v57, %v1922_v27  ;;  %v4455_v56 = vpack.c.bf16 %v1934_v59, %v1930_v28  ;;  %v1938_v63 = vld [vmem:[#allocation8 + $0x80] sm:$0xff] }
 0x682   :  { %v1954_v57 = vld [vmem:[#allocation8 + $0x100] sm:$0xff] }
 0x683   :  { %v1962_v59 = vld [vmem:[#allocation8 + $0x140] sm:$0xff] }
 0x736   :  { %v1634_v3 = vpop.f32.mrb[12].mxu0  ;;  %v1705_v6 = vpop.f32.mrb[12].mxu1 }
 0x737   :  { %v5061_v10 = vadd.f32 %v1634_v3, %v5749_v35  ;;  %v1636_v13 = vpop.f32.mrb[13].mxu0  ;;  %v1707_v16 = vpop.f32.mrb[13].mxu1  ;;  %v5077_v29 = vadd.f32 %v1705_v6, %v5759_v45  ;;  %v1942_v3 = vld [vmem:[#allocation8 + $0xa0] sm:$0xff]  ;;  %v4457_v6 = vpack.c.bf16 %v1943_v47, %v1939_v11  ;;  %v1968_v11 = vld [vmem:[#allocation8 + $0x170] sm:$0xff]  ;;  %v1971_v47 = vld [vmem:[#allocation8 + $0x188] sm:$0xff] }
 0x738   :  { %v5062_v19 = vadd.f32 %v1636_v13, %v5754_v39  ;;  %v5078_v32 = vadd.f32 %v1707_v16, %v5766_v1  ;;  %v1940_v13 = vld [vmem:[#allocation8 + $0x90] sm:$0xff] }
 0x739   :  { %v1714_v23 = vmul.f32 0.5, %v5061_v10  ;;  %v4489_v10 = vpack.c.bf16 %v1945_v53, %v1941_v50  ;;  %v1944_v16 = vld [vmem:[#allocation8 + $0xb0] sm:$0xff]  ;;  %v1975_v50 = vld [vmem:[#allocation8 + $0x1a8] sm:$0xff]  ;;  %v1973_v53 = vld [vmem:[#allocation8 + $0x198] sm:$0xff] }
 0x73a   :  { %v1718_v26 = vmul.f32 0.5, %v5062_v19  ;;  %v1723_v36 = vmul.f32 0.5, %v5078_v32  ;;  %v1947_v19 = vld [vmem:[#allocation8 + $0xc8] sm:$0xff]  ;;  %v4459_v32 = vpack.c.bf16 %v1942_v3, %v1938_v63  ;;  %v4503_v63 = vpack.c.bf16 %v1968_v11, %v1964_v52  ;;  %v1970_v3 = vld [vmem:[#allocation8 + $0x180] sm:$0xff]  ;;  %v2289_v52 = vld [vmem:[#allocation10 + $0x298] sm:$0xff] }
 0x73b   :  { %5248 = vtanh.f32 %v1714_v23  ;;  %v1951_v23 = vld [vmem:[#allocation8 + $0xe8] sm:$0xff] }
 0x73c   :  { %5250 = vtanh.f32 %v1718_v26  ;;  %v1949_v26 = vld [vmem:[#allocation8 + $0xd8] sm:$0xff] }
 0x73d   :  { %5252 = vtanh.f32 %v5077_v29  ;;  %v1953_v29 = vld [vmem:[#allocation8 + $0xf8] sm:$0xff] }
 0x73e   :  { %5254 = vtanh.f32 %v1723_v36  ;;  %v4491_v36 = vpack.c.bf16 %v1944_v16, %v1940_v13  ;;  %v1972_v16 = vld [vmem:[#allocation8 + $0x190] sm:$0xff] }
 0x745   :  { %v5249_v40 = vpop.eup %5248 }
 0x746   :  { %v5251_v44 = vpop.eup %5250  ;;  %v1716_v48 = vmul.f32 0.5, %v5249_v40  ;;  %v1946_v40 = vld [vmem:[#allocation8 + $0xc0] sm:$0xff] }
 0x747   :  { %v1720_v54 = vmul.f32 0.5, %v5251_v44  ;;  %v5253_v62 = vpop.eup %5252  ;;  %v1950_v44 = vld [vmem:[#allocation8 + $0xe0] sm:$0xff] }
 0x748   :  { %v1717_v58 = vadd.f32 0.5, %v1716_v48  ;;  %v5255_v22 = vpop.eup %5254  ;;  %v4461_v48 = vpack.c.bf16 %v1951_v23, %v1947_v19  ;;  %v1976_v19 = vld [vmem:[#allocation8 + $0x1b0] sm:$0xff]  ;;  %v1979_v23 = vld [vmem:[#allocation8 + $0x1c8] sm:$0xff] }
 0x749   :  { %v1721_v4 = vadd.f32 0.5, %v1720_v54  ;;  %v1725_v25 = vmul.f32 0.5, %v5255_v22  ;;  %v4493_v54 = vpack.c.bf16 %v1953_v29, %v1949_v26  ;;  %v1961_v22 = vld [vmem:[#allocation8 + $0x138] sm:$0xff]  ;;  %v1983_v26 = vld [vmem:[#allocation8 + $0x1e8] sm:$0xff] }
 0x74a   :  { %v1729_v9 = vmul.f32 %v5253_v62, %v1717_v58  ;;  %v1948_v58 = vld [vmem:[#allocation8 + $0xd0] sm:$0xff]  ;;  %v1981_v29 = vld [vmem:[#allocation8 + $0x1d8] sm:$0xff] }
 0x74b   :  { %v1728_v14 = vmul.f32 %v1721_v4, %v5999_v8  ;;  %v1726_v7 = vadd.f32 0.5, %v1725_v25  ;;  %v4453_v8 = vpack.c.bf16 %v1935_v38, %v1931_v42  ;;  %v1952_v62 = vld [vmem:[#allocation8 + $0xf0] sm:$0xff]  ;;  %v1955_v4 = vld [vmem:[#allocation8 + $0x108] sm:$0xff]  ;;  %v4463_v25 = vpack.c.bf16 %v1950_v44, %v1946_v40  ;;  %v1978_v44 = vld [vmem:[#allocation8 + $0x1c0] sm:$0xff] }
 0x74c   :  { %v4495_v27 = vpack.c.bf16 %v1952_v62, %v1948_v58  ;;  %v1956_v38 = vld [vmem:[#allocation8 + $0x110] sm:$0xff]  ;;  %v4507_v40 = vpack.c.bf16 %v1976_v19, %v1972_v16  ;;  %v1982_v58 = vld [vmem:[#allocation8 + $0x1e0] sm:$0xff]  ;;  %v2297_v16 = vld [vmem:[#allocation10 + $0x2d8] sm:$0xff] }
 0x74d   :  { %v6043_v18 = vadd.f32 %v1729_v9, %v1728_v14  ;;  %v1959_v9 = vld [vmem:[#allocation8 + $0x128] sm:$0xff]  ;;  %v1957_v14 = vld [vmem:[#allocation8 + $0x118] sm:$0xff]  ;;  %v4499_v28 = vpack.c.bf16 %v1960_v24, %v1956_v38  ;;  %v1980_v62 = vld [vmem:[#allocation8 + $0x1d0] sm:$0xff] }
 0x74e   :  { %v4465_v33 = vpack.c.bf16 %v1959_v9, %v1955_v4  ;;  %v4497_v42 = vpack.c.bf16 %v1961_v22, %v1957_v14  ;;  %v1984_v4 = vld [vmem:[#allocation8 + $0x1f0] sm:$0xff]  ;;  %v4479_v9 = vpack.c.bf16 %v1982_v58, %v1978_v44  ;;  %v2270_v22 = vld [vmem:[#allocation10 + $0x200] sm:$0xff]  ;;  %v2281_v38 = vld [vmem:[#allocation10 + $0x258] sm:$0xff] }
 0x74f   :  { %5256 = vtanh.f32 %v6043_v18  ;;  %v4511_v14 = vpack.c.bf16 %v1984_v4, %v1980_v62  ;;  %v2300_v44 = vld [vmem:[#allocation10 + $0x2f0] sm:$0xff]  ;;  %v2307_v58 = vld [vmem:[#allocation10 + $0x328] sm:$0xff]  ;;  %v2305_v62 = vld [vmem:[#allocation10 + $0x318] sm:$0xff] }
 0x759   :  { %v5257_v55 = vpop.eup %5256 }
 0x75a   :  { %v6046_v51 = vmul.f32 %v5257_v55, %v1726_v7  ;;  %v1967_v7 = vld [vmem:[#allocation8 + $0x168] sm:$0xff]  ;;  %v1965_v55 = vld [vmem:[#allocation8 + $0x158] sm:$0xff] }
 0x75c   :  { %1810 = vmatmul.mubr.f32.vlgmr.msra.gmra.mrb[14].mxu0 %v6046_v51  ;;  %1881 = vmatmul.mubr.f32.vlgmr.msra.gmra.mrb[14].mxu1 %v6046_v51 }
 0x75d   :  { %4452 = vmatpush1.bf16.msra.mxu0 %v4451_v46  ;;  %4484 = vmatpush1.bf16.msra.mxu1 %v4483_v61  ;;  %v1969_v46 = vld [vmem:[#allocation8 + $0x178] sm:$0xff]  ;;  %v4467_v61 = vpack.c.bf16 %v1958_v17, %v1954_v57  ;;  %v2272_v57 = vld [vmem:[#allocation10 + $0x210] sm:$0xff] }
 0x75e   :  { %4454 = vmatprep.subr.bf16.mxu0 %v4453_v8  ;;  %4486 = vmatprep.subr.bf16.mxu1 %v4485_v21  ;;  %v1966_v8 = vld [vmem:[#allocation8 + $0x160] sm:$0xff]  ;;  %v4469_v21 = vpack.c.bf16 %v1967_v7, %v1963_v41  ;;  %v4501_v12 = vpack.c.bf16 %v1969_v46, %v1965_v55  ;;  %v2276_v17 = vld [vmem:[#allocation10 + $0x230] sm:$0xff]  ;;  %v2285_v41 = vld [vmem:[#allocation10 + $0x278] sm:$0xff] }
 0x75f   :  { %2073 = vmatprep.mubr.f32.mxu0 %v5450_v0  ;;  %2186 = vmatprep.mubr.f32.mxu1 %v5450_v0  ;;  %v2278_v7 = vld [vmem:[#allocation10 + $0x240] sm:$0xff]  ;;  %v6094_v46 = vpack.c.bf16 %v2285_v41, %v2281_v38 }
 0x760   :  { %v2282_v55 = vld [vmem:[#allocation10 + $0x260] sm:$0xff] }
 0x761   :  { %4456 = vmatpush1.bf16.msra.mxu0 %v4455_v56  ;;  %4488 = vmatpush1.bf16.msra.mxu1 %v4487_v60  ;;  %v1977_v56 = vld [vmem:[#allocation8 + $0x1b8] sm:$0xff]  ;;  %v4471_v60 = vpack.c.bf16 %v1966_v8, %v1962_v59  ;;  %v2284_v59 = vld [vmem:[#allocation10 + $0x270] sm:$0xff] }
 0x762   :  { %4458 = vmatprep.subr.bf16.mxu0 %v4457_v6  ;;  %4490 = vmatprep.subr.bf16.mxu1 %v4489_v10  ;;  %v1974_v6 = vld [vmem:[#allocation8 + $0x1a0] sm:$0xff]  ;;  %v4473_v10 = vpack.c.bf16 %v1975_v50, %v1971_v47  ;;  %v4505_v13 = vpack.c.bf16 %v1977_v56, %v1973_v53  ;;  %v2293_v47 = vld [vmem:[#allocation10 + $0x2b8] sm:$0xff] }
 0x763   :  { %v2286_v50 = vld [vmem:[#allocation10 + $0x280] sm:$0xff]  ;;  %v6106_v56 = vpack.c.bf16 %v2293_v47, %v2289_v52  ;;  %v2323_v52 = vld [vmem:[#allocation10 + $0x3a8] sm:$0xff] }
 0x764   :  { %v2290_v53 = vld [vmem:[#allocation10 + $0x2a0] sm:$0xff] }
 0x765   :  { %4460 = vmatpush1.bf16.msra.mxu0 %v4459_v32  ;;  %4492 = vmatpush1.bf16.msra.mxu1 %v4491_v36  ;;  %v1985_v32 = vld [vmem:[#allocation8 + $0x1f8] sm:$0xff]  ;;  %v4475_v36 = vpack.c.bf16 %v1974_v6, %v1970_v3  ;;  %v2292_v3 = vld [vmem:[#allocation10 + $0x2b0] sm:$0xff] }
 0x766   :  { %4462 = vmatprep.subr.bf16.mxu0 %v4461_v48  ;;  %4494 = vmatprep.subr.bf16.mxu1 %v4493_v54  ;;  %v4477_v48 = vpack.c.bf16 %v1983_v26, %v1979_v23  ;;  %v4509_v54 = vpack.c.bf16 %v1985_v32, %v1981_v29  ;;  %v2301_v23 = vld [vmem:[#allocation10 + $0x2f8] sm:$0xff]  ;;  %v2294_v26 = vld [vmem:[#allocation10 + $0x2c0] sm:$0xff] }
 0x767   :  { %v2298_v29 = vld [vmem:[#allocation10 + $0x2e0] sm:$0xff]  ;;  %v6118_v32 = vpack.c.bf16 %v2301_v23, %v2297_v16  ;;  %v2320_v16 = vld [vmem:[#allocation10 + $0x390] sm:$0xff] }
 0x768   :  { %v2324_v23 = vld [vmem:[#allocation10 + $0x3b0] sm:$0xff] }
 0x769   :  { %4464 = vmatpush1.bf16.msra.mxu0 %v4463_v25  ;;  %4496 = vmatpush1.bf16.msra.mxu1 %v4495_v27 }
 0x76a   :  { %4466 = vmatprep.subr.bf16.mxu0 %v4465_v33  ;;  %4498 = vmatprep.subr.bf16.mxu1 %v4497_v42  ;;  %v2279_v33 = vld [vmem:[#allocation10 + $0x248] sm:$0xff] }
 0x76b   :  { %v2283_v42 = vld [vmem:[#allocation10 + $0x268] sm:$0xff] }
 0x76c   :  { %v6092_v24 = vpack.c.bf16 %v2283_v42, %v2279_v33  ;;  %v2313_v33 = vld [vmem:[#allocation10 + $0x358] sm:$0xff] }
 0x76d   :  { %4468 = vmatpush1.bf16.msra.mxu0 %v4467_v61  ;;  %4500 = vmatpush1.bf16.msra.mxu1 %v4499_v28  ;;  %v6096_v61 = vpack.c.bf16 %v2282_v55, %v2278_v7  ;;  %v2280_v28 = vld [vmem:[#allocation10 + $0x250] sm:$0xff]  ;;  %v2317_v42 = vld [vmem:[#allocation10 + $0x378] sm:$0xff]  ;;  %v2310_v7 = vld [vmem:[#allocation10 + $0x340] sm:$0xff] }
 0x76e   :  { %4470 = vmatprep.subr.bf16.mxu0 %v4469_v21  ;;  %4502 = vmatprep.subr.bf16.mxu1 %v4501_v12  ;;  %v6099_v8 = vpack.c.bf16 %v2284_v59, %v2280_v28  ;;  %v2287_v21 = vld [vmem:[#allocation10 + $0x288] sm:$0xff]  ;;  %v6141_v41 = vpack.c.bf16 %v2317_v42, %v2313_v33  ;;  %v2314_v55 = vld [vmem:[#allocation10 + $0x360] sm:$0xff]  ;;  %v2312_v28 = vld [vmem:[#allocation10 + $0x350] sm:$0xff] }
 0x76f   :  { %v2291_v12 = vld [vmem:[#allocation10 + $0x2a8] sm:$0xff]  ;;  %v6144_v59 = vpack.c.bf16 %v2314_v55, %v2310_v7 }
 0x770   :  { %v6104_v11 = vpack.c.bf16 %v2291_v12, %v2287_v21  ;;  %v2316_v21 = vld [vmem:[#allocation10 + $0x370] sm:$0xff]  ;;  %v2319_v12 = vld [vmem:[#allocation10 + $0x388] sm:$0xff] }
 0x771   :  { %4472 = vmatpush1.bf16.msra.mxu0 %v4471_v60  ;;  %4504 = vmatpush1.bf16.msra.mxu1 %v4503_v63  ;;  %v6108_v60 = vpack.c.bf16 %v2290_v53, %v2286_v50  ;;  %v2288_v63 = vld [vmem:[#allocation10 + $0x290] sm:$0xff]  ;;  %v6148_v47 = vpack.c.bf16 %v2316_v21, %v2312_v28  ;;  %v6150_v50 = vpack.c.bf16 %v2323_v52, %v2319_v12  ;;  %v2321_v53 = vld [vmem:[#allocation10 + $0x398] sm:$0xff] }
 0x772   :  { %4474 = vmatprep.subr.bf16.mxu0 %v4473_v10  ;;  %4506 = vmatprep.subr.bf16.mxu1 %v4505_v13  ;;  %v6111_v6 = vpack.c.bf16 %v2292_v3, %v2288_v63  ;;  %v2295_v10 = vld [vmem:[#allocation10 + $0x2c8] sm:$0xff]  ;;  %v2325_v63 = vld [vmem:[#allocation10 + $0x3b8] sm:$0xff]  ;;  %v2318_v3 = vld [vmem:[#allocation10 + $0x380] sm:$0xff] }
 0x773   :  { %v2299_v13 = vld [vmem:[#allocation10 + $0x2e8] sm:$0xff] }
 0x774   :  { %v6116_v19 = vpack.c.bf16 %v2299_v13, %v2295_v10  ;;  %v6152_v10 = vpack.c.bf16 %v2325_v63, %v2321_v53  ;;  %v2322_v13 = vld [vmem:[#allocation10 + $0x3a0] sm:$0xff] }
 0x775   :  { %4476 = vmatpush1.bf16.msra.mxu0 %v4475_v36  ;;  %4508 = vmatpush1.bf16.msra.mxu1 %v4507_v40  ;;  %v6120_v36 = vpack.c.bf16 %v2298_v29, %v2294_v26  ;;  %v2296_v40 = vld [vmem:[#allocation10 + $0x2d0] sm:$0xff]  ;;  %v6155_v26 = vpack.c.bf16 %v2322_v13, %v2318_v3  ;;  %v6159_v29 = vpack.c.bf16 %v2324_v23, %v2320_v16 }
 0x776   :  { %4478 = vmatprep.subr.bf16.mxu0 %v4477_v48  ;;  %4510 = vmatprep.subr.bf16.mxu1 %v4509_v54  ;;  %v6123_v48 = vpack.c.bf16 %v2300_v44, %v2296_v40  ;;  %v2303_v54 = vld [vmem:[#allocation10 + $0x308] sm:$0xff] }
 0x777   :  { %v6128_v4 = vpack.c.bf16 %v2307_v58, %v2303_v54  ;;  %v2327_v40 = vld [vmem:[#allocation10 + $0x3c8] sm:$0xff]  ;;  %v2329_v54 = vld [vmem:[#allocation10 + $0x3d8] sm:$0xff] }
 0x778   :  { %v2331_v44 = vld [vmem:[#allocation10 + $0x3e8] sm:$0xff] }
 0x779   :  { %4480 = vmatpush1.bf16.msra.mxu0 %v4479_v9  ;;  %4512 = vmatpush1.bf16.msra.mxu1 %v4511_v14  ;;  %v2309_v9 = vld [vmem:[#allocation10 + $0x338] sm:$0xff]  ;;  %v2302_v14 = vld [vmem:[#allocation10 + $0x300] sm:$0xff]  ;;  %v6164_v58 = vpack.c.bf16 %v2331_v44, %v2327_v40 }
 0x77c   :  { %2074 = vmatmul.mubr.f32.vlgmr.msra.gmra.mrb[16].mxu0 %v5772_v49  ;;  %2187 = vmatmul.mubr.f32.vlgmr.msra.gmra.mrb[16].mxu1 %v5772_v49  ;;  %v2271_v49 = vld [vmem:[#allocation10 + $0x208] sm:$0xff] }
 0x77d   :  { %2079 = vmatprep.mubr.f32.mxu0 %v5450_v0  ;;  %2192 = vmatprep.mubr.f32.mxu1 %v5450_v0 }
 0x780   :  { %2080 = vmatmul.mubr.f32.gmra.mrb[18].mxu0 %v5818_v2  ;;  %2193 = vmatmul.mubr.f32.gmra.mrb[18].mxu1 %v5818_v2  ;;  %v2275_v2 = vld [vmem:[#allocation10 + $0x228] sm:$0xff] }
 0x781   :  { %2085 = vmatprep.mubr.f32.mxu0 %v5450_v0  ;;  %2198 = vmatprep.mubr.f32.mxu1 %v5450_v0 }
 0x784   :  { %2086 = vmatmul.mubr.f32.gmra.mrb[20].mxu0 %v5864_v15  ;;  %2199 = vmatmul.mubr.f32.gmra.mrb[20].mxu1 %v5864_v15  ;;  %v2273_v15 = vld [vmem:[#allocation10 + $0x218] sm:$0xff] }
 0x785   :  { %2091 = vmatprep.mubr.f32.mxu0 %v5450_v0  ;;  %2204 = vmatprep.mubr.f32.mxu1 %v5450_v0 }
 0x788   :  { %2092 = vmatmul.mubr.f32.gmra.mrb[22].mxu0 %v5910_v43  ;;  %2205 = vmatmul.mubr.f32.gmra.mrb[22].mxu1 %v5910_v43  ;;  %v6080_v43 = vpack.c.bf16 %v2275_v2, %v2271_v49  ;;  %v2306_v49 = vld [vmem:[#allocation10 + $0x320] sm:$0xff]  ;;  %v6130_v2 = vpack.c.bf16 %v2309_v9, %v2305_v62  ;;  %v2333_v62 = vld [vmem:[#allocation10 + $0x3f8] sm:$0xff] }
 0x789   :  { %2097 = vmatprep.mubr.f32.mxu0 %v5450_v0  ;;  %2210 = vmatprep.mubr.f32.mxu1 %v5450_v0  ;;  %v2326_v9 = vld [vmem:[#allocation10 + $0x3c0] sm:$0xff] }
 0x78a   :  { %4514 = vmatprep.subr.bf16.mxu0 %v6080_v43 }
 0x78c   :  { %2098 = vmatmul.mubr.f32.gmra.mrb[24].mxu0 %v5956_v5  ;;  %2211 = vmatmul.mubr.f32.gmra.mrb[24].mxu1 %v5956_v5  ;;  %v2277_v5 = vld [vmem:[#allocation10 + $0x238] sm:$0xff] }
 0x78d   :  { %2103 = vmatprep.mubr.f32.mxu0 %v5450_v0  ;;  %2216 = vmatprep.mubr.f32.mxu1 %v5450_v0  ;;  %v6082_v25 = vpack.c.bf16 %v2277_v5, %v2273_v15  ;;  %v6132_v15 = vpack.c.bf16 %v2306_v49, %v2302_v14  ;;  %v2304_v5 = vld [vmem:[#allocation10 + $0x310] sm:$0xff]  ;;  %v2330_v14 = vld [vmem:[#allocation10 + $0x3e0] sm:$0xff]  ;;  %v6166_v49 = vpack.c.bf16 %v2333_v62, %v2329_v54 }
 0x78f   :  { %4546 = vmatprep.subr.bf16.mxu1 %v6082_v25 }
 0x790   :  { %2104 = vmatmul.mubr.f32.gmra.mrb[26].mxu0 %v6002_v20  ;;  %2217 = vmatmul.mubr.f32.gmra.mrb[26].mxu1 %v6002_v20  ;;  %v2274_v20 = vld [vmem:[#allocation10 + $0x220] sm:$0xff] }
 0x791   :  { %2109 = vmatprep.mubr.f32.mxu0 %v5450_v0  ;;  %2222 = vmatprep.mubr.f32.mxu1 %v5450_v0  ;;  %v6084_v27 = vpack.c.bf16 %v2274_v20, %v2270_v22  ;;  %v2308_v22 = vld [vmem:[#allocation10 + $0x330] sm:$0xff]  ;;  %v2311_v20 = vld [vmem:[#allocation10 + $0x348] sm:$0xff] }
 0x793   :  { %4516 = vmatpush1.bf16.msra.mxu0 %v6084_v27 }
 0x794   :  { %2110 = vmatmul.mubr.f32.gmra.mrb[28].mxu0 %v6046_v51  ;;  %2223 = vmatmul.mubr.f32.gmra.mrb[28].mxu1 %v6046_v51  ;;  %v6087_v51 = vpack.c.bf16 %v2276_v17, %v2272_v57  ;;  %v6135_v57 = vpack.c.bf16 %v2308_v22, %v2304_v5  ;;  %v2315_v17 = vld [vmem:[#allocation10 + $0x368] sm:$0xff]  ;;  %v6168_v5 = vpack.c.bf16 %v2330_v14, %v2326_v9  ;;  %v2328_v22 = vld [vmem:[#allocation10 + $0x3d0] sm:$0xff] }
 0x795   :  { %2115 = vmatprep.mubr.f32.mxu0 %v5450_v0  ;;  %2228 = vmatprep.mubr.f32.mxu1 %v5450_v0  ;;  %v6139_v38 = vpack.c.bf16 %v2315_v17, %v2311_v20  ;;  %v2332_v20 = vld [vmem:[#allocation10 + $0x3f0] sm:$0xff] }
 0x796   :  { %4548 = vmatpush1.bf16.msra.mxu1 %v6087_v51  ;;  %4518 = vmatprep.subr.bf16.mxu0 %v6092_v24  ;;  %v6171_v17 = vpack.c.bf16 %v2332_v20, %v2328_v22 }
 0x797   :  { %4550 = vmatprep.subr.bf16.mxu1 %v6094_v46  ;;  %4520 = vmatpush1.bf16.msra.mxu0 %v6096_v61 }
 0x798   :  { %4522 = vmatprep.subr.bf16.mxu0 %v6104_v11 }
 0x79a   :  { %4552 = vmatpush1.bf16.msra.mxu1 %v6099_v8 }
 0x79b   :  { %4554 = vmatprep.subr.bf16.mxu1 %v6106_v56  ;;  %4524 = vmatpush1.bf16.msra.mxu0 %v6108_v60 }
 0x79c   :  { %4526 = vmatprep.subr.bf16.mxu0 %v6116_v19 }
 0x79e   :  { %4556 = vmatpush1.bf16.msra.mxu1 %v6111_v6 }
 0x79f   :  { %4558 = vmatprep.subr.bf16.mxu1 %v6118_v32  ;;  %4528 = vmatpush1.bf16.msra.mxu0 %v6120_v36 }
 0x7a0   :  { %4530 = vmatprep.subr.bf16.mxu0 %v6128_v4 }
 0x7a2   :  { %4560 = vmatpush1.bf16.msra.mxu1 %v6123_v48 }
 0x7a3   :  { %4562 = vmatprep.subr.bf16.mxu1 %v6130_v2  ;;  %4532 = vmatpush1.bf16.msra.mxu0 %v6132_v15 }
 0x7a4   :  { %4534 = vmatprep.subr.bf16.mxu0 %v6139_v38 }
 0x7a6   :  { %4564 = vmatpush1.bf16.msra.mxu1 %v6135_v57 }
 0x7a7   :  { %4566 = vmatprep.subr.bf16.mxu1 %v6141_v41  ;;  %4536 = vmatpush1.bf16.msra.mxu0 %v6144_v59 }
 0x7a8   :  { %4538 = vmatprep.subr.bf16.mxu0 %v6150_v50 }
 0x7aa   :  { %4568 = vmatpush1.bf16.msra.mxu1 %v6148_v47 }
 0x7ab   :  { %4570 = vmatprep.subr.bf16.mxu1 %v6152_v10  ;;  %4540 = vmatpush1.bf16.msra.mxu0 %v6155_v26 }
 0x7ac   :  { %4542 = vmatprep.subr.bf16.mxu0 %v6164_v58 }
 0x7ae   :  { %4572 = vmatpush1.bf16.msra.mxu1 %v6159_v29 }
 0x7af   :  { %4574 = vmatprep.subr.bf16.mxu1 %v6166_v49  ;;  %4544 = vmatpush1.bf16.msra.mxu0 %v6168_v5 }
 0x7b0   :  { %4578 = vmatprep.subr.bf16.mxu0 %v6080_v43 }
 0x7b2   :  { %4576 = vmatpush1.bf16.msra.mxu1 %v6171_v17 }
 0x7b3   :  { %4610 = vmatprep.subr.bf16.mxu1 %v6082_v25 }
 0x82f   :  { %v1811_v33 = vpop.f32.mrb[14].mxu0  ;;  %v1882_v42 = vpop.f32.mrb[14].mxu1 }
 0x830   :  { %v5063_v7 = vadd.f32 %v1811_v33, %v5749_v35  ;;  %v1813_v55 = vpop.f32.mrb[15].mxu0  ;;  %v1884_v28 = vpop.f32.mrb[15].mxu1  ;;  %v5079_v53 = vadd.f32 %v1882_v42, %v5759_v45 }
 0x831   :  { %v5064_v21 = vadd.f32 %v1813_v55, %v5754_v39  ;;  %v5080_v63 = vadd.f32 %v1884_v28, %v5766_v1  ;;  %v3819_v1 = vld [vmem:[%s6513_s4 + $0x4] sm:$0xf] }
 0x832   :  { %v1891_v12 = vmul.f32 0.5, %v5063_v7  ;;  %v6230_v42 = vrot.slane %v3819_v1, %v161_v34  ;;  %v6518_v34 = vsub.s32 3, %v5740_v30 }
 0x833   :  { %v1895_v52 = vmul.f32 0.5, %v5064_v21  ;;  %v1900_v3 = vmul.f32 0.5, %v5080_v63  ;;  %v6235_v21 = vrot.slane %v3819_v1, %v165_v37 }
 0x834   :  { %5258 = vtanh.f32 %v1891_v12 }
 0x835   :  { %5260 = vtanh.f32 %v1895_v52 }
 0x836   :  { %5262 = vtanh.f32 %v5079_v53 }
 0x837   :  { %5264 = vtanh.f32 %v1900_v3 }
 0x83e   :  { %v5259_v13 = vpop.eup %5258 }
 0x83f   :  { %v5261_v16 = vpop.eup %5260  ;;  %v1893_v23 = vmul.f32 0.5, %v5259_v13  ;;  %v6241_v13 = vrot.slane %v3819_v1, %v6518_v34 }
 0x840   :  { %v1897_v40 = vmul.f32 0.5, %v5261_v16  ;;  %v5263_v44 = vpop.eup %5262 }
 0x841   :  { %v1894_v35 = vadd.f32 0.5, %v1893_v23  ;;  %v5265_v14 = vpop.eup %5264 }
 0x842   :  { %v1898_v54 = vadd.f32 0.5, %v1897_v40  ;;  %v1902_v45 = vmul.f32 0.5, %v5265_v14 }
 0x843   :  { %v1906_v62 = vmul.f32 %v5263_v44, %v1894_v35 }
 0x844   :  { %v1905_v39 = vmul.f32 %v1898_v54, %v6043_v18  ;;  %v1903_v22 = vadd.f32 0.5, %v1902_v45  ;;  %v6226_v18 = vrot.slane %v3819_v1, %v157_v31 }
 0x846   :  { %v1907_v9 = vadd.f32 %v1906_v62, %v1905_v39 }
 0x848   :  { %5266 = vtanh.f32 %v1907_v9 }
 0x852   :  { %v5267_v20 = vpop.eup %5266 }
 0x853   :  { %v1909_v33 = vmul.f32 %v5267_v20, %v1903_v22 }
 0x855   :  { %2116 = vmatmul.mubr.f32.gmra.mrb[30].mxu0 %v1909_v33  ;;  %2229 = vmatmul.mubr.f32.gmra.mrb[30].mxu1 %v1909_v33 }
 0x856   :  { %2403 = vmatprep.mubr.f32.mxu0 %v5450_v0  ;;  %2474 = vmatprep.mubr.f32.mxu1 %v5450_v0 }
 0x859   :  { %2404 = vmatmul.mubr.f32.vlgmr.msra.gmra.mrb[16].mxu0 %v5450_v0  ;;  %2475 = vmatmul.mubr.f32.vlgmr.msra.gmra.mrb[16].mxu1 %v5450_v0 }
 0x85a   :  { %4580 = vmatpush1.bf16.msra.mxu0 %v6084_v27  ;;  %4612 = vmatpush1.bf16.msra.mxu1 %v6087_v51 }
 0x85b   :  { %4582 = vmatprep.subr.bf16.mxu0 %v6092_v24  ;;  %4614 = vmatprep.subr.bf16.mxu1 %v6094_v46 }
 0x85c   :  { %2575 = vmatprep.mubr.f32.mxu0 %v5450_v0  ;;  %2646 = vmatprep.mubr.f32.mxu1 %v5450_v0 }
 0x85e   :  { %4584 = vmatpush1.bf16.msra.mxu0 %v6096_v61  ;;  %4616 = vmatpush1.bf16.msra.mxu1 %v6099_v8 }
 0x85f   :  { %4586 = vmatprep.subr.bf16.mxu0 %v6104_v11  ;;  %4618 = vmatprep.subr.bf16.mxu1 %v6106_v56 }
 0x862   :  { %4588 = vmatpush1.bf16.msra.mxu0 %v6108_v60  ;;  %4620 = vmatpush1.bf16.msra.mxu1 %v6111_v6 }
 0x863   :  { %4590 = vmatprep.subr.bf16.mxu0 %v6116_v19  ;;  %4622 = vmatprep.subr.bf16.mxu1 %v6118_v32 }
 0x866   :  { %4592 = vmatpush1.bf16.msra.mxu0 %v6120_v36  ;;  %4624 = vmatpush1.bf16.msra.mxu1 %v6123_v48 }
 0x867   :  { %4594 = vmatprep.subr.bf16.mxu0 %v6128_v4  ;;  %4626 = vmatprep.subr.bf16.mxu1 %v6130_v2 }
 0x86a   :  { %4596 = vmatpush1.bf16.msra.mxu0 %v6132_v15  ;;  %4628 = vmatpush1.bf16.msra.mxu1 %v6135_v57 }
 0x86b   :  { %4598 = vmatprep.subr.bf16.mxu0 %v6139_v38  ;;  %4630 = vmatprep.subr.bf16.mxu1 %v6141_v41 }
 0x86e   :  { %4600 = vmatpush1.bf16.msra.mxu0 %v6144_v59  ;;  %4632 = vmatpush1.bf16.msra.mxu1 %v6148_v47 }
 0x86f   :  { %4602 = vmatprep.subr.bf16.mxu0 %v6150_v50  ;;  %4634 = vmatprep.subr.bf16.mxu1 %v6152_v10 }
 0x872   :  { %4604 = vmatpush1.bf16.msra.mxu0 %v6155_v26  ;;  %4636 = vmatpush1.bf16.msra.mxu1 %v6159_v29 }
 0x873   :  { %4606 = vmatprep.subr.bf16.mxu0 %v6164_v58  ;;  %4638 = vmatprep.subr.bf16.mxu1 %v6166_v49 }
 0x876   :  { %4608 = vmatpush1.bf16.msra.mxu0 %v6168_v5  ;;  %4640 = vmatpush1.bf16.msra.mxu1 %v6171_v17 }
 0x877   :  { %4642 = vmatprep.subr.bf16.mxu0 %v6080_v43  ;;  %4674 = vmatprep.subr.bf16.mxu1 %v6082_v25 }
 0x92c   :  { %v2405_v7 = vpop.f32.mrb[16].mxu0  ;;  %v2476_v55 = vpop.f32.mrb[16].mxu1 }
 0x92d   :  { %v5081_v28 = vadd.f32 %v2405_v7, %v6226_v18  ;;  %v2407_v12 = vpop.f32.mrb[17].mxu0  ;;  %v2478_v52 = vpop.f32.mrb[17].mxu1  ;;  %v5097_v31 = vadd.f32 %v2476_v55, %v6235_v21 }
 0x92e   :  { %v5082_v53 = vadd.f32 %v2407_v12, %v6230_v42  ;;  %v5098_v16 = vadd.f32 %v2478_v52, %v6241_v13 }
 0x92f   :  { %v2485_v63 = vmul.f32 0.5, %v5081_v28 }
 0x930   :  { %v2489_v3 = vmul.f32 0.5, %v5082_v53  ;;  %v2494_v23 = vmul.f32 0.5, %v5098_v16 }
 0x931   :  { %5268 = vtanh.f32 %v2485_v63 }
 0x932   :  { %5270 = vtanh.f32 %v2489_v3 }
 0x933   :  { %5272 = vtanh.f32 %v5097_v31 }
 0x934   :  { %5274 = vtanh.f32 %v2494_v23 }
 0x93b   :  { %v5269_v37 = vpop.eup %5268 }
 0x93c   :  { %v5271_v40 = vpop.eup %5270  ;;  %v2487_v35 = vmul.f32 0.5, %v5269_v37 }
 0x93d   :  { %v2491_v44 = vmul.f32 0.5, %v5271_v40  ;;  %v5273_v62 = vpop.eup %5272 }
 0x93e   :  { %v2488_v54 = vadd.f32 0.5, %v2487_v35  ;;  %v5275_v30 = vpop.eup %5274 }
 0x93f   :  { %v2492_v39 = vadd.f32 0.5, %v2491_v44  ;;  %v2496_v22 = vmul.f32 0.5, %v5275_v30 }
 0x940   :  { %v2500_v9 = vmul.f32 %v5273_v62, %v2488_v54 }
 0x941   :  { %v2499_v14 = vmul.f32 0.0, %v2492_v39  ;;  %v2497_v20 = vadd.f32 0.5, %v2496_v22 }
 0x943   :  { %v6244_v45 = vadd.f32 %v2500_v9, %v2499_v14 }
 0x945   :  { %5276 = vtanh.f32 %v6244_v45 }
 0x94f   :  { %v5277_v33 = vpop.eup %5276 }
 0x950   :  { %v2503_v1 = vmul.f32 %v5277_v33, %v2497_v20 }
 0x952   :  { %2576 = vmatmul.mubr.f32.vlgmr.msra.gmra.mrb[18].mxu0 %v2503_v1  ;;  %2647 = vmatmul.mubr.f32.vlgmr.msra.gmra.mrb[18].mxu1 %v2503_v1 }
 0x953   :  { %4644 = vmatpush1.bf16.msra.mxu0 %v6084_v27  ;;  %4676 = vmatpush1.bf16.msra.mxu1 %v6087_v51 }
 0x954   :  { %4646 = vmatprep.subr.bf16.mxu0 %v6092_v24  ;;  %4678 = vmatprep.subr.bf16.mxu1 %v6094_v46 }
 0x955   :  { %2747 = vmatprep.mubr.f32.mxu0 %v5450_v0  ;;  %2818 = vmatprep.mubr.f32.mxu1 %v5450_v0 }
 0x957   :  { %4648 = vmatpush1.bf16.msra.mxu0 %v6096_v61  ;;  %4680 = vmatpush1.bf16.msra.mxu1 %v6099_v8 }
 0x958   :  { %4650 = vmatprep.subr.bf16.mxu0 %v6104_v11  ;;  %4682 = vmatprep.subr.bf16.mxu1 %v6106_v56 }
 0x95b   :  { %4652 = vmatpush1.bf16.msra.mxu0 %v6108_v60  ;;  %4684 = vmatpush1.bf16.msra.mxu1 %v6111_v6 }
 0x95c   :  { %4654 = vmatprep.subr.bf16.mxu0 %v6116_v19  ;;  %4686 = vmatprep.subr.bf16.mxu1 %v6118_v32 }
 0x95f   :  { %4656 = vmatpush1.bf16.msra.mxu0 %v6120_v36  ;;  %4688 = vmatpush1.bf16.msra.mxu1 %v6123_v48 }
 0x960   :  { %4658 = vmatprep.subr.bf16.mxu0 %v6128_v4  ;;  %4690 = vmatprep.subr.bf16.mxu1 %v6130_v2 }
 0x963   :  { %4660 = vmatpush1.bf16.msra.mxu0 %v6132_v15  ;;  %4692 = vmatpush1.bf16.msra.mxu1 %v6135_v57 }
 0x964   :  { %4662 = vmatprep.subr.bf16.mxu0 %v6139_v38  ;;  %4694 = vmatprep.subr.bf16.mxu1 %v6141_v41 }
 0x967   :  { %4664 = vmatpush1.bf16.msra.mxu0 %v6144_v59  ;;  %4696 = vmatpush1.bf16.msra.mxu1 %v6148_v47 }
 0x968   :  { %4666 = vmatprep.subr.bf16.mxu0 %v6150_v50  ;;  %4698 = vmatprep.subr.bf16.mxu1 %v6152_v10 }
 0x96b   :  { %4668 = vmatpush1.bf16.msra.mxu0 %v6155_v26  ;;  %4700 = vmatpush1.bf16.msra.mxu1 %v6159_v29 }
 0x96c   :  { %4670 = vmatprep.subr.bf16.mxu0 %v6164_v58  ;;  %4702 = vmatprep.subr.bf16.mxu1 %v6166_v49 }
 0x96f   :  { %4672 = vmatpush1.bf16.msra.mxu0 %v6168_v5  ;;  %4704 = vmatpush1.bf16.msra.mxu1 %v6171_v17 }
 0x970   :  { %4706 = vmatprep.subr.bf16.mxu0 %v6080_v43  ;;  %4738 = vmatprep.subr.bf16.mxu1 %v6082_v25 }
 0xa25   :  { %v2577_v7 = vpop.f32.mrb[18].mxu0  ;;  %v2648_v55 = vpop.f32.mrb[18].mxu1 }
 0xa26   :  { %v5083_v28 = vadd.f32 %v2577_v7, %v6226_v18  ;;  %v2579_v12 = vpop.f32.mrb[19].mxu0  ;;  %v2650_v52 = vpop.f32.mrb[19].mxu1  ;;  %v5099_v31 = vadd.f32 %v2648_v55, %v6235_v21 }
 0xa27   :  { %v5084_v53 = vadd.f32 %v2579_v12, %v6230_v42  ;;  %v5100_v34 = vadd.f32 %v2650_v52, %v6241_v13 }
 0xa28   :  { %v2657_v63 = vmul.f32 0.5, %v5083_v28 }
 0xa29   :  { %v2661_v3 = vmul.f32 0.5, %v5084_v53  ;;  %v2666_v16 = vmul.f32 0.5, %v5100_v34 }
 0xa2a   :  { %5278 = vtanh.f32 %v2657_v63 }
 0xa2b   :  { %5280 = vtanh.f32 %v2661_v3 }
 0xa2c   :  { %5282 = vtanh.f32 %v5099_v31 }
 0xa2d   :  { %5284 = vtanh.f32 %v2666_v16 }
 0xa34   :  { %v5279_v23 = vpop.eup %5278 }
 0xa35   :  { %v5281_v37 = vpop.eup %5280  ;;  %v2659_v40 = vmul.f32 0.5, %v5279_v23 }
 0xa36   :  { %v2663_v35 = vmul.f32 0.5, %v5281_v37  ;;  %v5283_v54 = vpop.eup %5282 }
 0xa37   :  { %v2660_v44 = vadd.f32 0.5, %v2659_v40  ;;  %v5285_v30 = vpop.eup %5284 }
 0xa38   :  { %v2664_v62 = vadd.f32 0.5, %v2663_v35  ;;  %v2668_v22 = vmul.f32 0.5, %v5285_v30 }
 0xa39   :  { %v2672_v39 = vmul.f32 %v5283_v54, %v2660_v44 }
 0xa3a   :  { %v2671_v9 = vmul.f32 %v2664_v62, %v6244_v45  ;;  %v2669_v20 = vadd.f32 0.5, %v2668_v22 }
 0xa3c   :  { %v6286_v14 = vadd.f32 %v2672_v39, %v2671_v9 }
 0xa3e   :  { %5286 = vtanh.f32 %v6286_v14 }
 0xa48   :  { %v5287_v33 = vpop.eup %5286 }
 0xa49   :  { %v2675_v1 = vmul.f32 %v5287_v33, %v2669_v20 }
 0xa4b   :  { %2748 = vmatmul.mubr.f32.vlgmr.msra.gmra.mrb[20].mxu0 %v2675_v1  ;;  %2819 = vmatmul.mubr.f32.vlgmr.msra.gmra.mrb[20].mxu1 %v2675_v1 }
 0xa4c   :  { %4708 = vmatpush1.bf16.msra.mxu0 %v6084_v27  ;;  %4740 = vmatpush1.bf16.msra.mxu1 %v6087_v51 }
 0xa4d   :  { %4710 = vmatprep.subr.bf16.mxu0 %v6092_v24  ;;  %4742 = vmatprep.subr.bf16.mxu1 %v6094_v46 }
 0xa4e   :  { %2919 = vmatprep.mubr.f32.mxu0 %v5450_v0  ;;  %2990 = vmatprep.mubr.f32.mxu1 %v5450_v0 }
 0xa50   :  { %4712 = vmatpush1.bf16.msra.mxu0 %v6096_v61  ;;  %4744 = vmatpush1.bf16.msra.mxu1 %v6099_v8 }
 0xa51   :  { %4714 = vmatprep.subr.bf16.mxu0 %v6104_v11  ;;  %4746 = vmatprep.subr.bf16.mxu1 %v6106_v56 }
 0xa54   :  { %4716 = vmatpush1.bf16.msra.mxu0 %v6108_v60  ;;  %4748 = vmatpush1.bf16.msra.mxu1 %v6111_v6 }
 0xa55   :  { %4718 = vmatprep.subr.bf16.mxu0 %v6116_v19  ;;  %4750 = vmatprep.subr.bf16.mxu1 %v6118_v32 }
 0xa58   :  { %4720 = vmatpush1.bf16.msra.mxu0 %v6120_v36  ;;  %4752 = vmatpush1.bf16.msra.mxu1 %v6123_v48 }
 0xa59   :  { %4722 = vmatprep.subr.bf16.mxu0 %v6128_v4  ;;  %4754 = vmatprep.subr.bf16.mxu1 %v6130_v2 }
 0xa5c   :  { %4724 = vmatpush1.bf16.msra.mxu0 %v6132_v15  ;;  %4756 = vmatpush1.bf16.msra.mxu1 %v6135_v57 }
 0xa5d   :  { %4726 = vmatprep.subr.bf16.mxu0 %v6139_v38  ;;  %4758 = vmatprep.subr.bf16.mxu1 %v6141_v41 }
 0xa60   :  { %4728 = vmatpush1.bf16.msra.mxu0 %v6144_v59  ;;  %4760 = vmatpush1.bf16.msra.mxu1 %v6148_v47 }
 0xa61   :  { %4730 = vmatprep.subr.bf16.mxu0 %v6150_v50  ;;  %4762 = vmatprep.subr.bf16.mxu1 %v6152_v10 }
 0xa64   :  { %4732 = vmatpush1.bf16.msra.mxu0 %v6155_v26  ;;  %4764 = vmatpush1.bf16.msra.mxu1 %v6159_v29 }
 0xa65   :  { %4734 = vmatprep.subr.bf16.mxu0 %v6164_v58  ;;  %4766 = vmatprep.subr.bf16.mxu1 %v6166_v49 }
 0xa68   :  { %4736 = vmatpush1.bf16.msra.mxu0 %v6168_v5  ;;  %4768 = vmatpush1.bf16.msra.mxu1 %v6171_v17 }
 0xa69   :  { %4770 = vmatprep.subr.bf16.mxu0 %v6080_v43  ;;  %4802 = vmatprep.subr.bf16.mxu1 %v6082_v25 }
 0xb1e   :  { %v2749_v45 = vpop.f32.mrb[20].mxu0  ;;  %v2820_v7 = vpop.f32.mrb[20].mxu1 }
 0xb1f   :  { %v5085_v55 = vadd.f32 %v2749_v45, %v6226_v18  ;;  %v2751_v28 = vpop.f32.mrb[21].mxu0  ;;  %v2822_v12 = vpop.f32.mrb[21].mxu1  ;;  %v5101_v3 = vadd.f32 %v2820_v7, %v6235_v21 }
 0xb20   :  { %v5086_v52 = vadd.f32 %v2751_v28, %v6230_v42  ;;  %v5102_v31 = vadd.f32 %v2822_v12, %v6241_v13 }
 0xb21   :  { %v2829_v53 = vmul.f32 0.5, %v5085_v55 }
 0xb22   :  { %v2833_v63 = vmul.f32 0.5, %v5086_v52  ;;  %v2838_v34 = vmul.f32 0.5, %v5102_v31 }
 0xb23   :  { %5288 = vtanh.f32 %v2829_v53 }
 0xb24   :  { %5290 = vtanh.f32 %v2833_v63 }
 0xb25   :  { %5292 = vtanh.f32 %v5101_v3 }
 0xb26   :  { %5294 = vtanh.f32 %v2838_v34 }
 0xb2d   :  { %v5289_v16 = vpop.eup %5288 }
 0xb2e   :  { %v5291_v23 = vpop.eup %5290  ;;  %v2831_v37 = vmul.f32 0.5, %v5289_v16 }
 0xb2f   :  { %v2835_v40 = vmul.f32 0.5, %v5291_v23  ;;  %v5293_v44 = vpop.eup %5292 }
 0xb30   :  { %v2832_v35 = vadd.f32 0.5, %v2831_v37  ;;  %v5295_v30 = vpop.eup %5294 }
 0xb31   :  { %v2836_v54 = vadd.f32 0.5, %v2835_v40  ;;  %v2840_v22 = vmul.f32 0.5, %v5295_v30 }
 0xb32   :  { %v2844_v62 = vmul.f32 %v5293_v44, %v2832_v35 }
 0xb33   :  { %v2843_v39 = vmul.f32 %v2836_v54, %v6286_v14  ;;  %v2841_v20 = vadd.f32 0.5, %v2840_v22 }
 0xb35   :  { %v6328_v9 = vadd.f32 %v2844_v62, %v2843_v39 }
 0xb37   :  { %5296 = vtanh.f32 %v6328_v9 }
 0xb41   :  { %v5297_v33 = vpop.eup %5296 }
 0xb42   :  { %v2847_v1 = vmul.f32 %v5297_v33, %v2841_v20 }
 0xb44   :  { %2920 = vmatmul.mubr.f32.vlgmr.msra.gmra.mrb[22].mxu0 %v2847_v1  ;;  %2991 = vmatmul.mubr.f32.vlgmr.msra.gmra.mrb[22].mxu1 %v2847_v1 }
 0xb45   :  { %4772 = vmatpush1.bf16.msra.mxu0 %v6084_v27  ;;  %4804 = vmatpush1.bf16.msra.mxu1 %v6087_v51 }
 0xb46   :  { %4774 = vmatprep.subr.bf16.mxu0 %v6092_v24  ;;  %4806 = vmatprep.subr.bf16.mxu1 %v6094_v46 }
 0xb47   :  { %3091 = vmatprep.mubr.f32.mxu0 %v5450_v0  ;;  %3162 = vmatprep.mubr.f32.mxu1 %v5450_v0 }
 0xb49   :  { %4776 = vmatpush1.bf16.msra.mxu0 %v6096_v61  ;;  %4808 = vmatpush1.bf16.msra.mxu1 %v6099_v8 }
 0xb4a   :  { %4778 = vmatprep.subr.bf16.mxu0 %v6104_v11  ;;  %4810 = vmatprep.subr.bf16.mxu1 %v6106_v56 }
 0xb4d   :  { %4780 = vmatpush1.bf16.msra.mxu0 %v6108_v60  ;;  %4812 = vmatpush1.bf16.msra.mxu1 %v6111_v6 }
 0xb4e   :  { %4782 = vmatprep.subr.bf16.mxu0 %v6116_v19  ;;  %4814 = vmatprep.subr.bf16.mxu1 %v6118_v32 }
 0xb51   :  { %4784 = vmatpush1.bf16.msra.mxu0 %v6120_v36  ;;  %4816 = vmatpush1.bf16.msra.mxu1 %v6123_v48 }
 0xb52   :  { %4786 = vmatprep.subr.bf16.mxu0 %v6128_v4  ;;  %4818 = vmatprep.subr.bf16.mxu1 %v6130_v2 }
 0xb55   :  { %4788 = vmatpush1.bf16.msra.mxu0 %v6132_v15  ;;  %4820 = vmatpush1.bf16.msra.mxu1 %v6135_v57 }
 0xb56   :  { %4790 = vmatprep.subr.bf16.mxu0 %v6139_v38  ;;  %4822 = vmatprep.subr.bf16.mxu1 %v6141_v41 }
 0xb59   :  { %4792 = vmatpush1.bf16.msra.mxu0 %v6144_v59  ;;  %4824 = vmatpush1.bf16.msra.mxu1 %v6148_v47 }
 0xb5a   :  { %4794 = vmatprep.subr.bf16.mxu0 %v6150_v50  ;;  %4826 = vmatprep.subr.bf16.mxu1 %v6152_v10 }
 0xb5d   :  { %4796 = vmatpush1.bf16.msra.mxu0 %v6155_v26  ;;  %4828 = vmatpush1.bf16.msra.mxu1 %v6159_v29 }
 0xb5e   :  { %4798 = vmatprep.subr.bf16.mxu0 %v6164_v58  ;;  %4830 = vmatprep.subr.bf16.mxu1 %v6166_v49 }
 0xb61   :  { %4800 = vmatpush1.bf16.msra.mxu0 %v6168_v5  ;;  %4832 = vmatpush1.bf16.msra.mxu1 %v6171_v17 }
 0xb62   :  { %4834 = vmatprep.subr.bf16.mxu0 %v6080_v43  ;;  %4866 = vmatprep.subr.bf16.mxu1 %v6082_v25 }
 0xc17   :  { %v2921_v14 = vpop.f32.mrb[22].mxu0  ;;  %v2992_v45 = vpop.f32.mrb[22].mxu1 }
 0xc18   :  { %v5087_v7 = vadd.f32 %v2921_v14, %v6226_v18  ;;  %v2923_v55 = vpop.f32.mrb[23].mxu0  ;;  %v2994_v28 = vpop.f32.mrb[23].mxu1  ;;  %v5103_v63 = vadd.f32 %v2992_v45, %v6235_v21 }
 0xc19   :  { %v5088_v12 = vadd.f32 %v2923_v55, %v6230_v42  ;;  %v5104_v3 = vadd.f32 %v2994_v28, %v6241_v13 }
 0xc1a   :  { %v3001_v52 = vmul.f32 0.5, %v5087_v7 }
 0xc1b   :  { %v3005_v53 = vmul.f32 0.5, %v5088_v12  ;;  %v3010_v31 = vmul.f32 0.5, %v5104_v3 }
 0xc1c   :  { %5298 = vtanh.f32 %v3001_v52 }
 0xc1d   :  { %5300 = vtanh.f32 %v3005_v53 }
 0xc1e   :  { %5302 = vtanh.f32 %v5103_v63 }
 0xc1f   :  { %5304 = vtanh.f32 %v3010_v31 }
 0xc26   :  { %v5299_v34 = vpop.eup %5298 }
 0xc27   :  { %v5301_v16 = vpop.eup %5300  ;;  %v3003_v23 = vmul.f32 0.5, %v5299_v34 }
 0xc28   :  { %v3007_v37 = vmul.f32 0.5, %v5301_v16  ;;  %v5303_v35 = vpop.eup %5302 }
 0xc29   :  { %v3004_v40 = vadd.f32 0.5, %v3003_v23  ;;  %v5305_v30 = vpop.eup %5304 }
 0xc2a   :  { %v3008_v44 = vadd.f32 0.5, %v3007_v37  ;;  %v3012_v22 = vmul.f32 0.5, %v5305_v30 }
 0xc2b   :  { %v3016_v54 = vmul.f32 %v5303_v35, %v3004_v40 }
 0xc2c   :  { %v3015_v62 = vmul.f32 %v3008_v44, %v6328_v9  ;;  %v3013_v20 = vadd.f32 0.5, %v3012_v22 }
 0xc2e   :  { %v6370_v39 = vadd.f32 %v3016_v54, %v3015_v62 }
 0xc30   :  { %5306 = vtanh.f32 %v6370_v39 }
 0xc3a   :  { %v5307_v33 = vpop.eup %5306 }
 0xc3b   :  { %v3019_v1 = vmul.f32 %v5307_v33, %v3013_v20 }
 0xc3d   :  { %3092 = vmatmul.mubr.f32.vlgmr.msra.gmra.mrb[24].mxu0 %v3019_v1  ;;  %3163 = vmatmul.mubr.f32.vlgmr.msra.gmra.mrb[24].mxu1 %v3019_v1 }
 0xc3e   :  { %4836 = vmatpush1.bf16.msra.mxu0 %v6084_v27  ;;  %4868 = vmatpush1.bf16.msra.mxu1 %v6087_v51 }
 0xc3f   :  { %4838 = vmatprep.subr.bf16.mxu0 %v6092_v24  ;;  %4870 = vmatprep.subr.bf16.mxu1 %v6094_v46 }
 0xc40   :  { %3263 = vmatprep.mubr.f32.mxu0 %v5450_v0  ;;  %3334 = vmatprep.mubr.f32.mxu1 %v5450_v0 }
 0xc42   :  { %4840 = vmatpush1.bf16.msra.mxu0 %v6096_v61  ;;  %4872 = vmatpush1.bf16.msra.mxu1 %v6099_v8 }
 0xc43   :  { %4842 = vmatprep.subr.bf16.mxu0 %v6104_v11  ;;  %4874 = vmatprep.subr.bf16.mxu1 %v6106_v56 }
 0xc46   :  { %4844 = vmatpush1.bf16.msra.mxu0 %v6108_v60  ;;  %4876 = vmatpush1.bf16.msra.mxu1 %v6111_v6 }
 0xc47   :  { %4846 = vmatprep.subr.bf16.mxu0 %v6116_v19  ;;  %4878 = vmatprep.subr.bf16.mxu1 %v6118_v32 }
 0xc4a   :  { %4848 = vmatpush1.bf16.msra.mxu0 %v6120_v36  ;;  %4880 = vmatpush1.bf16.msra.mxu1 %v6123_v48 }
 0xc4b   :  { %4850 = vmatprep.subr.bf16.mxu0 %v6128_v4  ;;  %4882 = vmatprep.subr.bf16.mxu1 %v6130_v2 }
 0xc4e   :  { %4852 = vmatpush1.bf16.msra.mxu0 %v6132_v15  ;;  %4884 = vmatpush1.bf16.msra.mxu1 %v6135_v57 }
 0xc4f   :  { %4854 = vmatprep.subr.bf16.mxu0 %v6139_v38  ;;  %4886 = vmatprep.subr.bf16.mxu1 %v6141_v41 }
 0xc52   :  { %4856 = vmatpush1.bf16.msra.mxu0 %v6144_v59  ;;  %4888 = vmatpush1.bf16.msra.mxu1 %v6148_v47 }
 0xc53   :  { %4858 = vmatprep.subr.bf16.mxu0 %v6150_v50  ;;  %4890 = vmatprep.subr.bf16.mxu1 %v6152_v10 }
 0xc56   :  { %4860 = vmatpush1.bf16.msra.mxu0 %v6155_v26  ;;  %4892 = vmatpush1.bf16.msra.mxu1 %v6159_v29 }
 0xc57   :  { %4862 = vmatprep.subr.bf16.mxu0 %v6164_v58  ;;  %4894 = vmatprep.subr.bf16.mxu1 %v6166_v49 }
 0xc5a   :  { %4864 = vmatpush1.bf16.msra.mxu0 %v6168_v5  ;;  %4896 = vmatpush1.bf16.msra.mxu1 %v6171_v17 }
 0xc5b   :  { %4898 = vmatprep.subr.bf16.mxu0 %v6080_v43  ;;  %4930 = vmatprep.subr.bf16.mxu1 %v6082_v25 }
 0xd10   :  { %v3093_v9 = vpop.f32.mrb[24].mxu0  ;;  %v3164_v14 = vpop.f32.mrb[24].mxu1 }
 0xd11   :  { %v5089_v45 = vadd.f32 %v3093_v9, %v6226_v18  ;;  %v3095_v7 = vpop.f32.mrb[25].mxu0  ;;  %v3166_v55 = vpop.f32.mrb[25].mxu1  ;;  %v5105_v53 = vadd.f32 %v3164_v14, %v6235_v21 }
 0xd12   :  { %v5090_v28 = vadd.f32 %v3095_v7, %v6230_v42  ;;  %v5106_v63 = vadd.f32 %v3166_v55, %v6241_v13 }
 0xd13   :  { %v3173_v12 = vmul.f32 0.5, %v5089_v45 }
 0xd14   :  { %v3177_v52 = vmul.f32 0.5, %v5090_v28  ;;  %v3182_v3 = vmul.f32 0.5, %v5106_v63 }
 0xd15   :  { %5308 = vtanh.f32 %v3173_v12 }
 0xd16   :  { %5310 = vtanh.f32 %v3177_v52 }
 0xd17   :  { %5312 = vtanh.f32 %v5105_v53 }
 0xd18   :  { %5314 = vtanh.f32 %v3182_v3 }
 0xd1f   :  { %v5309_v31 = vpop.eup %5308 }
 0xd20   :  { %v5311_v34 = vpop.eup %5310  ;;  %v3175_v16 = vmul.f32 0.5, %v5309_v31 }
 0xd21   :  { %v3179_v23 = vmul.f32 0.5, %v5311_v34  ;;  %v5313_v40 = vpop.eup %5312 }
 0xd22   :  { %v3176_v37 = vadd.f32 0.5, %v3175_v16  ;;  %v5315_v30 = vpop.eup %5314 }
 0xd23   :  { %v3180_v35 = vadd.f32 0.5, %v3179_v23  ;;  %v3184_v22 = vmul.f32 0.5, %v5315_v30 }
 0xd24   :  { %v3188_v44 = vmul.f32 %v5313_v40, %v3176_v37 }
 0xd25   :  { %v3187_v54 = vmul.f32 %v3180_v35, %v6370_v39  ;;  %v3185_v20 = vadd.f32 0.5, %v3184_v22 }
 0xd27   :  { %v6412_v62 = vadd.f32 %v3188_v44, %v3187_v54 }
 0xd29   :  { %5316 = vtanh.f32 %v6412_v62 }
 0xd33   :  { %v5317_v33 = vpop.eup %5316 }
 0xd34   :  { %v3191_v1 = vmul.f32 %v5317_v33, %v3185_v20  ;;  %v3714_v33 = vld [vmem:[#allocation11 + $0x18] sm:$0xff] }
 0xd36   :  { %3264 = vmatmul.mubr.f32.vlgmr.msra.gmra.mrb[26].mxu0 %v3191_v1  ;;  %3335 = vmatmul.mubr.f32.vlgmr.msra.gmra.mrb[26].mxu1 %v3191_v1 }
 0xd37   :  { %4900 = vmatpush1.bf16.msra.mxu0 %v6084_v27  ;;  %4932 = vmatpush1.bf16.msra.mxu1 %v6087_v51 }
 0xd38   :  { %4902 = vmatprep.subr.bf16.mxu0 %v6092_v24  ;;  %4934 = vmatprep.subr.bf16.mxu1 %v6094_v46 }
 0xd39   :  { %3435 = vmatprep.mubr.f32.mxu0 %v5450_v0  ;;  %3506 = vmatprep.mubr.f32.mxu1 %v5450_v0 }
 0xd3b   :  { %4904 = vmatpush1.bf16.msra.mxu0 %v6096_v61  ;;  %4936 = vmatpush1.bf16.msra.mxu1 %v6099_v8 }
 0xd3c   :  { %4906 = vmatprep.subr.bf16.mxu0 %v6104_v11  ;;  %4938 = vmatprep.subr.bf16.mxu1 %v6106_v56 }
 0xd3f   :  { %4908 = vmatpush1.bf16.msra.mxu0 %v6108_v60  ;;  %4940 = vmatpush1.bf16.msra.mxu1 %v6111_v6 }
 0xd40   :  { %4910 = vmatprep.subr.bf16.mxu0 %v6116_v19  ;;  %4942 = vmatprep.subr.bf16.mxu1 %v6118_v32 }
 0xd43   :  { %4912 = vmatpush1.bf16.msra.mxu0 %v6120_v36  ;;  %4944 = vmatpush1.bf16.msra.mxu1 %v6123_v48 }
 0xd44   :  { %4914 = vmatprep.subr.bf16.mxu0 %v6128_v4  ;;  %4946 = vmatprep.subr.bf16.mxu1 %v6130_v2 }
 0xd47   :  { %4916 = vmatpush1.bf16.msra.mxu0 %v6132_v15  ;;  %4948 = vmatpush1.bf16.msra.mxu1 %v6135_v57 }
 0xd48   :  { %4918 = vmatprep.subr.bf16.mxu0 %v6139_v38  ;;  %4950 = vmatprep.subr.bf16.mxu1 %v6141_v41 }
 0xd4b   :  { %4920 = vmatpush1.bf16.msra.mxu0 %v6144_v59  ;;  %4952 = vmatpush1.bf16.msra.mxu1 %v6148_v47 }
 0xd4c   :  { %4922 = vmatprep.subr.bf16.mxu0 %v6150_v50  ;;  %4954 = vmatprep.subr.bf16.mxu1 %v6152_v10 }
 0xd4f   :  { %4924 = vmatpush1.bf16.msra.mxu0 %v6155_v26  ;;  %4956 = vmatpush1.bf16.msra.mxu1 %v6159_v29 }
 0xd50   :  { %4926 = vmatprep.subr.bf16.mxu0 %v6164_v58  ;;  %4958 = vmatprep.subr.bf16.mxu1 %v6166_v49 }
 0xd53   :  { %4928 = vmatpush1.bf16.msra.mxu0 %v6168_v5  ;;  %4960 = vmatpush1.bf16.msra.mxu1 %v6171_v17 }
 0xd54   :  { %4962 = vmatprep.subr.bf16.mxu0 %v6080_v43  ;;  %4994 = vmatprep.subr.bf16.mxu1 %v6082_v25 }
 0xe09   :  { %v3265_v39 = vpop.f32.mrb[26].mxu0  ;;  %v3336_v9 = vpop.f32.mrb[26].mxu1 }
 0xe0a   :  { %v5091_v14 = vadd.f32 %v3265_v39, %v6226_v18  ;;  %v3267_v45 = vpop.f32.mrb[27].mxu0  ;;  %v3338_v7 = vpop.f32.mrb[27].mxu1  ;;  %v5107_v52 = vadd.f32 %v3336_v9, %v6235_v21  ;;  %v3715_v39 = vld [vmem:[#allocation11 + $0x20] sm:$0xff]  ;;  %v3716_v9 = vld [vmem:[#allocation11 + $0x28] sm:$0xff] }
 0xe0b   :  { %v5092_v55 = vadd.f32 %v3267_v45, %v6230_v42  ;;  %v5108_v53 = vadd.f32 %v3338_v7, %v6241_v13  ;;  %v3717_v45 = vld [vmem:[#allocation11 + $0x30] sm:$0xff]  ;;  %v3718_v7 = vld [vmem:[#allocation11 + $0x38] sm:$0xff] }
 0xe0c   :  { %v3345_v28 = vmul.f32 0.5, %v5091_v14  ;;  %v5032_v14 = vpack.c.bf16 %v3716_v9, %v3715_v39 }
 0xe0d   :  { %v3349_v12 = vmul.f32 0.5, %v5092_v55  ;;  %v3354_v43 = vmul.f32 0.5, %v5108_v53  ;;  %v5035_v55 = vpack.c.bf16 %v3718_v7, %v3717_v45  ;;  %v3721_v53 = vld [vmem:[#allocation11 + $0x50] sm:$0xff] }
 0xe0e   :  { %5318 = vtanh.f32 %v3345_v28  ;;  %v3719_v28 = vld [vmem:[#allocation11 + $0x40] sm:$0xff] }
 0xe0f   :  { %5320 = vtanh.f32 %v3349_v12  ;;  %v3720_v12 = vld [vmem:[#allocation11 + $0x48] sm:$0xff] }
 0xe10   :  { %5322 = vtanh.f32 %v5107_v52  ;;  %v5038_v52 = vpack.c.bf16 %v3720_v12, %v3719_v28 }
 0xe11   :  { %5324 = vtanh.f32 %v3354_v43  ;;  %v3722_v43 = vld [vmem:[#allocation11 + $0x58] sm:$0xff] }
 0xe18   :  { %v5319_v63 = vpop.eup %5318 }
 0xe19   :  { %v5321_v25 = vpop.eup %5320  ;;  %v3347_v3 = vmul.f32 0.5, %v5319_v63  ;;  %v5041_v63 = vpack.c.bf16 %v3722_v43, %v3721_v53 }
 0xe1a   :  { %v3351_v31 = vmul.f32 0.5, %v5321_v25  ;;  %v5323_v16 = vpop.eup %5322  ;;  %v3723_v25 = vld [vmem:[#allocation11 + $0x60] sm:$0xff] }
 0xe1b   :  { %v3348_v34 = vadd.f32 0.5, %v3347_v3  ;;  %v5325_v44 = vpop.eup %5324  ;;  %v3724_v3 = vld [vmem:[#allocation11 + $0x68] sm:$0xff] }
 0xe1c   :  { %v3352_v23 = vadd.f32 0.5, %v3351_v31  ;;  %v3356_v54 = vmul.f32 0.5, %v5325_v44  ;;  %v5044_v31 = vpack.c.bf16 %v3724_v3, %v3723_v25 }
 0xe1d   :  { %v3360_v37 = vmul.f32 %v5323_v16, %v3348_v34  ;;  %v3725_v34 = vld [vmem:[#allocation11 + $0x70] sm:$0xff]  ;;  %v3726_v16 = vld [vmem:[#allocation11 + $0x78] sm:$0xff] }
 0xe1e   :  { %v3359_v40 = vmul.f32 %v3352_v23, %v6412_v62  ;;  %v3357_v30 = vadd.f32 0.5, %v3356_v54  ;;  %v3713_v62 = vld [vmem:[#allocation11 + $0x10] sm:$0xff]  ;;  %v5047_v23 = vpack.c.bf16 %v3726_v16, %v3725_v34 }
 0xe1f   :  { %v5029_v1 = vpack.c.bf16 %v3714_v33, %v3713_v62 }
 0xe20   :  { %v6454_v35 = vadd.f32 %v3360_v37, %v3359_v40 }
 0xe22   :  { %5326 = vtanh.f32 %v6454_v35 }
 0xe2c   :  { %v5327_v22 = vpop.eup %5326 }
 0xe2d   :  { %v3363_v20 = vmul.f32 %v5327_v22, %v3357_v30 }
 0xe2f   :  { %3436 = vmatmul.mubr.f32.vlgmr.msra.gmra.mrb[28].mxu0 %v3363_v20  ;;  %3507 = vmatmul.mubr.f32.vlgmr.msra.gmra.mrb[28].mxu1 %v3363_v20 }
 0xe30   :  { %4964 = vmatpush1.bf16.msra.mxu0 %v6084_v27  ;;  %4996 = vmatpush1.bf16.msra.mxu1 %v6087_v51 }
 0xe31   :  { %4966 = vmatprep.subr.bf16.mxu0 %v6092_v24  ;;  %4998 = vmatprep.subr.bf16.mxu1 %v6094_v46 }
 0xe32   :  { %3607 = vmatprep.mubr.f32.mxu0 %v5450_v0  ;;  %3678 = vmatprep.mubr.f32.mxu1 %v5450_v0 }
 0xe34   :  { %4968 = vmatpush1.bf16.msra.mxu0 %v6096_v61  ;;  %5000 = vmatpush1.bf16.msra.mxu1 %v6099_v8 }
 0xe35   :  { %4970 = vmatprep.subr.bf16.mxu0 %v6104_v11  ;;  %5002 = vmatprep.subr.bf16.mxu1 %v6106_v56 }
 0xe38   :  { %4972 = vmatpush1.bf16.msra.mxu0 %v6108_v60  ;;  %5004 = vmatpush1.bf16.msra.mxu1 %v6111_v6 }
 0xe39   :  { %4974 = vmatprep.subr.bf16.mxu0 %v6116_v19  ;;  %5006 = vmatprep.subr.bf16.mxu1 %v6118_v32 }
 0xe3c   :  { %4976 = vmatpush1.bf16.msra.mxu0 %v6120_v36  ;;  %5008 = vmatpush1.bf16.msra.mxu1 %v6123_v48 }
 0xe3d   :  { %4978 = vmatprep.subr.bf16.mxu0 %v6128_v4  ;;  %5010 = vmatprep.subr.bf16.mxu1 %v6130_v2 }
 0xe40   :  { %4980 = vmatpush1.bf16.msra.mxu0 %v6132_v15  ;;  %5012 = vmatpush1.bf16.msra.mxu1 %v6135_v57 }
 0xe41   :  { %4982 = vmatprep.subr.bf16.mxu0 %v6139_v38  ;;  %5014 = vmatprep.subr.bf16.mxu1 %v6141_v41 }
 0xe44   :  { %4984 = vmatpush1.bf16.msra.mxu0 %v6144_v59  ;;  %5016 = vmatpush1.bf16.msra.mxu1 %v6148_v47 }
 0xe45   :  { %4986 = vmatprep.subr.bf16.mxu0 %v6150_v50  ;;  %5018 = vmatprep.subr.bf16.mxu1 %v6152_v10 }
 0xe48   :  { %4988 = vmatpush1.bf16.msra.mxu0 %v6155_v26  ;;  %5020 = vmatpush1.bf16.msra.mxu1 %v6159_v29 }
 0xe49   :  { %4990 = vmatprep.subr.bf16.mxu0 %v6164_v58  ;;  %5022 = vmatprep.subr.bf16.mxu1 %v6166_v49  ;;  %v3711_v58 = vld [vmem:[#allocation11] sm:$0xff]  ;;  %v3712_v49 = vld [vmem:[#allocation11 + $0x8] sm:$0xff] }
 0xe4c   :  { %4992 = vmatpush1.bf16.msra.mxu0 %v6168_v5  ;;  %5024 = vmatpush1.bf16.msra.mxu1 %v6171_v17  ;;  %v5026_v5 = vpack.c.bf16 %v3712_v49, %v3711_v58  ;;  %v5451_v17 = vmov 0.0|0.0  }
 0xe4d   :  { %5025 = vmatprep.subr.bf16.mxu0 %v5451_v17 }
 0xf02   :  { %v3437_v27 = vpop.f32.mrb[28].mxu0  ;;  %v3508_v51 = vpop.f32.mrb[28].mxu1 }
 0xf03   :  { %v5093_v24 = vadd.f32 %v3437_v27, %v6226_v18  ;;  %v3439_v46 = vpop.f32.mrb[29].mxu0  ;;  %v3510_v61 = vpop.f32.mrb[29].mxu1  ;;  %v5109_v60 = vadd.f32 %v3508_v51, %v6235_v21 }
 0xf04   :  { %v5094_v8 = vadd.f32 %v3439_v46, %v6230_v42  ;;  %v5110_v6 = vadd.f32 %v3510_v61, %v6241_v13 }
 0xf05   :  { %v3517_v11 = vmul.f32 0.5, %v5093_v24 }
 0xf06   :  { %v3521_v56 = vmul.f32 0.5, %v5094_v8  ;;  %v3526_v19 = vmul.f32 0.5, %v5110_v6 }
 0xf07   :  { %5328 = vtanh.f32 %v3517_v11 }
 0xf08   :  { %5330 = vtanh.f32 %v3521_v56 }
 0xf09   :  { %5332 = vtanh.f32 %v5109_v60 }
 0xf0a   :  { %5334 = vtanh.f32 %v3526_v19 }
 0xf11   :  { %v5329_v32 = vpop.eup %5328 }
 0xf12   :  { %v5331_v36 = vpop.eup %5330  ;;  %v3519_v48 = vmul.f32 0.5, %v5329_v32 }
 0xf13   :  { %v3523_v4 = vmul.f32 0.5, %v5331_v36  ;;  %v5333_v15 = vpop.eup %5332 }
 0xf14   :  { %v3520_v2 = vadd.f32 0.5, %v3519_v48  ;;  %v5335_v47 = vpop.eup %5334 }
 0xf15   :  { %v3524_v57 = vadd.f32 0.5, %v3523_v4  ;;  %v3528_v50 = vmul.f32 0.5, %v5335_v47 }
 0xf16   :  { %v3532_v38 = vmul.f32 %v5333_v15, %v3520_v2 }
 0xf17   :  { %v3531_v41 = vmul.f32 %v3524_v57, %v6454_v35  ;;  %v3529_v10 = vadd.f32 0.5, %v3528_v50 }
 0xf19   :  { %v6494_v59 = vadd.f32 %v3532_v38, %v3531_v41 }
 0xf1b   :  { %5336 = vtanh.f32 %v6494_v59 }
 0xf25   :  { %v5337_v26 = vpop.eup %5336 }
 0xf26   :  { %v3535_v29 = vmul.f32 %v5337_v26, %v3529_v10 }
 0xf28   :  { %3608 = vmatmul.mubr.f32.vlgmr.msra.gmra.mrb[30].mxu0 %v3535_v29  ;;  %3679 = vmatmul.mubr.f32.vlgmr.msra.gmra.mrb[30].mxu1 %v3535_v29 }
 0xf29   :  { %5027 = vmatpush3.bf16.msra.mxu0 %v5026_v5  ;;  %3870 = vmatprep.mubr.msk.f32.mxu0 %vm5452_vm0, %v5450_v0 }
 0xf2a   :  { %5028 = vmatprep.subr.bf16.mxu0 %v5451_v17 }
 0xf2d   :  { %5030 = vmatpush3.bf16.msra.mxu0 %v5029_v1 }
 0xf2e   :  { %5031 = vmatprep.subr.bf16.mxu0 %v5451_v17 }
 0xf31   :  { %5033 = vmatpush3.bf16.msra.mxu0 %v5032_v14 }
 0xf32   :  { %5034 = vmatprep.subr.bf16.mxu0 %v5451_v17 }
 0xf35   :  { %5036 = vmatpush3.bf16.msra.mxu0 %v5035_v55 }
 0xf36   :  { %5037 = vmatprep.subr.bf16.mxu0 %v5451_v17 }
 0xf39   :  { %5039 = vmatpush3.bf16.msra.mxu0 %v5038_v52 }
 0xf3a   :  { %5040 = vmatprep.subr.bf16.mxu0 %v5451_v17 }
 0xf3d   :  { %5042 = vmatpush3.bf16.msra.mxu0 %v5041_v63 }
 0xf3e   :  { %5043 = vmatprep.subr.bf16.mxu0 %v5451_v17 }
 0xf41   :  { %5045 = vmatpush3.bf16.msra.mxu0 %v5044_v31 }
 0xf42   :  { %5046 = vmatprep.subr.bf16.mxu0 %v5451_v17 }
 0xf45   :  { %5048 = vmatpush3.bf16.msra.mxu0 %v5047_v23 }
 0xffb   :  { %v3609_v37 = vpop.f32.mrb[30].mxu0  ;;  %v3680_v40 = vpop.f32.mrb[30].mxu1 }
 0xffc   :  { %v5095_v35 = vadd.f32 %v3609_v37, %v6226_v18  ;;  %v3611_v44 = vpop.f32.mrb[31].mxu0  ;;  %v3682_v54 = vpop.f32.mrb[31].mxu1  ;;  %v5111_v27 = vadd.f32 %v3680_v40, %v6235_v21 }
 0xffd   :  { %v5096_v30 = vadd.f32 %v3611_v44, %v6230_v42  ;;  %v5112_v51 = vadd.f32 %v3682_v54, %v6241_v13  ;;  %v3820_v13 = vld [vmem:[%s6515_s6] ss:$0 sm:$0xff] }
 0xffe   :  { %v3689_v22 = vmul.f32 0.5, %v5095_v35 }
 0xfff   :  { %v3693_v20 = vmul.f32 0.5, %v5096_v30  ;;  %v3698_v24 = vmul.f32 0.5, %v5112_v51 }
0x1000   :  { %5338 = vtanh.f32 %v3689_v22 }
0x1001   :  { %5340 = vtanh.f32 %v3693_v20 }
0x1002   :  { %5342 = vtanh.f32 %v5111_v27 }
0x1003   :  { %5344 = vtanh.f32 %v3698_v24 }
0x100a   :  { %v5339_v46 = vpop.eup %5338 }
0x100b   :  { %v5341_v0 = vpop.eup %5340  ;;  %v3691_v61 = vmul.f32 0.5, %v5339_v46 }
0x100c   :  { %v3695_v8 = vmul.f32 0.5, %v5341_v0  ;;  %v5343_v11 = vpop.eup %5342 }
0x100d   :  { %v3692_v18 = vadd.f32 0.5, %v3691_v61  ;;  %v5345_v19 = vpop.eup %5344 }
0x100e   :  { %v3696_v56 = vadd.f32 0.5, %v3695_v8  ;;  %v3700_v21 = vmul.f32 0.5, %v5345_v19 }
0x100f   :  { %v3704_v60 = vmul.f32 %v5343_v11, %v3692_v18 }
0x1010   :  { %v3703_v42 = vmul.f32 %v3696_v56, %v6494_v59  ;;  %v3701_v32 = vadd.f32 0.5, %v3700_v21 }
0x1012   :  { %v3705_v6 = vadd.f32 %v3704_v60, %v3703_v42 }
0x1014   :  { %5346 = vtanh.f32 %v3705_v6 }
0x101e   :  { %v5347_v36 = vpop.eup %5346 }
0x101f   :  { %v3707_v48 = vmul.f32 %v5347_v36, %v3701_v32 }
0x1021   :  { %3871 = vmatmul.mubr.f32.vlgmr.msra.gmra.mrb[32].mxu0 %v3707_v48 }
0x10f4   :  { %v3800_v4 = vpop.f32.mrb[32].mxu0 }
0x10f5   :  { %v3801_v2 = vadd.f32 %v3820_v13, %v3800_v4  ;;  %v3872_v15 = vpop.f32.mrb[33].mxu0 }
0x10f7   :  { %3804 = vst [vmem:[%s6516_s7] sm:$0xff] %v3801_v2 }
0x10f8   :  { %3809 = vsyncpa [#allocation7], 1 }
0x10f9   :  { %3810 = vsyncpa [#allocation9], 1 }
0x10fa   :  { %3811 = vsyncpa [#allocation12], 1 }

</bundles_post_ra>
